<compile_context>
chip_gen: v6e
topology: v6e:2x2x1
jax: 0.10.0
libtpu: 0.0.40
codegen_flags: <defaults>
</compile_context>

<pallas_src>
import functools

import jax
import jax.numpy as jnp
from jax.experimental import pallas as pl
from jax.experimental.pallas import tpu as pltpu


# ----------------------------------------------------------------------------
# Fused kernel: QKV projection + multi-head attention with relative embeddings
# ----------------------------------------------------------------------------
def _fused_mha_rel_kernel(x_ref, w_ref, b_ref, r_ref, bias_ref, o_ref, *,
                          bias_per_batch):
    Nb, T, D = x_ref.shape
    H, P, Dh = r_ref.shape
    L = (P - 1) // 2
    scale = 0.5 / (Dh ** 0.5)        # both reference scalings, folded into q

    # --- fused QKV projection on the MXU: (Nb*T, D) @ (D, 3D), bf16 in / f32 acc ---
    x = x_ref[...].reshape(Nb * T, D).astype(jnp.bfloat16)
    qkv = jnp.dot(x, w_ref[...], preferred_element_type=jnp.float32)
    qkv = qkv + b_ref[...]                                       # [Nb*T, 3D] f32

    # scale folded into q (one [Nb*T, D] VPU multiply), then bf16 for the MXU
    q_all = (qkv[:, :D] * scale).astype(jnp.bfloat16)
    k_all = qkv[:, D:2 * D].astype(jnp.bfloat16)
    v_all = qkv[:, 2 * D:].astype(jnp.bfloat16)

    # --- clipped relative-position selection masks, built ONCE per grid step ---
    row = jax.lax.broadcasted_iota(jnp.int32, (T, T), 0)
    col = jax.lax.broadcasted_iota(jnp.int32, (T, T), 1)
    rel = jnp.clip(col - row, -L, L) + L                         # [T, T] int32
    p_lo = max(0, L - (T - 1))                                   # reachable buckets only
    p_hi = min(P, L + T)
    sel = [(rel == p).astype(jnp.float32) for p in range(p_lo, p_hi)]

    # group heads so each output store covers >= 128 lanes (lane-dense vst)
    hpg = 1 if Dh >= 128 else max(1, 128 // Dh)
    if H % hpg != 0:
        hpg = 1

    for b in range(Nb):                                          # static unroll
        bias = bias_ref[b] if bias_per_batch else bias_ref[0]    # [T, T] f32
        r0 = b * T
        for g in range(0, H, hpg):
            outs = []
            for h in range(g, g + hpg):
                c0 = h * Dh
                q_h = q_all[r0:r0 + T, c0:c0 + Dh]
                k_h = k_all[r0:r0 + T, c0:c0 + Dh]
                v_h = v_all[r0:r0 + T, c0:c0 + Dh]
                # one MXU launch per head: q @ [k ; R_h]^T -> [T, T+P]
                kr = jnp.concatenate([k_h, r_ref[h]], axis=0)
                s = jax.lax.dot_general(q_h, kr, (((1,), (1,)), ((), ())),
                                        preferred_element_type=jnp.float32)
                dot_term = s[:, :T]                               # [T, T]
                qr = s[:, T:]                                     # [T, P]

                # rel_term[i, j] = qr[i, rel[i, j]]  (hoisted-mask multiply-add)
                logits = dot_term + bias
                for idx, p in enumerate(range(p_lo, p_hi)):
                    logits = logits + sel[idx] * qr[:, p:p + 1]

                m = jnp.max(logits, axis=-1, keepdims=True)
                e = jnp.exp(logits - m)
                # approx (EUP) reciprocal; swap for an exact divide if strict
                # f32 parity with the PyTorch reference is required.
                attn_w = e * pl.reciprocal(jnp.sum(e, axis=-1, keepdims=True),
                                           approx=True)
                outs.append(jnp.dot(attn_w.astype(jnp.bfloat16), v_h,
                                    preferred_element_type=jnp.float32))
            blk = outs[0] if len(outs) == 1 else jnp.concatenate(outs, axis=-1)
            o_ref[b, :, g * Dh:(g + hpg) * Dh] = blk.astype(o_ref.dtype)


# ----------------------------------------------------------------------------
# pallas_call wrapper
# ----------------------------------------------------------------------------
def _pick_batch_block(N, T):
    """Pack several batch elements per grid step (amortize per-step overhead and
    MXU fill at small T) while keeping >= 2 grid steps so both v7x TCs get work."""
    best = 1
    for nb in range(1, N + 1):
        if N % nb != 0:
            continue
        if nb * T > 512:
            continue
        if N // nb >= 2 or N == 1:
            best = nb
    return best


def _vmem_limit_bytes():
    """Per-generation scoped-VMEM budget (v7x: 64 MiB/core, v5e/v6e: 128 MiB),
    with ~20% headroom for compiler-internal scratch."""
    try:
        return int(pltpu.get_tpu_info().vmem_capacity_bytes * 0.8)
    except Exception:
        return 32 * 1024 * 1024        # conservative fallback


def fused_mha(x, w_packed, b_packed, R, bias):
    N, T, D = x.shape
    D3 = w_packed.shape[1]
    H, P, Dh = R.shape
    Nm = bias.shape[0]
    bias_per_batch = (Nm == N) and (N > 1)
    nb = _pick_batch_block(N, T)

    resident = dict(pipeline_mode=pl.Buffered(1))    # constant index_map -> 1 buffer
    in_specs = [
        pl.BlockSpec((nb, T, D), lambda n: (n, 0, 0)),                 # x slab
        pl.BlockSpec((D, D3), lambda n: (0, 0), **resident),           # packed W (bf16)
        pl.BlockSpec((1, D3), lambda n: (0, 0), **resident),           # packed bias (f32)
        pl.BlockSpec((H, P, Dh), lambda n: (0, 0, 0), **resident),     # R (bf16)
    ]
    if bias_per_batch:
        in_specs.append(pl.BlockSpec((nb, T, T), lambda n: (n, 0, 0)))
    else:
        in_specs.append(pl.BlockSpec((1, T, T), lambda n: (0, 0, 0), **resident))

    kernel = functools.partial(_fused_mha_rel_kernel,
                               bias_per_batch=bias_per_batch)
    return pl.pallas_call(
        kernel,
        out_shape=jax.ShapeDtypeStruct((N, T, D), x.dtype),
        grid=(N // nb,),
        in_specs=in_specs,
        out_specs=pl.BlockSpec((nb, T, D), lambda n: (n, 0, 0)),
        compiler_params=pltpu.CompilerParams(
            dimension_semantics=("parallel",),
            vmem_limit_bytes=_vmem_limit_bytes()),
    )(x, w_packed, b_packed, R, bias)


# ----------------------------------------------------------------------------
# Module wrapper (parameter setup / one-time packing is plain-JAX glue)
# ----------------------------------------------------------------------------
class MHAWithRelativeEmbeddingsPallas:
    def __init__(self, num_heads, head_dim, max_length, key):
        self.num_heads = num_heads
        self.head_dim = head_dim
        self.max_length = max_length
        H, Dh = num_heads, head_dim
        d_model = H * Dh
        k1, k2, k3 = jax.random.split(key, 3)
        bound_w = 1.0 / d_model ** 0.5
        # nn.Linear(d_model, 3*d_model): weight [3D, D], bias [3D] (PyTorch layout)
        self.w = jax.random.uniform(k1, (3 * d_model, d_model),
                                    minval=-bound_w, maxval=bound_w,
                                    dtype=jnp.float32)
        self.b = jax.random.uniform(k2, (3 * d_model,),
                                    minval=-bound_w, maxval=bound_w,
                                    dtype=jnp.float32)
        # R ~ U(-1/sqrt(head_dim), 1/sqrt(head_dim))  (fill_emb_matrix)
        bound_r = 1.0 / head_dim ** 0.5
        self.R = jax.random.uniform(k3, (H, 2 * max_length + 1, Dh),
                                    minval=-bound_r, maxval=bound_r,
                                    dtype=jnp.float32)

        # One-time packing for the kernel: columns ordered [q | k | v] with
        # per-head-contiguous features:  col = s*D + h*Dh + d
        # (PyTorch row index after reshape(.., H, Dh, 3) is h*Dh*3 + d*3 + s).
        D = d_model
        w_r = self.w.reshape(H, Dh, 3, D)                       # (h, d, s, j)
        self.w_packed = (jnp.transpose(w_r, (2, 0, 1, 3))
                         .reshape(3 * D, D).T.astype(jnp.bfloat16))
        self.b_packed = jnp.transpose(self.b.reshape(H, Dh, 3),
                                      (2, 0, 1)).reshape(1, 3 * D)   # stays f32
        self.R_bf16 = self.R.astype(jnp.bfloat16)

    def __call__(self, x, mask=None):
        # NOTE: faithful to the PyTorch reference only for N == T (it builds
        # relative positions from arange(batch)); the kernel itself is T-only.
        N, T, D = x.shape
        if mask is None:
            bias = jnp.zeros((1, T, T), dtype=jnp.float32)      # resident in-kernel
        else:
            mask = jnp.asarray(mask, jnp.float32)               # [Nm, 1, T, T]
            bias = ((1.0 - mask) * -10000.0).reshape(mask.shape[0], T, T)
        return fused_mha(x, self.w_packed, self.b_packed, self.R_bf16, bias)


# ----------------------------------------------------------------------------
# Pure-JAX reference (mirrors the PyTorch forward) for the correctness check
# ----------------------------------------------------------------------------
def reference_forward(mod, x, mask=None):
    N, T, D = x.shape
    H, Dh, L = mod.num_heads, mod.head_dim, mod.max_length
    qkv = x @ mod.w.T + mod.b
    qkv = qkv.reshape(N, T, H, Dh, 3).transpose(4, 0, 2, 1, 3)
    q, k, v = qkv[0], qkv[1], qkv[2]
    dot_term = jnp.einsum('nhid,nhjd->nhij', q, k)
    idx = jnp.arange(T)
    rel = jnp.clip(idx[None, :] - idx[:, None], -L, L) + L
    r = mod.R[:, rel, :]                                         # [H, T, T, Dh]
    rel_term = jnp.einsum('nhid,hijd->nhij', q, r)
    logits = (dot_term + rel_term) * 0.5 * (1.0 / Dh ** 0.5)
    if mask is not None:
        logits = logits + (1.0 - mask) * -10000.0
    w = jax.nn.softmax(logits, axis=-1)
    o = jnp.einsum('nhij,nhjd->nhid', w, v)
    return o.transpose(0, 2, 1, 3).reshape(N, T, H * Dh)


if __name__ == "__main__":
    num_heads, head_dim, max_length = 4, 32, 8
    N = T = 8                      # the reference forward requires N == T
    D = num_heads * head_dim       # 128

    key = jax.random.PRNGKey(0)
    kx, kp, km = jax.random.split(key, 3)

    mod = MHAWithRelativeEmbeddingsPallas(num_heads, head_dim, max_length, kp)
    x = jax.random.normal(kx, (N, T, D), dtype=jnp.float32)

    # tolerance accounts for bf16 MXU operands + approx (EUP) softmax reciprocal
    rtol = atol = 3e-2

    # (1) batch-invariant causal mask [1, 1, T, T] -> exercises the resident-bias path
    causal = jnp.broadcast_to(jnp.tril(jnp.ones((T, T), jnp.float32)),
                              (1, 1, T, T))
    out = jax.block_until_ready(mod(x, causal))
    ref = reference_forward(mod, x, causal)
    assert out.shape == (N, T, D)
    assert jnp.allclose(out, ref, rtol=rtol, atol=atol), (
        f"causal mismatch, max abs err {float(jnp.max(jnp.abs(out - ref)))}")

    # (2) per-batch padding+causal mask [N, 1, T, T] -> exercises the per-batch path
    lens = jax.random.randint(km, (N,), 1, T + 1)                         # [1, T]
    keyvalid = (jnp.arange(T)[None, :] < lens[:, None]).astype(jnp.float32)
    mask_b = (jnp.tril(jnp.ones((T, T), jnp.float32))[None, :, :]
              * keyvalid[:, None, :])[:, None, :, :]
    out_b = jax.block_until_ready(mod(x, mask_b))
    ref_b = reference_forward(mod, x, mask_b)
    assert jnp.allclose(out_b, ref_b, rtol=rtol, atol=atol), (
        f"per-batch mismatch, max abs err {float(jnp.max(jnp.abs(out_b - ref_b)))}")

    print("KERNEL_OK")
</pallas_src>

<mosaic_0001>
module attributes {stable_mosaic.version = 11 : i64} {
  func.func @_fused_mha_rel_kernel(%arg0: i32, %arg1: memref<4x8x128xf32, #tpu.memory_space<vmem>>, %arg2: memref<128x384xbf16, #tpu.memory_space<vmem>>, %arg3: memref<1x384xf32, #tpu.memory_space<vmem>>, %arg4: memref<4x17x32xbf16, #tpu.memory_space<vmem>>, %arg5: memref<1x8x8xf32, #tpu.memory_space<vmem>>, %arg6: memref<4x8x128xf32, #tpu.memory_space<vmem>>) attributes {dimension_semantics = [#tpu.dimension_semantics<parallel>], iteration_bounds = array<i64: 2>, scalar_prefetch = 0 : i64, scratch_operands = 0 : i64, tpu.core_type = #tpu.core_type<tc>, window_params = [{transform_indices = @transform_0, window_bounds = array<i64: 4, 8, 128>}, {pipeline_mode = #tpu.pipeline_mode<synchronous>, transform_indices = @transform_1, window_bounds = array<i64: 128, 384>}, {pipeline_mode = #tpu.pipeline_mode<synchronous>, transform_indices = @transform_2, window_bounds = array<i64: 1, 384>}, {pipeline_mode = #tpu.pipeline_mode<synchronous>, transform_indices = @transform_3, window_bounds = array<i64: 4, 17, 32>}, {pipeline_mode = #tpu.pipeline_mode<synchronous>, transform_indices = @transform_4, window_bounds = array<i64: 1, 8, 8>}, {transform_indices = @transform_5, window_bounds = array<i64: 4, 8, 128>}]} {
    %c0 = arith.constant 0 : index
    %c0_0 = arith.constant 0 : index
    %c0_1 = arith.constant 0 : index
    %0 = vector.load %arg1[%c0, %c0_0, %c0_1] : memref<4x8x128xf32, #tpu.memory_space<vmem>>, vector<4x8x128xf32>
    %1 = vector.shape_cast %0 : vector<4x8x128xf32> to vector<32x128xf32>
    %2 = arith.truncf %1 : vector<32x128xf32> to vector<32x128xbf16>
    %c0_2 = arith.constant 0 : index
    %c0_3 = arith.constant 0 : index
    %3 = vector.load %arg2[%c0_2, %c0_3] : memref<128x384xbf16, #tpu.memory_space<vmem>>, vector<128x384xbf16>
    %cst = arith.constant dense<0.000000e+00> : vector<32x384xf32>
    %4 = tpu.matmul %2, %3, %cst {dimension_numbers = #tpu.dot_dimension_numbers<[1], [0], [0], [1], [0, 0, 1, 1], [], []>} : vector<32x128xbf16>, vector<128x384xbf16>, vector<32x384xf32> -> vector<32x384xf32>
    %c0_4 = arith.constant 0 : index
    %c0_5 = arith.constant 0 : index
    %5 = vector.load %arg3[%c0_4, %c0_5] : memref<1x384xf32, #tpu.memory_space<vmem>>, vector<1x384xf32>
    %6 = vector.broadcast %5 : vector<1x384xf32> to vector<32x384xf32>
    %7 = arith.addf %4, %6 : vector<32x384xf32>
    %8 = vector.extract_strided_slice %7 {offsets = [0, 0], sizes = [32, 128], strides = [1, 1]} : vector<32x384xf32> to vector<32x128xf32>
    %cst_6 = arith.constant 0.0883883461 : f32
    %9 = vector.broadcast %cst_6 : f32 to vector<32x128xf32>
    %10 = arith.mulf %8, %9 : vector<32x128xf32>
    %11 = arith.truncf %10 : vector<32x128xf32> to vector<32x128xbf16>
    %12 = vector.extract_strided_slice %7 {offsets = [0, 128], sizes = [32, 128], strides = [1, 1]} : vector<32x384xf32> to vector<32x128xf32>
    %13 = arith.truncf %12 : vector<32x128xf32> to vector<32x128xbf16>
    %14 = vector.extract_strided_slice %7 {offsets = [0, 256], sizes = [32, 128], strides = [1, 1]} : vector<32x384xf32> to vector<32x128xf32>
    %15 = arith.truncf %14 : vector<32x128xf32> to vector<32x128xbf16>
    %16 = tpu.iota {dimensions = array<i32: 0>} : vector<8x8xi32>
    %17 = tpu.iota {dimensions = array<i32: 1>} : vector<8x8xi32>
    %18 = arith.subi %17, %16 : vector<8x8xi32>
    %c-8_i32 = arith.constant -8 : i32
    %c8_i32 = arith.constant 8 : i32
    %19 = vector.broadcast %c-8_i32 : i32 to vector<8x8xi32>
    %20 = arith.maxsi %19, %18 : vector<8x8xi32>
    %21 = vector.broadcast %c8_i32 : i32 to vector<8x8xi32>
    %22 = arith.minsi %21, %20 : vector<8x8xi32>
    %c8_i32_7 = arith.constant 8 : i32
    %23 = vector.broadcast %c8_i32_7 : i32 to vector<8x8xi32>
    %24 = arith.addi %22, %23 : vector<8x8xi32>
    %c1_i32 = arith.constant 1 : i32
    %25 = vector.broadcast %c1_i32 : i32 to vector<8x8xi32>
    %26 = arith.cmpi eq, %24, %25 : vector<8x8xi32>
    %27 = arith.extui %26 : vector<8x8xi1> to vector<8x8xi32>
    %28 = arith.sitofp %27 : vector<8x8xi32> to vector<8x8xf32>
    %c2_i32 = arith.constant 2 : i32
    %29 = vector.broadcast %c2_i32 : i32 to vector<8x8xi32>
    %30 = arith.cmpi eq, %24, %29 : vector<8x8xi32>
    %31 = arith.extui %30 : vector<8x8xi1> to vector<8x8xi32>
    %32 = arith.sitofp %31 : vector<8x8xi32> to vector<8x8xf32>
    %c3_i32 = arith.constant 3 : i32
    %33 = vector.broadcast %c3_i32 : i32 to vector<8x8xi32>
    %34 = arith.cmpi eq, %24, %33 : vector<8x8xi32>
    %35 = arith.extui %34 : vector<8x8xi1> to vector<8x8xi32>
    %36 = arith.sitofp %35 : vector<8x8xi32> to vector<8x8xf32>
    %c4_i32 = arith.constant 4 : i32
    %37 = vector.broadcast %c4_i32 : i32 to vector<8x8xi32>
    %38 = arith.cmpi eq, %24, %37 : vector<8x8xi32>
    %39 = arith.extui %38 : vector<8x8xi1> to vector<8x8xi32>
    %40 = arith.sitofp %39 : vector<8x8xi32> to vector<8x8xf32>
    %c5_i32 = arith.constant 5 : i32
    %41 = vector.broadcast %c5_i32 : i32 to vector<8x8xi32>
    %42 = arith.cmpi eq, %24, %41 : vector<8x8xi32>
    %43 = arith.extui %42 : vector<8x8xi1> to vector<8x8xi32>
    %44 = arith.sitofp %43 : vector<8x8xi32> to vector<8x8xf32>
    %c6_i32 = arith.constant 6 : i32
    %45 = vector.broadcast %c6_i32 : i32 to vector<8x8xi32>
    %46 = arith.cmpi eq, %24, %45 : vector<8x8xi32>
    %47 = arith.extui %46 : vector<8x8xi1> to vector<8x8xi32>
    %48 = arith.sitofp %47 : vector<8x8xi32> to vector<8x8xf32>
    %c7_i32 = arith.constant 7 : i32
    %49 = vector.broadcast %c7_i32 : i32 to vector<8x8xi32>
    %50 = arith.cmpi eq, %24, %49 : vector<8x8xi32>
    %51 = arith.extui %50 : vector<8x8xi1> to vector<8x8xi32>
    %52 = arith.sitofp %51 : vector<8x8xi32> to vector<8x8xf32>
    %c8_i32_8 = arith.constant 8 : i32
    %53 = vector.broadcast %c8_i32_8 : i32 to vector<8x8xi32>
    %54 = arith.cmpi eq, %24, %53 : vector<8x8xi32>
    %55 = arith.extui %54 : vector<8x8xi1> to vector<8x8xi32>
    %56 = arith.sitofp %55 : vector<8x8xi32> to vector<8x8xf32>
    %c9_i32 = arith.constant 9 : i32
    %57 = vector.broadcast %c9_i32 : i32 to vector<8x8xi32>
    %58 = arith.cmpi eq, %24, %57 : vector<8x8xi32>
    %59 = arith.extui %58 : vector<8x8xi1> to vector<8x8xi32>
    %60 = arith.sitofp %59 : vector<8x8xi32> to vector<8x8xf32>
    %c10_i32 = arith.constant 10 : i32
    %61 = vector.broadcast %c10_i32 : i32 to vector<8x8xi32>
    %62 = arith.cmpi eq, %24, %61 : vector<8x8xi32>
    %63 = arith.extui %62 : vector<8x8xi1> to vector<8x8xi32>
    %64 = arith.sitofp %63 : vector<8x8xi32> to vector<8x8xf32>
    %c11_i32 = arith.constant 11 : i32
    %65 = vector.broadcast %c11_i32 : i32 to vector<8x8xi32>
    %66 = arith.cmpi eq, %24, %65 : vector<8x8xi32>
    %67 = arith.extui %66 : vector<8x8xi1> to vector<8x8xi32>
    %68 = arith.sitofp %67 : vector<8x8xi32> to vector<8x8xf32>
    %c12_i32 = arith.constant 12 : i32
    %69 = vector.broadcast %c12_i32 : i32 to vector<8x8xi32>
    %70 = arith.cmpi eq, %24, %69 : vector<8x8xi32>
    %71 = arith.extui %70 : vector<8x8xi1> to vector<8x8xi32>
    %72 = arith.sitofp %71 : vector<8x8xi32> to vector<8x8xf32>
    %c13_i32 = arith.constant 13 : i32
    %73 = vector.broadcast %c13_i32 : i32 to vector<8x8xi32>
    %74 = arith.cmpi eq, %24, %73 : vector<8x8xi32>
    %75 = arith.extui %74 : vector<8x8xi1> to vector<8x8xi32>
    %76 = arith.sitofp %75 : vector<8x8xi32> to vector<8x8xf32>
    %c14_i32 = arith.constant 14 : i32
    %77 = vector.broadcast %c14_i32 : i32 to vector<8x8xi32>
    %78 = arith.cmpi eq, %24, %77 : vector<8x8xi32>
    %79 = arith.extui %78 : vector<8x8xi1> to vector<8x8xi32>
    %80 = arith.sitofp %79 : vector<8x8xi32> to vector<8x8xf32>
    %c15_i32 = arith.constant 15 : i32
    %81 = vector.broadcast %c15_i32 : i32 to vector<8x8xi32>
    %82 = arith.cmpi eq, %24, %81 : vector<8x8xi32>
    %83 = arith.extui %82 : vector<8x8xi1> to vector<8x8xi32>
    %84 = arith.sitofp %83 : vector<8x8xi32> to vector<8x8xf32>
    %c0_9 = arith.constant 0 : index
    %c0_10 = arith.constant 0 : index
    %c0_11 = arith.constant 0 : index
    %85 = vector.load %arg5[%c0_9, %c0_10, %c0_11] : memref<1x8x8xf32, #tpu.memory_space<vmem>>, vector<1x8x8xf32>
    %86 = vector.shape_cast %85 : vector<1x8x8xf32> to vector<8x8xf32>
    %87 = vector.extract_strided_slice %11 {offsets = [0, 0], sizes = [8, 32], strides = [1, 1]} : vector<32x128xbf16> to vector<8x32xbf16>
    %88 = vector.extract_strided_slice %13 {offsets = [0, 0], sizes = [8, 32], strides = [1, 1]} : vector<32x128xbf16> to vector<8x32xbf16>
    %89 = vector.extract_strided_slice %15 {offsets = [0, 0], sizes = [8, 32], strides = [1, 1]} : vector<32x128xbf16> to vector<8x32xbf16>
    %c0_12 = arith.constant 0 : index
    %c0_13 = arith.constant 0 : index
    %c0_14 = arith.constant 0 : index
    %90 = vector.load %arg4[%c0_12, %c0_13, %c0_14] : memref<4x17x32xbf16, #tpu.memory_space<vmem>>, vector<1x17x32xbf16>
    %91 = vector.shape_cast %90 : vector<1x17x32xbf16> to vector<17x32xbf16>
    %92 = tpu.concatenate %88, %91 in 0 : vector<8x32xbf16>, vector<17x32xbf16> -> vector<25x32xbf16>
    %cst_15 = arith.constant dense<0.000000e+00> : vector<8x25xf32>
    %93 = tpu.matmul %87, %92, %cst_15 {dimension_numbers = #tpu.dot_dimension_numbers<[1], [1], [0], [0], [0, 0, 1, 0], [], []>} : vector<8x32xbf16>, vector<25x32xbf16>, vector<8x25xf32> -> vector<8x25xf32>
    %94 = vector.extract_strided_slice %93 {offsets = [0, 0], sizes = [8, 8], strides = [1, 1]} : vector<8x25xf32> to vector<8x8xf32>
    %95 = vector.extract_strided_slice %93 {offsets = [0, 8], sizes = [8, 17], strides = [1, 1]} : vector<8x25xf32> to vector<8x17xf32>
    %96 = arith.addf %94, %86 : vector<8x8xf32>
    %97 = vector.extract_strided_slice %95 {offsets = [0, 1], sizes = [8, 1], strides = [1, 1]} : vector<8x17xf32> to vector<8x1xf32>
    %98 = vector.broadcast %97 : vector<8x1xf32> to vector<8x8xf32>
    %99 = arith.mulf %28, %98 : vector<8x8xf32>
    %100 = arith.addf %96, %99 : vector<8x8xf32>
    %101 = vector.extract_strided_slice %95 {offsets = [0, 2], sizes = [8, 1], strides = [1, 1]} : vector<8x17xf32> to vector<8x1xf32>
    %102 = vector.broadcast %101 : vector<8x1xf32> to vector<8x8xf32>
    %103 = arith.mulf %32, %102 : vector<8x8xf32>
    %104 = arith.addf %100, %103 : vector<8x8xf32>
    %105 = vector.extract_strided_slice %95 {offsets = [0, 3], sizes = [8, 1], strides = [1, 1]} : vector<8x17xf32> to vector<8x1xf32>
    %106 = vector.broadcast %105 : vector<8x1xf32> to vector<8x8xf32>
    %107 = arith.mulf %36, %106 : vector<8x8xf32>
    %108 = arith.addf %104, %107 : vector<8x8xf32>
    %109 = vector.extract_strided_slice %95 {offsets = [0, 4], sizes = [8, 1], strides = [1, 1]} : vector<8x17xf32> to vector<8x1xf32>
    %110 = vector.broadcast %109 : vector<8x1xf32> to vector<8x8xf32>
    %111 = arith.mulf %40, %110 : vector<8x8xf32>
    %112 = arith.addf %108, %111 : vector<8x8xf32>
    %113 = vector.extract_strided_slice %95 {offsets = [0, 5], sizes = [8, 1], strides = [1, 1]} : vector<8x17xf32> to vector<8x1xf32>
    %114 = vector.broadcast %113 : vector<8x1xf32> to vector<8x8xf32>
    %115 = arith.mulf %44, %114 : vector<8x8xf32>
    %116 = arith.addf %112, %115 : vector<8x8xf32>
    %117 = vector.extract_strided_slice %95 {offsets = [0, 6], sizes = [8, 1], strides = [1, 1]} : vector<8x17xf32> to vector<8x1xf32>
    %118 = vector.broadcast %117 : vector<8x1xf32> to vector<8x8xf32>
    %119 = arith.mulf %48, %118 : vector<8x8xf32>
    %120 = arith.addf %116, %119 : vector<8x8xf32>
    %121 = vector.extract_strided_slice %95 {offsets = [0, 7], sizes = [8, 1], strides = [1, 1]} : vector<8x17xf32> to vector<8x1xf32>
    %122 = vector.broadcast %121 : vector<8x1xf32> to vector<8x8xf32>
    %123 = arith.mulf %52, %122 : vector<8x8xf32>
    %124 = arith.addf %120, %123 : vector<8x8xf32>
    %125 = vector.extract_strided_slice %95 {offsets = [0, 8], sizes = [8, 1], strides = [1, 1]} : vector<8x17xf32> to vector<8x1xf32>
    %126 = vector.broadcast %125 : vector<8x1xf32> to vector<8x8xf32>
    %127 = arith.mulf %56, %126 : vector<8x8xf32>
    %128 = arith.addf %124, %127 : vector<8x8xf32>
    %129 = vector.extract_strided_slice %95 {offsets = [0, 9], sizes = [8, 1], strides = [1, 1]} : vector<8x17xf32> to vector<8x1xf32>
    %130 = vector.broadcast %129 : vector<8x1xf32> to vector<8x8xf32>
    %131 = arith.mulf %60, %130 : vector<8x8xf32>
    %132 = arith.addf %128, %131 : vector<8x8xf32>
    %133 = vector.extract_strided_slice %95 {offsets = [0, 10], sizes = [8, 1], strides = [1, 1]} : vector<8x17xf32> to vector<8x1xf32>
    %134 = vector.broadcast %133 : vector<8x1xf32> to vector<8x8xf32>
    %135 = arith.mulf %64, %134 : vector<8x8xf32>
    %136 = arith.addf %132, %135 : vector<8x8xf32>
    %137 = vector.extract_strided_slice %95 {offsets = [0, 11], sizes = [8, 1], strides = [1, 1]} : vector<8x17xf32> to vector<8x1xf32>
    %138 = vector.broadcast %137 : vector<8x1xf32> to vector<8x8xf32>
    %139 = arith.mulf %68, %138 : vector<8x8xf32>
    %140 = arith.addf %136, %139 : vector<8x8xf32>
    %141 = vector.extract_strided_slice %95 {offsets = [0, 12], sizes = [8, 1], strides = [1, 1]} : vector<8x17xf32> to vector<8x1xf32>
    %142 = vector.broadcast %141 : vector<8x1xf32> to vector<8x8xf32>
    %143 = arith.mulf %72, %142 : vector<8x8xf32>
    %144 = arith.addf %140, %143 : vector<8x8xf32>
    %145 = vector.extract_strided_slice %95 {offsets = [0, 13], sizes = [8, 1], strides = [1, 1]} : vector<8x17xf32> to vector<8x1xf32>
    %146 = vector.broadcast %145 : vector<8x1xf32> to vector<8x8xf32>
    %147 = arith.mulf %76, %146 : vector<8x8xf32>
    %148 = arith.addf %144, %147 : vector<8x8xf32>
    %149 = vector.extract_strided_slice %95 {offsets = [0, 14], sizes = [8, 1], strides = [1, 1]} : vector<8x17xf32> to vector<8x1xf32>
    %150 = vector.broadcast %149 : vector<8x1xf32> to vector<8x8xf32>
    %151 = arith.mulf %80, %150 : vector<8x8xf32>
    %152 = arith.addf %148, %151 : vector<8x8xf32>
    %153 = vector.extract_strided_slice %95 {offsets = [0, 15], sizes = [8, 1], strides = [1, 1]} : vector<8x17xf32> to vector<8x1xf32>
    %154 = vector.broadcast %153 : vector<8x1xf32> to vector<8x8xf32>
    %155 = arith.mulf %84, %154 : vector<8x8xf32>
    %156 = arith.addf %152, %155 : vector<8x8xf32>
    %cst_16 = arith.constant dense<0xFF800000> : vector<8xf32>
    %157 = vector.multi_reduction <maximumf>, %156, %cst_16 [1] : vector<8x8xf32> to vector<8xf32>
    %158 = vector.shape_cast %157 : vector<8xf32> to vector<8x1xf32>
    %159 = vector.broadcast %158 : vector<8x1xf32> to vector<8x8xf32>
    %160 = arith.subf %156, %159 : vector<8x8xf32>
    %161 = math.exp %160 : vector<8x8xf32>
    %cst_17 = arith.constant dense<0.000000e+00> : vector<8xf32>
    %162 = vector.multi_reduction <add>, %161, %cst_17 [1] : vector<8x8xf32> to vector<8xf32>
    %163 = vector.shape_cast %162 : vector<8xf32> to vector<8x1xf32>
    %164 = tpu.reciprocal %163 {approx = true} : vector<8x1xf32> -> vector<8x1xf32>
    %165 = vector.broadcast %164 : vector<8x1xf32> to vector<8x8xf32>
    %166 = arith.mulf %161, %165 : vector<8x8xf32>
    %167 = arith.truncf %166 : vector<8x8xf32> to vector<8x8xbf16>
    %cst_18 = arith.constant dense<0.000000e+00> : vector<8x32xf32>
    %168 = tpu.matmul %167, %89, %cst_18 {dimension_numbers = #tpu.dot_dimension_numbers<[1], [0], [0], [1], [0, 0, 1, 1], [], []>} : vector<8x8xbf16>, vector<8x32xbf16>, vector<8x32xf32> -> vector<8x32xf32>
    %169 = vector.extract_strided_slice %11 {offsets = [0, 32], sizes = [8, 32], strides = [1, 1]} : vector<32x128xbf16> to vector<8x32xbf16>
    %170 = vector.extract_strided_slice %13 {offsets = [0, 32], sizes = [8, 32], strides = [1, 1]} : vector<32x128xbf16> to vector<8x32xbf16>
    %171 = vector.extract_strided_slice %15 {offsets = [0, 32], sizes = [8, 32], strides = [1, 1]} : vector<32x128xbf16> to vector<8x32xbf16>
    %c1 = arith.constant 1 : index
    %c0_19 = arith.constant 0 : index
    %c0_20 = arith.constant 0 : index
    %172 = vector.load %arg4[%c1, %c0_19, %c0_20] : memref<4x17x32xbf16, #tpu.memory_space<vmem>>, vector<1x17x32xbf16>
    %173 = vector.shape_cast %172 : vector<1x17x32xbf16> to vector<17x32xbf16>
    %174 = tpu.concatenate %170, %173 in 0 : vector<8x32xbf16>, vector<17x32xbf16> -> vector<25x32xbf16>
    %cst_21 = arith.constant dense<0.000000e+00> : vector<8x25xf32>
    %175 = tpu.matmul %169, %174, %cst_21 {dimension_numbers = #tpu.dot_dimension_numbers<[1], [1], [0], [0], [0, 0, 1, 0], [], []>} : vector<8x32xbf16>, vector<25x32xbf16>, vector<8x25xf32> -> vector<8x25xf32>
    %176 = vector.extract_strided_slice %175 {offsets = [0, 0], sizes = [8, 8], strides = [1, 1]} : vector<8x25xf32> to vector<8x8xf32>
    %177 = vector.extract_strided_slice %175 {offsets = [0, 8], sizes = [8, 17], strides = [1, 1]} : vector<8x25xf32> to vector<8x17xf32>
    %178 = arith.addf %176, %86 : vector<8x8xf32>
    %179 = vector.extract_strided_slice %177 {offsets = [0, 1], sizes = [8, 1], strides = [1, 1]} : vector<8x17xf32> to vector<8x1xf32>
    %180 = vector.broadcast %179 : vector<8x1xf32> to vector<8x8xf32>
    %181 = arith.mulf %28, %180 : vector<8x8xf32>
    %182 = arith.addf %178, %181 : vector<8x8xf32>
    %183 = vector.extract_strided_slice %177 {offsets = [0, 2], sizes = [8, 1], strides = [1, 1]} : vector<8x17xf32> to vector<8x1xf32>
    %184 = vector.broadcast %183 : vector<8x1xf32> to vector<8x8xf32>
    %185 = arith.mulf %32, %184 : vector<8x8xf32>
    %186 = arith.addf %182, %185 : vector<8x8xf32>
    %187 = vector.extract_strided_slice %177 {offsets = [0, 3], sizes = [8, 1], strides = [1, 1]} : vector<8x17xf32> to vector<8x1xf32>
    %188 = vector.broadcast %187 : vector<8x1xf32> to vector<8x8xf32>
    %189 = arith.mulf %36, %188 : vector<8x8xf32>
    %190 = arith.addf %186, %189 : vector<8x8xf32>
    %191 = vector.extract_strided_slice %177 {offsets = [0, 4], sizes = [8, 1], strides = [1, 1]} : vector<8x17xf32> to vector<8x1xf32>
    %192 = vector.broadcast %191 : vector<8x1xf32> to vector<8x8xf32>
    %193 = arith.mulf %40, %192 : vector<8x8xf32>
    %194 = arith.addf %190, %193 : vector<8x8xf32>
    %195 = vector.extract_strided_slice %177 {offsets = [0, 5], sizes = [8, 1], strides = [1, 1]} : vector<8x17xf32> to vector<8x1xf32>
    %196 = vector.broadcast %195 : vector<8x1xf32> to vector<8x8xf32>
    %197 = arith.mulf %44, %196 : vector<8x8xf32>
    %198 = arith.addf %194, %197 : vector<8x8xf32>
    %199 = vector.extract_strided_slice %177 {offsets = [0, 6], sizes = [8, 1], strides = [1, 1]} : vector<8x17xf32> to vector<8x1xf32>
    %200 = vector.broadcast %199 : vector<8x1xf32> to vector<8x8xf32>
    %201 = arith.mulf %48, %200 : vector<8x8xf32>
    %202 = arith.addf %198, %201 : vector<8x8xf32>
    %203 = vector.extract_strided_slice %177 {offsets = [0, 7], sizes = [8, 1], strides = [1, 1]} : vector<8x17xf32> to vector<8x1xf32>
    %204 = vector.broadcast %203 : vector<8x1xf32> to vector<8x8xf32>
    %205 = arith.mulf %52, %204 : vector<8x8xf32>
    %206 = arith.addf %202, %205 : vector<8x8xf32>
    %207 = vector.extract_strided_slice %177 {offsets = [0, 8], sizes = [8, 1], strides = [1, 1]} : vector<8x17xf32> to vector<8x1xf32>
    %208 = vector.broadcast %207 : vector<8x1xf32> to vector<8x8xf32>
    %209 = arith.mulf %56, %208 : vector<8x8xf32>
    %210 = arith.addf %206, %209 : vector<8x8xf32>
    %211 = vector.extract_strided_slice %177 {offsets = [0, 9], sizes = [8, 1], strides = [1, 1]} : vector<8x17xf32> to vector<8x1xf32>
    %212 = vector.broadcast %211 : vector<8x1xf32> to vector<8x8xf32>
    %213 = arith.mulf %60, %212 : vector<8x8xf32>
    %214 = arith.addf %210, %213 : vector<8x8xf32>
    %215 = vector.extract_strided_slice %177 {offsets = [0, 10], sizes = [8, 1], strides = [1, 1]} : vector<8x17xf32> to vector<8x1xf32>
    %216 = vector.broadcast %215 : vector<8x1xf32> to vector<8x8xf32>
    %217 = arith.mulf %64, %216 : vector<8x8xf32>
    %218 = arith.addf %214, %217 : vector<8x8xf32>
    %219 = vector.extract_strided_slice %177 {offsets = [0, 11], sizes = [8, 1], strides = [1, 1]} : vector<8x17xf32> to vector<8x1xf32>
    %220 = vector.broadcast %219 : vector<8x1xf32> to vector<8x8xf32>
    %221 = arith.mulf %68, %220 : vector<8x8xf32>
    %222 = arith.addf %218, %221 : vector<8x8xf32>
    %223 = vector.extract_strided_slice %177 {offsets = [0, 12], sizes = [8, 1], strides = [1, 1]} : vector<8x17xf32> to vector<8x1xf32>
    %224 = vector.broadcast %223 : vector<8x1xf32> to vector<8x8xf32>
    %225 = arith.mulf %72, %224 : vector<8x8xf32>
    %226 = arith.addf %222, %225 : vector<8x8xf32>
    %227 = vector.extract_strided_slice %177 {offsets = [0, 13], sizes = [8, 1], strides = [1, 1]} : vector<8x17xf32> to vector<8x1xf32>
    %228 = vector.broadcast %227 : vector<8x1xf32> to vector<8x8xf32>
    %229 = arith.mulf %76, %228 : vector<8x8xf32>
    %230 = arith.addf %226, %229 : vector<8x8xf32>
    %231 = vector.extract_strided_slice %177 {offsets = [0, 14], sizes = [8, 1], strides = [1, 1]} : vector<8x17xf32> to vector<8x1xf32>
    %232 = vector.broadcast %231 : vector<8x1xf32> to vector<8x8xf32>
    %233 = arith.mulf %80, %232 : vector<8x8xf32>
    %234 = arith.addf %230, %233 : vector<8x8xf32>
    %235 = vector.extract_strided_slice %177 {offsets = [0, 15], sizes = [8, 1], strides = [1, 1]} : vector<8x17xf32> to vector<8x1xf32>
    %236 = vector.broadcast %235 : vector<8x1xf32> to vector<8x8xf32>
    %237 = arith.mulf %84, %236 : vector<8x8xf32>
    %238 = arith.addf %234, %237 : vector<8x8xf32>
    %cst_22 = arith.constant dense<0xFF800000> : vector<8xf32>
    %239 = vector.multi_reduction <maximumf>, %238, %cst_22 [1] : vector<8x8xf32> to vector<8xf32>
    %240 = vector.shape_cast %239 : vector<8xf32> to vector<8x1xf32>
    %241 = vector.broadcast %240 : vector<8x1xf32> to vector<8x8xf32>
    %242 = arith.subf %238, %241 : vector<8x8xf32>
    %243 = math.exp %242 : vector<8x8xf32>
    %cst_23 = arith.constant dense<0.000000e+00> : vector<8xf32>
    %244 = vector.multi_reduction <add>, %243, %cst_23 [1] : vector<8x8xf32> to vector<8xf32>
    %245 = vector.shape_cast %244 : vector<8xf32> to vector<8x1xf32>
    %246 = tpu.reciprocal %245 {approx = true} : vector<8x1xf32> -> vector<8x1xf32>
    %247 = vector.broadcast %246 : vector<8x1xf32> to vector<8x8xf32>
    %248 = arith.mulf %243, %247 : vector<8x8xf32>
    %249 = arith.truncf %248 : vector<8x8xf32> to vector<8x8xbf16>
    %cst_24 = arith.constant dense<0.000000e+00> : vector<8x32xf32>
    %250 = tpu.matmul %249, %171, %cst_24 {dimension_numbers = #tpu.dot_dimension_numbers<[1], [0], [0], [1], [0, 0, 1, 1], [], []>} : vector<8x8xbf16>, vector<8x32xbf16>, vector<8x32xf32> -> vector<8x32xf32>
    %251 = vector.extract_strided_slice %11 {offsets = [0, 64], sizes = [8, 32], strides = [1, 1]} : vector<32x128xbf16> to vector<8x32xbf16>
    %252 = vector.extract_strided_slice %13 {offsets = [0, 64], sizes = [8, 32], strides = [1, 1]} : vector<32x128xbf16> to vector<8x32xbf16>
    %253 = vector.extract_strided_slice %15 {offsets = [0, 64], sizes = [8, 32], strides = [1, 1]} : vector<32x128xbf16> to vector<8x32xbf16>
    %c2 = arith.constant 2 : index
    %c0_25 = arith.constant 0 : index
    %c0_26 = arith.constant 0 : index
    %254 = vector.load %arg4[%c2, %c0_25, %c0_26] : memref<4x17x32xbf16, #tpu.memory_space<vmem>>, vector<1x17x32xbf16>
    %255 = vector.shape_cast %254 : vector<1x17x32xbf16> to vector<17x32xbf16>
    %256 = tpu.concatenate %252, %255 in 0 : vector<8x32xbf16>, vector<17x32xbf16> -> vector<25x32xbf16>
    %cst_27 = arith.constant dense<0.000000e+00> : vector<8x25xf32>
    %257 = tpu.matmul %251, %256, %cst_27 {dimension_numbers = #tpu.dot_dimension_numbers<[1], [1], [0], [0], [0, 0, 1, 0], [], []>} : vector<8x32xbf16>, vector<25x32xbf16>, vector<8x25xf32> -> vector<8x25xf32>
    %258 = vector.extract_strided_slice %257 {offsets = [0, 0], sizes = [8, 8], strides = [1, 1]} : vector<8x25xf32> to vector<8x8xf32>
    %259 = vector.extract_strided_slice %257 {offsets = [0, 8], sizes = [8, 17], strides = [1, 1]} : vector<8x25xf32> to vector<8x17xf32>
    %260 = arith.addf %258, %86 : vector<8x8xf32>
    %261 = vector.extract_strided_slice %259 {offsets = [0, 1], sizes = [8, 1], strides = [1, 1]} : vector<8x17xf32> to vector<8x1xf32>
    %262 = vector.broadcast %261 : vector<8x1xf32> to vector<8x8xf32>
    %263 = arith.mulf %28, %262 : vector<8x8xf32>
    %264 = arith.addf %260, %263 : vector<8x8xf32>
    %265 = vector.extract_strided_slice %259 {offsets = [0, 2], sizes = [8, 1], strides = [1, 1]} : vector<8x17xf32> to vector<8x1xf32>
    %266 = vector.broadcast %265 : vector<8x1xf32> to vector<8x8xf32>
    %267 = arith.mulf %32, %266 : vector<8x8xf32>
    %268 = arith.addf %264, %267 : vector<8x8xf32>
    %269 = vector.extract_strided_slice %259 {offsets = [0, 3], sizes = [8, 1], strides = [1, 1]} : vector<8x17xf32> to vector<8x1xf32>
    %270 = vector.broadcast %269 : vector<8x1xf32> to vector<8x8xf32>
    %271 = arith.mulf %36, %270 : vector<8x8xf32>
    %272 = arith.addf %268, %271 : vector<8x8xf32>
    %273 = vector.extract_strided_slice %259 {offsets = [0, 4], sizes = [8, 1], strides = [1, 1]} : vector<8x17xf32> to vector<8x1xf32>
    %274 = vector.broadcast %273 : vector<8x1xf32> to vector<8x8xf32>
    %275 = arith.mulf %40, %274 : vector<8x8xf32>
    %276 = arith.addf %272, %275 : vector<8x8xf32>
    %277 = vector.extract_strided_slice %259 {offsets = [0, 5], sizes = [8, 1], strides = [1, 1]} : vector<8x17xf32> to vector<8x1xf32>
    %278 = vector.broadcast %277 : vector<8x1xf32> to vector<8x8xf32>
    %279 = arith.mulf %44, %278 : vector<8x8xf32>
    %280 = arith.addf %276, %279 : vector<8x8xf32>
    %281 = vector.extract_strided_slice %259 {offsets = [0, 6], sizes = [8, 1], strides = [1, 1]} : vector<8x17xf32> to vector<8x1xf32>
    %282 = vector.broadcast %281 : vector<8x1xf32> to vector<8x8xf32>
    %283 = arith.mulf %48, %282 : vector<8x8xf32>
    %284 = arith.addf %280, %283 : vector<8x8xf32>
    %285 = vector.extract_strided_slice %259 {offsets = [0, 7], sizes = [8, 1], strides = [1, 1]} : vector<8x17xf32> to vector<8x1xf32>
    %286 = vector.broadcast %285 : vector<8x1xf32> to vector<8x8xf32>
    %287 = arith.mulf %52, %286 : vector<8x8xf32>
    %288 = arith.addf %284, %287 : vector<8x8xf32>
    %289 = vector.extract_strided_slice %259 {offsets = [0, 8], sizes = [8, 1], strides = [1, 1]} : vector<8x17xf32> to vector<8x1xf32>
    %290 = vector.broadcast %289 : vector<8x1xf32> to vector<8x8xf32>
    %291 = arith.mulf %56, %290 : vector<8x8xf32>
    %292 = arith.addf %288, %291 : vector<8x8xf32>
    %293 = vector.extract_strided_slice %259 {offsets = [0, 9], sizes = [8, 1], strides = [1, 1]} : vector<8x17xf32> to vector<8x1xf32>
    %294 = vector.broadcast %293 : vector<8x1xf32> to vector<8x8xf32>
    %295 = arith.mulf %60, %294 : vector<8x8xf32>
    %296 = arith.addf %292, %295 : vector<8x8xf32>
    %297 = vector.extract_strided_slice %259 {offsets = [0, 10], sizes = [8, 1], strides = [1, 1]} : vector<8x17xf32> to vector<8x1xf32>
    %298 = vector.broadcast %297 : vector<8x1xf32> to vector<8x8xf32>
    %299 = arith.mulf %64, %298 : vector<8x8xf32>
    %300 = arith.addf %296, %299 : vector<8x8xf32>
    %301 = vector.extract_strided_slice %259 {offsets = [0, 11], sizes = [8, 1], strides = [1, 1]} : vector<8x17xf32> to vector<8x1xf32>
    %302 = vector.broadcast %301 : vector<8x1xf32> to vector<8x8xf32>
    %303 = arith.mulf %68, %302 : vector<8x8xf32>
    %304 = arith.addf %300, %303 : vector<8x8xf32>
    %305 = vector.extract_strided_slice %259 {offsets = [0, 12], sizes = [8, 1], strides = [1, 1]} : vector<8x17xf32> to vector<8x1xf32>
    %306 = vector.broadcast %305 : vector<8x1xf32> to vector<8x8xf32>
    %307 = arith.mulf %72, %306 : vector<8x8xf32>
    %308 = arith.addf %304, %307 : vector<8x8xf32>
    %309 = vector.extract_strided_slice %259 {offsets = [0, 13], sizes = [8, 1], strides = [1, 1]} : vector<8x17xf32> to vector<8x1xf32>
    %310 = vector.broadcast %309 : vector<8x1xf32> to vector<8x8xf32>
    %311 = arith.mulf %76, %310 : vector<8x8xf32>
    %312 = arith.addf %308, %311 : vector<8x8xf32>
    %313 = vector.extract_strided_slice %259 {offsets = [0, 14], sizes = [8, 1], strides = [1, 1]} : vector<8x17xf32> to vector<8x1xf32>
    %314 = vector.broadcast %313 : vector<8x1xf32> to vector<8x8xf32>
    %315 = arith.mulf %80, %314 : vector<8x8xf32>
    %316 = arith.addf %312, %315 : vector<8x8xf32>
    %317 = vector.extract_strided_slice %259 {offsets = [0, 15], sizes = [8, 1], strides = [1, 1]} : vector<8x17xf32> to vector<8x1xf32>
    %318 = vector.broadcast %317 : vector<8x1xf32> to vector<8x8xf32>
    %319 = arith.mulf %84, %318 : vector<8x8xf32>
    %320 = arith.addf %316, %319 : vector<8x8xf32>
    %cst_28 = arith.constant dense<0xFF800000> : vector<8xf32>
    %321 = vector.multi_reduction <maximumf>, %320, %cst_28 [1] : vector<8x8xf32> to vector<8xf32>
    %322 = vector.shape_cast %321 : vector<8xf32> to vector<8x1xf32>
    %323 = vector.broadcast %322 : vector<8x1xf32> to vector<8x8xf32>
    %324 = arith.subf %320, %323 : vector<8x8xf32>
    %325 = math.exp %324 : vector<8x8xf32>
    %cst_29 = arith.constant dense<0.000000e+00> : vector<8xf32>
    %326 = vector.multi_reduction <add>, %325, %cst_29 [1] : vector<8x8xf32> to vector<8xf32>
    %327 = vector.shape_cast %326 : vector<8xf32> to vector<8x1xf32>
    %328 = tpu.reciprocal %327 {approx = true} : vector<8x1xf32> -> vector<8x1xf32>
    %329 = vector.broadcast %328 : vector<8x1xf32> to vector<8x8xf32>
    %330 = arith.mulf %325, %329 : vector<8x8xf32>
    %331 = arith.truncf %330 : vector<8x8xf32> to vector<8x8xbf16>
    %cst_30 = arith.constant dense<0.000000e+00> : vector<8x32xf32>
    %332 = tpu.matmul %331, %253, %cst_30 {dimension_numbers = #tpu.dot_dimension_numbers<[1], [0], [0], [1], [0, 0, 1, 1], [], []>} : vector<8x8xbf16>, vector<8x32xbf16>, vector<8x32xf32> -> vector<8x32xf32>
    %333 = vector.extract_strided_slice %11 {offsets = [0, 96], sizes = [8, 32], strides = [1, 1]} : vector<32x128xbf16> to vector<8x32xbf16>
    %334 = vector.extract_strided_slice %13 {offsets = [0, 96], sizes = [8, 32], strides = [1, 1]} : vector<32x128xbf16> to vector<8x32xbf16>
    %335 = vector.extract_strided_slice %15 {offsets = [0, 96], sizes = [8, 32], strides = [1, 1]} : vector<32x128xbf16> to vector<8x32xbf16>
    %c3 = arith.constant 3 : index
    %c0_31 = arith.constant 0 : index
    %c0_32 = arith.constant 0 : index
    %336 = vector.load %arg4[%c3, %c0_31, %c0_32] : memref<4x17x32xbf16, #tpu.memory_space<vmem>>, vector<1x17x32xbf16>
    %337 = vector.shape_cast %336 : vector<1x17x32xbf16> to vector<17x32xbf16>
    %338 = tpu.concatenate %334, %337 in 0 : vector<8x32xbf16>, vector<17x32xbf16> -> vector<25x32xbf16>
    %cst_33 = arith.constant dense<0.000000e+00> : vector<8x25xf32>
    %339 = tpu.matmul %333, %338, %cst_33 {dimension_numbers = #tpu.dot_dimension_numbers<[1], [1], [0], [0], [0, 0, 1, 0], [], []>} : vector<8x32xbf16>, vector<25x32xbf16>, vector<8x25xf32> -> vector<8x25xf32>
    %340 = vector.extract_strided_slice %339 {offsets = [0, 0], sizes = [8, 8], strides = [1, 1]} : vector<8x25xf32> to vector<8x8xf32>
    %341 = vector.extract_strided_slice %339 {offsets = [0, 8], sizes = [8, 17], strides = [1, 1]} : vector<8x25xf32> to vector<8x17xf32>
    %342 = arith.addf %340, %86 : vector<8x8xf32>
    %343 = vector.extract_strided_slice %341 {offsets = [0, 1], sizes = [8, 1], strides = [1, 1]} : vector<8x17xf32> to vector<8x1xf32>
    %344 = vector.broadcast %343 : vector<8x1xf32> to vector<8x8xf32>
    %345 = arith.mulf %28, %344 : vector<8x8xf32>
    %346 = arith.addf %342, %345 : vector<8x8xf32>
    %347 = vector.extract_strided_slice %341 {offsets = [0, 2], sizes = [8, 1], strides = [1, 1]} : vector<8x17xf32> to vector<8x1xf32>
    %348 = vector.broadcast %347 : vector<8x1xf32> to vector<8x8xf32>
    %349 = arith.mulf %32, %348 : vector<8x8xf32>
    %350 = arith.addf %346, %349 : vector<8x8xf32>
    %351 = vector.extract_strided_slice %341 {offsets = [0, 3], sizes = [8, 1], strides = [1, 1]} : vector<8x17xf32> to vector<8x1xf32>
    %352 = vector.broadcast %351 : vector<8x1xf32> to vector<8x8xf32>
    %353 = arith.mulf %36, %352 : vector<8x8xf32>
    %354 = arith.addf %350, %353 : vector<8x8xf32>
    %355 = vector.extract_strided_slice %341 {offsets = [0, 4], sizes = [8, 1], strides = [1, 1]} : vector<8x17xf32> to vector<8x1xf32>
    %356 = vector.broadcast %355 : vector<8x1xf32> to vector<8x8xf32>
    %357 = arith.mulf %40, %356 : vector<8x8xf32>
    %358 = arith.addf %354, %357 : vector<8x8xf32>
    %359 = vector.extract_strided_slice %341 {offsets = [0, 5], sizes = [8, 1], strides = [1, 1]} : vector<8x17xf32> to vector<8x1xf32>
    %360 = vector.broadcast %359 : vector<8x1xf32> to vector<8x8xf32>
    %361 = arith.mulf %44, %360 : vector<8x8xf32>
    %362 = arith.addf %358, %361 : vector<8x8xf32>
    %363 = vector.extract_strided_slice %341 {offsets = [0, 6], sizes = [8, 1], strides = [1, 1]} : vector<8x17xf32> to vector<8x1xf32>
    %364 = vector.broadcast %363 : vector<8x1xf32> to vector<8x8xf32>
    %365 = arith.mulf %48, %364 : vector<8x8xf32>
    %366 = arith.addf %362, %365 : vector<8x8xf32>
    %367 = vector.extract_strided_slice %341 {offsets = [0, 7], sizes = [8, 1], strides = [1, 1]} : vector<8x17xf32> to vector<8x1xf32>
    %368 = vector.broadcast %367 : vector<8x1xf32> to vector<8x8xf32>
    %369 = arith.mulf %52, %368 : vector<8x8xf32>
    %370 = arith.addf %366, %369 : vector<8x8xf32>
    %371 = vector.extract_strided_slice %341 {offsets = [0, 8], sizes = [8, 1], strides = [1, 1]} : vector<8x17xf32> to vector<8x1xf32>
    %372 = vector.broadcast %371 : vector<8x1xf32> to vector<8x8xf32>
    %373 = arith.mulf %56, %372 : vector<8x8xf32>
    %374 = arith.addf %370, %373 : vector<8x8xf32>
    %375 = vector.extract_strided_slice %341 {offsets = [0, 9], sizes = [8, 1], strides = [1, 1]} : vector<8x17xf32> to vector<8x1xf32>
    %376 = vector.broadcast %375 : vector<8x1xf32> to vector<8x8xf32>
    %377 = arith.mulf %60, %376 : vector<8x8xf32>
    %378 = arith.addf %374, %377 : vector<8x8xf32>
    %379 = vector.extract_strided_slice %341 {offsets = [0, 10], sizes = [8, 1], strides = [1, 1]} : vector<8x17xf32> to vector<8x1xf32>
    %380 = vector.broadcast %379 : vector<8x1xf32> to vector<8x8xf32>
    %381 = arith.mulf %64, %380 : vector<8x8xf32>
    %382 = arith.addf %378, %381 : vector<8x8xf32>
    %383 = vector.extract_strided_slice %341 {offsets = [0, 11], sizes = [8, 1], strides = [1, 1]} : vector<8x17xf32> to vector<8x1xf32>
    %384 = vector.broadcast %383 : vector<8x1xf32> to vector<8x8xf32>
    %385 = arith.mulf %68, %384 : vector<8x8xf32>
    %386 = arith.addf %382, %385 : vector<8x8xf32>
    %387 = vector.extract_strided_slice %341 {offsets = [0, 12], sizes = [8, 1], strides = [1, 1]} : vector<8x17xf32> to vector<8x1xf32>
    %388 = vector.broadcast %387 : vector<8x1xf32> to vector<8x8xf32>
    %389 = arith.mulf %72, %388 : vector<8x8xf32>
    %390 = arith.addf %386, %389 : vector<8x8xf32>
    %391 = vector.extract_strided_slice %341 {offsets = [0, 13], sizes = [8, 1], strides = [1, 1]} : vector<8x17xf32> to vector<8x1xf32>
    %392 = vector.broadcast %391 : vector<8x1xf32> to vector<8x8xf32>
    %393 = arith.mulf %76, %392 : vector<8x8xf32>
    %394 = arith.addf %390, %393 : vector<8x8xf32>
    %395 = vector.extract_strided_slice %341 {offsets = [0, 14], sizes = [8, 1], strides = [1, 1]} : vector<8x17xf32> to vector<8x1xf32>
    %396 = vector.broadcast %395 : vector<8x1xf32> to vector<8x8xf32>
    %397 = arith.mulf %80, %396 : vector<8x8xf32>
    %398 = arith.addf %394, %397 : vector<8x8xf32>
    %399 = vector.extract_strided_slice %341 {offsets = [0, 15], sizes = [8, 1], strides = [1, 1]} : vector<8x17xf32> to vector<8x1xf32>
    %400 = vector.broadcast %399 : vector<8x1xf32> to vector<8x8xf32>
    %401 = arith.mulf %84, %400 : vector<8x8xf32>
    %402 = arith.addf %398, %401 : vector<8x8xf32>
    %cst_34 = arith.constant dense<0xFF800000> : vector<8xf32>
    %403 = vector.multi_reduction <maximumf>, %402, %cst_34 [1] : vector<8x8xf32> to vector<8xf32>
    %404 = vector.shape_cast %403 : vector<8xf32> to vector<8x1xf32>
    %405 = vector.broadcast %404 : vector<8x1xf32> to vector<8x8xf32>
    %406 = arith.subf %402, %405 : vector<8x8xf32>
    %407 = math.exp %406 : vector<8x8xf32>
    %cst_35 = arith.constant dense<0.000000e+00> : vector<8xf32>
    %408 = vector.multi_reduction <add>, %407, %cst_35 [1] : vector<8x8xf32> to vector<8xf32>
    %409 = vector.shape_cast %408 : vector<8xf32> to vector<8x1xf32>
    %410 = tpu.reciprocal %409 {approx = true} : vector<8x1xf32> -> vector<8x1xf32>
    %411 = vector.broadcast %410 : vector<8x1xf32> to vector<8x8xf32>
    %412 = arith.mulf %407, %411 : vector<8x8xf32>
    %413 = arith.truncf %412 : vector<8x8xf32> to vector<8x8xbf16>
    %cst_36 = arith.constant dense<0.000000e+00> : vector<8x32xf32>
    %414 = tpu.matmul %413, %335, %cst_36 {dimension_numbers = #tpu.dot_dimension_numbers<[1], [0], [0], [1], [0, 0, 1, 1], [], []>} : vector<8x8xbf16>, vector<8x32xbf16>, vector<8x32xf32> -> vector<8x32xf32>
    %415 = tpu.concatenate %168, %250, %332, %414 in 1 : vector<8x32xf32>, vector<8x32xf32>, vector<8x32xf32>, vector<8x32xf32> -> vector<8x128xf32>
    %c0_37 = arith.constant 0 : index
    %c0_38 = arith.constant 0 : index
    %c0_39 = arith.constant 0 : index
    %416 = vector.load %arg6[%c0_37, %c0_38, %c0_39] : memref<4x8x128xf32, #tpu.memory_space<vmem>>, vector<1x8x128xf32>
    %417 = vector.shape_cast %416 : vector<1x8x128xf32> to vector<8x128xf32>
    %418 = vector.shape_cast %415 : vector<8x128xf32> to vector<1x8x128xf32>
    tpu.vector_store %arg6[%c0_37, %c0_38, %c0_39], %418 {strides = array<i32>} : memref<4x8x128xf32, #tpu.memory_space<vmem>>, vector<1x8x128xf32>,
    %c0_40 = arith.constant 0 : index
    %c0_41 = arith.constant 0 : index
    %c0_42 = arith.constant 0 : index
    %419 = vector.load %arg5[%c0_40, %c0_41, %c0_42] : memref<1x8x8xf32, #tpu.memory_space<vmem>>, vector<1x8x8xf32>
    %420 = vector.shape_cast %419 : vector<1x8x8xf32> to vector<8x8xf32>
    %421 = vector.extract_strided_slice %11 {offsets = [8, 0], sizes = [8, 32], strides = [1, 1]} : vector<32x128xbf16> to vector<8x32xbf16>
    %422 = vector.extract_strided_slice %13 {offsets = [8, 0], sizes = [8, 32], strides = [1, 1]} : vector<32x128xbf16> to vector<8x32xbf16>
    %423 = vector.extract_strided_slice %15 {offsets = [8, 0], sizes = [8, 32], strides = [1, 1]} : vector<32x128xbf16> to vector<8x32xbf16>
    %c0_43 = arith.constant 0 : index
    %c0_44 = arith.constant 0 : index
    %c0_45 = arith.constant 0 : index
    %424 = vector.load %arg4[%c0_43, %c0_44, %c0_45] : memref<4x17x32xbf16, #tpu.memory_space<vmem>>, vector<1x17x32xbf16>
    %425 = vector.shape_cast %424 : vector<1x17x32xbf16> to vector<17x32xbf16>
    %426 = tpu.concatenate %422, %425 in 0 : vector<8x32xbf16>, vector<17x32xbf16> -> vector<25x32xbf16>
    %cst_46 = arith.constant dense<0.000000e+00> : vector<8x25xf32>
    %427 = tpu.matmul %421, %426, %cst_46 {dimension_numbers = #tpu.dot_dimension_numbers<[1], [1], [0], [0], [0, 0, 1, 0], [], []>} : vector<8x32xbf16>, vector<25x32xbf16>, vector<8x25xf32> -> vector<8x25xf32>
    %428 = vector.extract_strided_slice %427 {offsets = [0, 0], sizes = [8, 8], strides = [1, 1]} : vector<8x25xf32> to vector<8x8xf32>
    %429 = vector.extract_strided_slice %427 {offsets = [0, 8], sizes = [8, 17], strides = [1, 1]} : vector<8x25xf32> to vector<8x17xf32>
    %430 = arith.addf %428, %420 : vector<8x8xf32>
    %431 = vector.extract_strided_slice %429 {offsets = [0, 1], sizes = [8, 1], strides = [1, 1]} : vector<8x17xf32> to vector<8x1xf32>
    %432 = vector.broadcast %431 : vector<8x1xf32> to vector<8x8xf32>
    %433 = arith.mulf %28, %432 : vector<8x8xf32>
    %434 = arith.addf %430, %433 : vector<8x8xf32>
    %435 = vector.extract_strided_slice %429 {offsets = [0, 2], sizes = [8, 1], strides = [1, 1]} : vector<8x17xf32> to vector<8x1xf32>
    %436 = vector.broadcast %435 : vector<8x1xf32> to vector<8x8xf32>
    %437 = arith.mulf %32, %436 : vector<8x8xf32>
    %438 = arith.addf %434, %437 : vector<8x8xf32>
    %439 = vector.extract_strided_slice %429 {offsets = [0, 3], sizes = [8, 1], strides = [1, 1]} : vector<8x17xf32> to vector<8x1xf32>
    %440 = vector.broadcast %439 : vector<8x1xf32> to vector<8x8xf32>
    %441 = arith.mulf %36, %440 : vector<8x8xf32>
    %442 = arith.addf %438, %441 : vector<8x8xf32>
    %443 = vector.extract_strided_slice %429 {offsets = [0, 4], sizes = [8, 1], strides = [1, 1]} : vector<8x17xf32> to vector<8x1xf32>
    %444 = vector.broadcast %443 : vector<8x1xf32> to vector<8x8xf32>
    %445 = arith.mulf %40, %444 : vector<8x8xf32>
    %446 = arith.addf %442, %445 : vector<8x8xf32>
    %447 = vector.extract_strided_slice %429 {offsets = [0, 5], sizes = [8, 1], strides = [1, 1]} : vector<8x17xf32> to vector<8x1xf32>
    %448 = vector.broadcast %447 : vector<8x1xf32> to vector<8x8xf32>
    %449 = arith.mulf %44, %448 : vector<8x8xf32>
    %450 = arith.addf %446, %449 : vector<8x8xf32>
    %451 = vector.extract_strided_slice %429 {offsets = [0, 6], sizes = [8, 1], strides = [1, 1]} : vector<8x17xf32> to vector<8x1xf32>
    %452 = vector.broadcast %451 : vector<8x1xf32> to vector<8x8xf32>
    %453 = arith.mulf %48, %452 : vector<8x8xf32>
    %454 = arith.addf %450, %453 : vector<8x8xf32>
    %455 = vector.extract_strided_slice %429 {offsets = [0, 7], sizes = [8, 1], strides = [1, 1]} : vector<8x17xf32> to vector<8x1xf32>
    %456 = vector.broadcast %455 : vector<8x1xf32> to vector<8x8xf32>
    %457 = arith.mulf %52, %456 : vector<8x8xf32>
    %458 = arith.addf %454, %457 : vector<8x8xf32>
    %459 = vector.extract_strided_slice %429 {offsets = [0, 8], sizes = [8, 1], strides = [1, 1]} : vector<8x17xf32> to vector<8x1xf32>
    %460 = vector.broadcast %459 : vector<8x1xf32> to vector<8x8xf32>
    %461 = arith.mulf %56, %460 : vector<8x8xf32>
    %462 = arith.addf %458, %461 : vector<8x8xf32>
    %463 = vector.extract_strided_slice %429 {offsets = [0, 9], sizes = [8, 1], strides = [1, 1]} : vector<8x17xf32> to vector<8x1xf32>
    %464 = vector.broadcast %463 : vector<8x1xf32> to vector<8x8xf32>
    %465 = arith.mulf %60, %464 : vector<8x8xf32>
    %466 = arith.addf %462, %465 : vector<8x8xf32>
    %467 = vector.extract_strided_slice %429 {offsets = [0, 10], sizes = [8, 1], strides = [1, 1]} : vector<8x17xf32> to vector<8x1xf32>
    %468 = vector.broadcast %467 : vector<8x1xf32> to vector<8x8xf32>
    %469 = arith.mulf %64, %468 : vector<8x8xf32>
    %470 = arith.addf %466, %469 : vector<8x8xf32>
    %471 = vector.extract_strided_slice %429 {offsets = [0, 11], sizes = [8, 1], strides = [1, 1]} : vector<8x17xf32> to vector<8x1xf32>
    %472 = vector.broadcast %471 : vector<8x1xf32> to vector<8x8xf32>
    %473 = arith.mulf %68, %472 : vector<8x8xf32>
    %474 = arith.addf %470, %473 : vector<8x8xf32>
    %475 = vector.extract_strided_slice %429 {offsets = [0, 12], sizes = [8, 1], strides = [1, 1]} : vector<8x17xf32> to vector<8x1xf32>
    %476 = vector.broadcast %475 : vector<8x1xf32> to vector<8x8xf32>
    %477 = arith.mulf %72, %476 : vector<8x8xf32>
    %478 = arith.addf %474, %477 : vector<8x8xf32>
    %479 = vector.extract_strided_slice %429 {offsets = [0, 13], sizes = [8, 1], strides = [1, 1]} : vector<8x17xf32> to vector<8x1xf32>
    %480 = vector.broadcast %479 : vector<8x1xf32> to vector<8x8xf32>
    %481 = arith.mulf %76, %480 : vector<8x8xf32>
    %482 = arith.addf %478, %481 : vector<8x8xf32>
    %483 = vector.extract_strided_slice %429 {offsets = [0, 14], sizes = [8, 1], strides = [1, 1]} : vector<8x17xf32> to vector<8x1xf32>
    %484 = vector.broadcast %483 : vector<8x1xf32> to vector<8x8xf32>
    %485 = arith.mulf %80, %484 : vector<8x8xf32>
    %486 = arith.addf %482, %485 : vector<8x8xf32>
    %487 = vector.extract_strided_slice %429 {offsets = [0, 15], sizes = [8, 1], strides = [1, 1]} : vector<8x17xf32> to vector<8x1xf32>
    %488 = vector.broadcast %487 : vector<8x1xf32> to vector<8x8xf32>
    %489 = arith.mulf %84, %488 : vector<8x8xf32>
    %490 = arith.addf %486, %489 : vector<8x8xf32>
    %cst_47 = arith.constant dense<0xFF800000> : vector<8xf32>
    %491 = vector.multi_reduction <maximumf>, %490, %cst_47 [1] : vector<8x8xf32> to vector<8xf32>
    %492 = vector.shape_cast %491 : vector<8xf32> to vector<8x1xf32>
    %493 = vector.broadcast %492 : vector<8x1xf32> to vector<8x8xf32>
    %494 = arith.subf %490, %493 : vector<8x8xf32>
    %495 = math.exp %494 : vector<8x8xf32>
    %cst_48 = arith.constant dense<0.000000e+00> : vector<8xf32>
    %496 = vector.multi_reduction <add>, %495, %cst_48 [1] : vector<8x8xf32> to vector<8xf32>
    %497 = vector.shape_cast %496 : vector<8xf32> to vector<8x1xf32>
    %498 = tpu.reciprocal %497 {approx = true} : vector<8x1xf32> -> vector<8x1xf32>
    %499 = vector.broadcast %498 : vector<8x1xf32> to vector<8x8xf32>
    %500 = arith.mulf %495, %499 : vector<8x8xf32>
    %501 = arith.truncf %500 : vector<8x8xf32> to vector<8x8xbf16>
    %cst_49 = arith.constant dense<0.000000e+00> : vector<8x32xf32>
    %502 = tpu.matmul %501, %423, %cst_49 {dimension_numbers = #tpu.dot_dimension_numbers<[1], [0], [0], [1], [0, 0, 1, 1], [], []>} : vector<8x8xbf16>, vector<8x32xbf16>, vector<8x32xf32> -> vector<8x32xf32>
    %503 = vector.extract_strided_slice %11 {offsets = [8, 32], sizes = [8, 32], strides = [1, 1]} : vector<32x128xbf16> to vector<8x32xbf16>
    %504 = vector.extract_strided_slice %13 {offsets = [8, 32], sizes = [8, 32], strides = [1, 1]} : vector<32x128xbf16> to vector<8x32xbf16>
    %505 = vector.extract_strided_slice %15 {offsets = [8, 32], sizes = [8, 32], strides = [1, 1]} : vector<32x128xbf16> to vector<8x32xbf16>
    %c1_50 = arith.constant 1 : index
    %c0_51 = arith.constant 0 : index
    %c0_52 = arith.constant 0 : index
    %506 = vector.load %arg4[%c1_50, %c0_51, %c0_52] : memref<4x17x32xbf16, #tpu.memory_space<vmem>>, vector<1x17x32xbf16>
    %507 = vector.shape_cast %506 : vector<1x17x32xbf16> to vector<17x32xbf16>
    %508 = tpu.concatenate %504, %507 in 0 : vector<8x32xbf16>, vector<17x32xbf16> -> vector<25x32xbf16>
    %cst_53 = arith.constant dense<0.000000e+00> : vector<8x25xf32>
    %509 = tpu.matmul %503, %508, %cst_53 {dimension_numbers = #tpu.dot_dimension_numbers<[1], [1], [0], [0], [0, 0, 1, 0], [], []>} : vector<8x32xbf16>, vector<25x32xbf16>, vector<8x25xf32> -> vector<8x25xf32>
    %510 = vector.extract_strided_slice %509 {offsets = [0, 0], sizes = [8, 8], strides = [1, 1]} : vector<8x25xf32> to vector<8x8xf32>
    %511 = vector.extract_strided_slice %509 {offsets = [0, 8], sizes = [8, 17], strides = [1, 1]} : vector<8x25xf32> to vector<8x17xf32>
    %512 = arith.addf %510, %420 : vector<8x8xf32>
    %513 = vector.extract_strided_slice %511 {offsets = [0, 1], sizes = [8, 1], strides = [1, 1]} : vector<8x17xf32> to vector<8x1xf32>
    %514 = vector.broadcast %513 : vector<8x1xf32> to vector<8x8xf32>
    %515 = arith.mulf %28, %514 : vector<8x8xf32>
    %516 = arith.addf %512, %515 : vector<8x8xf32>
    %517 = vector.extract_strided_slice %511 {offsets = [0, 2], sizes = [8, 1], strides = [1, 1]} : vector<8x17xf32> to vector<8x1xf32>
    %518 = vector.broadcast %517 : vector<8x1xf32> to vector<8x8xf32>
    %519 = arith.mulf %32, %518 : vector<8x8xf32>
    %520 = arith.addf %516, %519 : vector<8x8xf32>
    %521 = vector.extract_strided_slice %511 {offsets = [0, 3], sizes = [8, 1], strides = [1, 1]} : vector<8x17xf32> to vector<8x1xf32>
    %522 = vector.broadcast %521 : vector<8x1xf32> to vector<8x8xf32>
    %523 = arith.mulf %36, %522 : vector<8x8xf32>
    %524 = arith.addf %520, %523 : vector<8x8xf32>
    %525 = vector.extract_strided_slice %511 {offsets = [0, 4], sizes = [8, 1], strides = [1, 1]} : vector<8x17xf32> to vector<8x1xf32>
    %526 = vector.broadcast %525 : vector<8x1xf32> to vector<8x8xf32>
    %527 = arith.mulf %40, %526 : vector<8x8xf32>
    %528 = arith.addf %524, %527 : vector<8x8xf32>
    %529 = vector.extract_strided_slice %511 {offsets = [0, 5], sizes = [8, 1], strides = [1, 1]} : vector<8x17xf32> to vector<8x1xf32>
    %530 = vector.broadcast %529 : vector<8x1xf32> to vector<8x8xf32>
    %531 = arith.mulf %44, %530 : vector<8x8xf32>
    %532 = arith.addf %528, %531 : vector<8x8xf32>
    %533 = vector.extract_strided_slice %511 {offsets = [0, 6], sizes = [8, 1], strides = [1, 1]} : vector<8x17xf32> to vector<8x1xf32>
    %534 = vector.broadcast %533 : vector<8x1xf32> to vector<8x8xf32>
    %535 = arith.mulf %48, %534 : vector<8x8xf32>
    %536 = arith.addf %532, %535 : vector<8x8xf32>
    %537 = vector.extract_strided_slice %511 {offsets = [0, 7], sizes = [8, 1], strides = [1, 1]} : vector<8x17xf32> to vector<8x1xf32>
    %538 = vector.broadcast %537 : vector<8x1xf32> to vector<8x8xf32>
    %539 = arith.mulf %52, %538 : vector<8x8xf32>
    %540 = arith.addf %536, %539 : vector<8x8xf32>
    %541 = vector.extract_strided_slice %511 {offsets = [0, 8], sizes = [8, 1], strides = [1, 1]} : vector<8x17xf32> to vector<8x1xf32>
    %542 = vector.broadcast %541 : vector<8x1xf32> to vector<8x8xf32>
    %543 = arith.mulf %56, %542 : vector<8x8xf32>
    %544 = arith.addf %540, %543 : vector<8x8xf32>
    %545 = vector.extract_strided_slice %511 {offsets = [0, 9], sizes = [8, 1], strides = [1, 1]} : vector<8x17xf32> to vector<8x1xf32>
    %546 = vector.broadcast %545 : vector<8x1xf32> to vector<8x8xf32>
    %547 = arith.mulf %60, %546 : vector<8x8xf32>
    %548 = arith.addf %544, %547 : vector<8x8xf32>
    %549 = vector.extract_strided_slice %511 {offsets = [0, 10], sizes = [8, 1], strides = [1, 1]} : vector<8x17xf32> to vector<8x1xf32>
    %550 = vector.broadcast %549 : vector<8x1xf32> to vector<8x8xf32>
    %551 = arith.mulf %64, %550 : vector<8x8xf32>
    %552 = arith.addf %548, %551 : vector<8x8xf32>
    %553 = vector.extract_strided_slice %511 {offsets = [0, 11], sizes = [8, 1], strides = [1, 1]} : vector<8x17xf32> to vector<8x1xf32>
    %554 = vector.broadcast %553 : vector<8x1xf32> to vector<8x8xf32>
    %555 = arith.mulf %68, %554 : vector<8x8xf32>
    %556 = arith.addf %552, %555 : vector<8x8xf32>
    %557 = vector.extract_strided_slice %511 {offsets = [0, 12], sizes = [8, 1], strides = [1, 1]} : vector<8x17xf32> to vector<8x1xf32>
    %558 = vector.broadcast %557 : vector<8x1xf32> to vector<8x8xf32>
    %559 = arith.mulf %72, %558 : vector<8x8xf32>
    %560 = arith.addf %556, %559 : vector<8x8xf32>
    %561 = vector.extract_strided_slice %511 {offsets = [0, 13], sizes = [8, 1], strides = [1, 1]} : vector<8x17xf32> to vector<8x1xf32>
    %562 = vector.broadcast %561 : vector<8x1xf32> to vector<8x8xf32>
    %563 = arith.mulf %76, %562 : vector<8x8xf32>
    %564 = arith.addf %560, %563 : vector<8x8xf32>
    %565 = vector.extract_strided_slice %511 {offsets = [0, 14], sizes = [8, 1], strides = [1, 1]} : vector<8x17xf32> to vector<8x1xf32>
    %566 = vector.broadcast %565 : vector<8x1xf32> to vector<8x8xf32>
    %567 = arith.mulf %80, %566 : vector<8x8xf32>
    %568 = arith.addf %564, %567 : vector<8x8xf32>
    %569 = vector.extract_strided_slice %511 {offsets = [0, 15], sizes = [8, 1], strides = [1, 1]} : vector<8x17xf32> to vector<8x1xf32>
    %570 = vector.broadcast %569 : vector<8x1xf32> to vector<8x8xf32>
    %571 = arith.mulf %84, %570 : vector<8x8xf32>
    %572 = arith.addf %568, %571 : vector<8x8xf32>
    %cst_54 = arith.constant dense<0xFF800000> : vector<8xf32>
    %573 = vector.multi_reduction <maximumf>, %572, %cst_54 [1] : vector<8x8xf32> to vector<8xf32>
    %574 = vector.shape_cast %573 : vector<8xf32> to vector<8x1xf32>
    %575 = vector.broadcast %574 : vector<8x1xf32> to vector<8x8xf32>
    %576 = arith.subf %572, %575 : vector<8x8xf32>
    %577 = math.exp %576 : vector<8x8xf32>
    %cst_55 = arith.constant dense<0.000000e+00> : vector<8xf32>
    %578 = vector.multi_reduction <add>, %577, %cst_55 [1] : vector<8x8xf32> to vector<8xf32>
    %579 = vector.shape_cast %578 : vector<8xf32> to vector<8x1xf32>
    %580 = tpu.reciprocal %579 {approx = true} : vector<8x1xf32> -> vector<8x1xf32>
    %581 = vector.broadcast %580 : vector<8x1xf32> to vector<8x8xf32>
    %582 = arith.mulf %577, %581 : vector<8x8xf32>
    %583 = arith.truncf %582 : vector<8x8xf32> to vector<8x8xbf16>
    %cst_56 = arith.constant dense<0.000000e+00> : vector<8x32xf32>
    %584 = tpu.matmul %583, %505, %cst_56 {dimension_numbers = #tpu.dot_dimension_numbers<[1], [0], [0], [1], [0, 0, 1, 1], [], []>} : vector<8x8xbf16>, vector<8x32xbf16>, vector<8x32xf32> -> vector<8x32xf32>
    %585 = vector.extract_strided_slice %11 {offsets = [8, 64], sizes = [8, 32], strides = [1, 1]} : vector<32x128xbf16> to vector<8x32xbf16>
    %586 = vector.extract_strided_slice %13 {offsets = [8, 64], sizes = [8, 32], strides = [1, 1]} : vector<32x128xbf16> to vector<8x32xbf16>
    %587 = vector.extract_strided_slice %15 {offsets = [8, 64], sizes = [8, 32], strides = [1, 1]} : vector<32x128xbf16> to vector<8x32xbf16>
    %c2_57 = arith.constant 2 : index
    %c0_58 = arith.constant 0 : index
    %c0_59 = arith.constant 0 : index
    %588 = vector.load %arg4[%c2_57, %c0_58, %c0_59] : memref<4x17x32xbf16, #tpu.memory_space<vmem>>, vector<1x17x32xbf16>
    %589 = vector.shape_cast %588 : vector<1x17x32xbf16> to vector<17x32xbf16>
    %590 = tpu.concatenate %586, %589 in 0 : vector<8x32xbf16>, vector<17x32xbf16> -> vector<25x32xbf16>
    %cst_60 = arith.constant dense<0.000000e+00> : vector<8x25xf32>
    %591 = tpu.matmul %585, %590, %cst_60 {dimension_numbers = #tpu.dot_dimension_numbers<[1], [1], [0], [0], [0, 0, 1, 0], [], []>} : vector<8x32xbf16>, vector<25x32xbf16>, vector<8x25xf32> -> vector<8x25xf32>
    %592 = vector.extract_strided_slice %591 {offsets = [0, 0], sizes = [8, 8], strides = [1, 1]} : vector<8x25xf32> to vector<8x8xf32>
    %593 = vector.extract_strided_slice %591 {offsets = [0, 8], sizes = [8, 17], strides = [1, 1]} : vector<8x25xf32> to vector<8x17xf32>
    %594 = arith.addf %592, %420 : vector<8x8xf32>
    %595 = vector.extract_strided_slice %593 {offsets = [0, 1], sizes = [8, 1], strides = [1, 1]} : vector<8x17xf32> to vector<8x1xf32>
    %596 = vector.broadcast %595 : vector<8x1xf32> to vector<8x8xf32>
    %597 = arith.mulf %28, %596 : vector<8x8xf32>
    %598 = arith.addf %594, %597 : vector<8x8xf32>
    %599 = vector.extract_strided_slice %593 {offsets = [0, 2], sizes = [8, 1], strides = [1, 1]} : vector<8x17xf32> to vector<8x1xf32>
    %600 = vector.broadcast %599 : vector<8x1xf32> to vector<8x8xf32>
    %601 = arith.mulf %32, %600 : vector<8x8xf32>
    %602 = arith.addf %598, %601 : vector<8x8xf32>
    %603 = vector.extract_strided_slice %593 {offsets = [0, 3], sizes = [8, 1], strides = [1, 1]} : vector<8x17xf32> to vector<8x1xf32>
    %604 = vector.broadcast %603 : vector<8x1xf32> to vector<8x8xf32>
    %605 = arith.mulf %36, %604 : vector<8x8xf32>
    %606 = arith.addf %602, %605 : vector<8x8xf32>
    %607 = vector.extract_strided_slice %593 {offsets = [0, 4], sizes = [8, 1], strides = [1, 1]} : vector<8x17xf32> to vector<8x1xf32>
    %608 = vector.broadcast %607 : vector<8x1xf32> to vector<8x8xf32>
    %609 = arith.mulf %40, %608 : vector<8x8xf32>
    %610 = arith.addf %606, %609 : vector<8x8xf32>
    %611 = vector.extract_strided_slice %593 {offsets = [0, 5], sizes = [8, 1], strides = [1, 1]} : vector<8x17xf32> to vector<8x1xf32>
    %612 = vector.broadcast %611 : vector<8x1xf32> to vector<8x8xf32>
    %613 = arith.mulf %44, %612 : vector<8x8xf32>
    %614 = arith.addf %610, %613 : vector<8x8xf32>
    %615 = vector.extract_strided_slice %593 {offsets = [0, 6], sizes = [8, 1], strides = [1, 1]} : vector<8x17xf32> to vector<8x1xf32>
    %616 = vector.broadcast %615 : vector<8x1xf32> to vector<8x8xf32>
    %617 = arith.mulf %48, %616 : vector<8x8xf32>
    %618 = arith.addf %614, %617 : vector<8x8xf32>
    %619 = vector.extract_strided_slice %593 {offsets = [0, 7], sizes = [8, 1], strides = [1, 1]} : vector<8x17xf32> to vector<8x1xf32>
    %620 = vector.broadcast %619 : vector<8x1xf32> to vector<8x8xf32>
    %621 = arith.mulf %52, %620 : vector<8x8xf32>
    %622 = arith.addf %618, %621 : vector<8x8xf32>
    %623 = vector.extract_strided_slice %593 {offsets = [0, 8], sizes = [8, 1], strides = [1, 1]} : vector<8x17xf32> to vector<8x1xf32>
    %624 = vector.broadcast %623 : vector<8x1xf32> to vector<8x8xf32>
    %625 = arith.mulf %56, %624 : vector<8x8xf32>
    %626 = arith.addf %622, %625 : vector<8x8xf32>
    %627 = vector.extract_strided_slice %593 {offsets = [0, 9], sizes = [8, 1], strides = [1, 1]} : vector<8x17xf32> to vector<8x1xf32>
    %628 = vector.broadcast %627 : vector<8x1xf32> to vector<8x8xf32>
    %629 = arith.mulf %60, %628 : vector<8x8xf32>
    %630 = arith.addf %626, %629 : vector<8x8xf32>
    %631 = vector.extract_strided_slice %593 {offsets = [0, 10], sizes = [8, 1], strides = [1, 1]} : vector<8x17xf32> to vector<8x1xf32>
    %632 = vector.broadcast %631 : vector<8x1xf32> to vector<8x8xf32>
    %633 = arith.mulf %64, %632 : vector<8x8xf32>
    %634 = arith.addf %630, %633 : vector<8x8xf32>
    %635 = vector.extract_strided_slice %593 {offsets = [0, 11], sizes = [8, 1], strides = [1, 1]} : vector<8x17xf32> to vector<8x1xf32>
    %636 = vector.broadcast %635 : vector<8x1xf32> to vector<8x8xf32>
    %637 = arith.mulf %68, %636 : vector<8x8xf32>
    %638 = arith.addf %634, %637 : vector<8x8xf32>
    %639 = vector.extract_strided_slice %593 {offsets = [0, 12], sizes = [8, 1], strides = [1, 1]} : vector<8x17xf32> to vector<8x1xf32>
    %640 = vector.broadcast %639 : vector<8x1xf32> to vector<8x8xf32>
    %641 = arith.mulf %72, %640 : vector<8x8xf32>
    %642 = arith.addf %638, %641 : vector<8x8xf32>
    %643 = vector.extract_strided_slice %593 {offsets = [0, 13], sizes = [8, 1], strides = [1, 1]} : vector<8x17xf32> to vector<8x1xf32>
    %644 = vector.broadcast %643 : vector<8x1xf32> to vector<8x8xf32>
    %645 = arith.mulf %76, %644 : vector<8x8xf32>
    %646 = arith.addf %642, %645 : vector<8x8xf32>
    %647 = vector.extract_strided_slice %593 {offsets = [0, 14], sizes = [8, 1], strides = [1, 1]} : vector<8x17xf32> to vector<8x1xf32>
    %648 = vector.broadcast %647 : vector<8x1xf32> to vector<8x8xf32>
    %649 = arith.mulf %80, %648 : vector<8x8xf32>
    %650 = arith.addf %646, %649 : vector<8x8xf32>
    %651 = vector.extract_strided_slice %593 {offsets = [0, 15], sizes = [8, 1], strides = [1, 1]} : vector<8x17xf32> to vector<8x1xf32>
    %652 = vector.broadcast %651 : vector<8x1xf32> to vector<8x8xf32>
    %653 = arith.mulf %84, %652 : vector<8x8xf32>
    %654 = arith.addf %650, %653 : vector<8x8xf32>
    %cst_61 = arith.constant dense<0xFF800000> : vector<8xf32>
    %655 = vector.multi_reduction <maximumf>, %654, %cst_61 [1] : vector<8x8xf32> to vector<8xf32>
    %656 = vector.shape_cast %655 : vector<8xf32> to vector<8x1xf32>
    %657 = vector.broadcast %656 : vector<8x1xf32> to vector<8x8xf32>
    %658 = arith.subf %654, %657 : vector<8x8xf32>
    %659 = math.exp %658 : vector<8x8xf32>
    %cst_62 = arith.constant dense<0.000000e+00> : vector<8xf32>
    %660 = vector.multi_reduction <add>, %659, %cst_62 [1] : vector<8x8xf32> to vector<8xf32>
    %661 = vector.shape_cast %660 : vector<8xf32> to vector<8x1xf32>
    %662 = tpu.reciprocal %661 {approx = true} : vector<8x1xf32> -> vector<8x1xf32>
    %663 = vector.broadcast %662 : vector<8x1xf32> to vector<8x8xf32>
    %664 = arith.mulf %659, %663 : vector<8x8xf32>
    %665 = arith.truncf %664 : vector<8x8xf32> to vector<8x8xbf16>
    %cst_63 = arith.constant dense<0.000000e+00> : vector<8x32xf32>
    %666 = tpu.matmul %665, %587, %cst_63 {dimension_numbers = #tpu.dot_dimension_numbers<[1], [0], [0], [1], [0, 0, 1, 1], [], []>} : vector<8x8xbf16>, vector<8x32xbf16>, vector<8x32xf32> -> vector<8x32xf32>
    %667 = vector.extract_strided_slice %11 {offsets = [8, 96], sizes = [8, 32], strides = [1, 1]} : vector<32x128xbf16> to vector<8x32xbf16>
    %668 = vector.extract_strided_slice %13 {offsets = [8, 96], sizes = [8, 32], strides = [1, 1]} : vector<32x128xbf16> to vector<8x32xbf16>
    %669 = vector.extract_strided_slice %15 {offsets = [8, 96], sizes = [8, 32], strides = [1, 1]} : vector<32x128xbf16> to vector<8x32xbf16>
    %c3_64 = arith.constant 3 : index
    %c0_65 = arith.constant 0 : index
    %c0_66 = arith.constant 0 : index
    %670 = vector.load %arg4[%c3_64, %c0_65, %c0_66] : memref<4x17x32xbf16, #tpu.memory_space<vmem>>, vector<1x17x32xbf16>
    %671 = vector.shape_cast %670 : vector<1x17x32xbf16> to vector<17x32xbf16>
    %672 = tpu.concatenate %668, %671 in 0 : vector<8x32xbf16>, vector<17x32xbf16> -> vector<25x32xbf16>
    %cst_67 = arith.constant dense<0.000000e+00> : vector<8x25xf32>
    %673 = tpu.matmul %667, %672, %cst_67 {dimension_numbers = #tpu.dot_dimension_numbers<[1], [1], [0], [0], [0, 0, 1, 0], [], []>} : vector<8x32xbf16>, vector<25x32xbf16>, vector<8x25xf32> -> vector<8x25xf32>
    %674 = vector.extract_strided_slice %673 {offsets = [0, 0], sizes = [8, 8], strides = [1, 1]} : vector<8x25xf32> to vector<8x8xf32>
    %675 = vector.extract_strided_slice %673 {offsets = [0, 8], sizes = [8, 17], strides = [1, 1]} : vector<8x25xf32> to vector<8x17xf32>
    %676 = arith.addf %674, %420 : vector<8x8xf32>
    %677 = vector.extract_strided_slice %675 {offsets = [0, 1], sizes = [8, 1], strides = [1, 1]} : vector<8x17xf32> to vector<8x1xf32>
    %678 = vector.broadcast %677 : vector<8x1xf32> to vector<8x8xf32>
    %679 = arith.mulf %28, %678 : vector<8x8xf32>
    %680 = arith.addf %676, %679 : vector<8x8xf32>
    %681 = vector.extract_strided_slice %675 {offsets = [0, 2], sizes = [8, 1], strides = [1, 1]} : vector<8x17xf32> to vector<8x1xf32>
    %682 = vector.broadcast %681 : vector<8x1xf32> to vector<8x8xf32>
    %683 = arith.mulf %32, %682 : vector<8x8xf32>
    %684 = arith.addf %680, %683 : vector<8x8xf32>
    %685 = vector.extract_strided_slice %675 {offsets = [0, 3], sizes = [8, 1], strides = [1, 1]} : vector<8x17xf32> to vector<8x1xf32>
    %686 = vector.broadcast %685 : vector<8x1xf32> to vector<8x8xf32>
    %687 = arith.mulf %36, %686 : vector<8x8xf32>
    %688 = arith.addf %684, %687 : vector<8x8xf32>
    %689 = vector.extract_strided_slice %675 {offsets = [0, 4], sizes = [8, 1], strides = [1, 1]} : vector<8x17xf32> to vector<8x1xf32>
    %690 = vector.broadcast %689 : vector<8x1xf32> to vector<8x8xf32>
    %691 = arith.mulf %40, %690 : vector<8x8xf32>
    %692 = arith.addf %688, %691 : vector<8x8xf32>
    %693 = vector.extract_strided_slice %675 {offsets = [0, 5], sizes = [8, 1], strides = [1, 1]} : vector<8x17xf32> to vector<8x1xf32>
    %694 = vector.broadcast %693 : vector<8x1xf32> to vector<8x8xf32>
    %695 = arith.mulf %44, %694 : vector<8x8xf32>
    %696 = arith.addf %692, %695 : vector<8x8xf32>
    %697 = vector.extract_strided_slice %675 {offsets = [0, 6], sizes = [8, 1], strides = [1, 1]} : vector<8x17xf32> to vector<8x1xf32>
    %698 = vector.broadcast %697 : vector<8x1xf32> to vector<8x8xf32>
    %699 = arith.mulf %48, %698 : vector<8x8xf32>
    %700 = arith.addf %696, %699 : vector<8x8xf32>
    %701 = vector.extract_strided_slice %675 {offsets = [0, 7], sizes = [8, 1], strides = [1, 1]} : vector<8x17xf32> to vector<8x1xf32>
    %702 = vector.broadcast %701 : vector<8x1xf32> to vector<8x8xf32>
    %703 = arith.mulf %52, %702 : vector<8x8xf32>
    %704 = arith.addf %700, %703 : vector<8x8xf32>
    %705 = vector.extract_strided_slice %675 {offsets = [0, 8], sizes = [8, 1], strides = [1, 1]} : vector<8x17xf32> to vector<8x1xf32>
    %706 = vector.broadcast %705 : vector<8x1xf32> to vector<8x8xf32>
    %707 = arith.mulf %56, %706 : vector<8x8xf32>
    %708 = arith.addf %704, %707 : vector<8x8xf32>
    %709 = vector.extract_strided_slice %675 {offsets = [0, 9], sizes = [8, 1], strides = [1, 1]} : vector<8x17xf32> to vector<8x1xf32>
    %710 = vector.broadcast %709 : vector<8x1xf32> to vector<8x8xf32>
    %711 = arith.mulf %60, %710 : vector<8x8xf32>
    %712 = arith.addf %708, %711 : vector<8x8xf32>
    %713 = vector.extract_strided_slice %675 {offsets = [0, 10], sizes = [8, 1], strides = [1, 1]} : vector<8x17xf32> to vector<8x1xf32>
    %714 = vector.broadcast %713 : vector<8x1xf32> to vector<8x8xf32>
    %715 = arith.mulf %64, %714 : vector<8x8xf32>
    %716 = arith.addf %712, %715 : vector<8x8xf32>
    %717 = vector.extract_strided_slice %675 {offsets = [0, 11], sizes = [8, 1], strides = [1, 1]} : vector<8x17xf32> to vector<8x1xf32>
    %718 = vector.broadcast %717 : vector<8x1xf32> to vector<8x8xf32>
    %719 = arith.mulf %68, %718 : vector<8x8xf32>
    %720 = arith.addf %716, %719 : vector<8x8xf32>
    %721 = vector.extract_strided_slice %675 {offsets = [0, 12], sizes = [8, 1], strides = [1, 1]} : vector<8x17xf32> to vector<8x1xf32>
    %722 = vector.broadcast %721 : vector<8x1xf32> to vector<8x8xf32>
    %723 = arith.mulf %72, %722 : vector<8x8xf32>
    %724 = arith.addf %720, %723 : vector<8x8xf32>
    %725 = vector.extract_strided_slice %675 {offsets = [0, 13], sizes = [8, 1], strides = [1, 1]} : vector<8x17xf32> to vector<8x1xf32>
    %726 = vector.broadcast %725 : vector<8x1xf32> to vector<8x8xf32>
    %727 = arith.mulf %76, %726 : vector<8x8xf32>
    %728 = arith.addf %724, %727 : vector<8x8xf32>
    %729 = vector.extract_strided_slice %675 {offsets = [0, 14], sizes = [8, 1], strides = [1, 1]} : vector<8x17xf32> to vector<8x1xf32>
    %730 = vector.broadcast %729 : vector<8x1xf32> to vector<8x8xf32>
    %731 = arith.mulf %80, %730 : vector<8x8xf32>
    %732 = arith.addf %728, %731 : vector<8x8xf32>
    %733 = vector.extract_strided_slice %675 {offsets = [0, 15], sizes = [8, 1], strides = [1, 1]} : vector<8x17xf32> to vector<8x1xf32>
    %734 = vector.broadcast %733 : vector<8x1xf32> to vector<8x8xf32>
    %735 = arith.mulf %84, %734 : vector<8x8xf32>
    %736 = arith.addf %732, %735 : vector<8x8xf32>
    %cst_68 = arith.constant dense<0xFF800000> : vector<8xf32>
    %737 = vector.multi_reduction <maximumf>, %736, %cst_68 [1] : vector<8x8xf32> to vector<8xf32>
    %738 = vector.shape_cast %737 : vector<8xf32> to vector<8x1xf32>
    %739 = vector.broadcast %738 : vector<8x1xf32> to vector<8x8xf32>
    %740 = arith.subf %736, %739 : vector<8x8xf32>
    %741 = math.exp %740 : vector<8x8xf32>
    %cst_69 = arith.constant dense<0.000000e+00> : vector<8xf32>
    %742 = vector.multi_reduction <add>, %741, %cst_69 [1] : vector<8x8xf32> to vector<8xf32>
    %743 = vector.shape_cast %742 : vector<8xf32> to vector<8x1xf32>
    %744 = tpu.reciprocal %743 {approx = true} : vector<8x1xf32> -> vector<8x1xf32>
    %745 = vector.broadcast %744 : vector<8x1xf32> to vector<8x8xf32>
    %746 = arith.mulf %741, %745 : vector<8x8xf32>
    %747 = arith.truncf %746 : vector<8x8xf32> to vector<8x8xbf16>
    %cst_70 = arith.constant dense<0.000000e+00> : vector<8x32xf32>
    %748 = tpu.matmul %747, %669, %cst_70 {dimension_numbers = #tpu.dot_dimension_numbers<[1], [0], [0], [1], [0, 0, 1, 1], [], []>} : vector<8x8xbf16>, vector<8x32xbf16>, vector<8x32xf32> -> vector<8x32xf32>
    %749 = tpu.concatenate %502, %584, %666, %748 in 1 : vector<8x32xf32>, vector<8x32xf32>, vector<8x32xf32>, vector<8x32xf32> -> vector<8x128xf32>
    %c1_71 = arith.constant 1 : index
    %c0_72 = arith.constant 0 : index
    %c0_73 = arith.constant 0 : index
    %750 = vector.load %arg6[%c1_71, %c0_72, %c0_73] : memref<4x8x128xf32, #tpu.memory_space<vmem>>, vector<1x8x128xf32>
    %751 = vector.shape_cast %750 : vector<1x8x128xf32> to vector<8x128xf32>
    %752 = vector.shape_cast %749 : vector<8x128xf32> to vector<1x8x128xf32>
    tpu.vector_store %arg6[%c1_71, %c0_72, %c0_73], %752 {strides = array<i32>} : memref<4x8x128xf32, #tpu.memory_space<vmem>>, vector<1x8x128xf32>,
    %c0_74 = arith.constant 0 : index
    %c0_75 = arith.constant 0 : index
    %c0_76 = arith.constant 0 : index
    %753 = vector.load %arg5[%c0_74, %c0_75, %c0_76] : memref<1x8x8xf32, #tpu.memory_space<vmem>>, vector<1x8x8xf32>
    %754 = vector.shape_cast %753 : vector<1x8x8xf32> to vector<8x8xf32>
    %755 = vector.extract_strided_slice %11 {offsets = [16, 0], sizes = [8, 32], strides = [1, 1]} : vector<32x128xbf16> to vector<8x32xbf16>
    %756 = vector.extract_strided_slice %13 {offsets = [16, 0], sizes = [8, 32], strides = [1, 1]} : vector<32x128xbf16> to vector<8x32xbf16>
    %757 = vector.extract_strided_slice %15 {offsets = [16, 0], sizes = [8, 32], strides = [1, 1]} : vector<32x128xbf16> to vector<8x32xbf16>
    %c0_77 = arith.constant 0 : index
    %c0_78 = arith.constant 0 : index
    %c0_79 = arith.constant 0 : index
    %758 = vector.load %arg4[%c0_77, %c0_78, %c0_79] : memref<4x17x32xbf16, #tpu.memory_space<vmem>>, vector<1x17x32xbf16>
    %759 = vector.shape_cast %758 : vector<1x17x32xbf16> to vector<17x32xbf16>
    %760 = tpu.concatenate %756, %759 in 0 : vector<8x32xbf16>, vector<17x32xbf16> -> vector<25x32xbf16>
    %cst_80 = arith.constant dense<0.000000e+00> : vector<8x25xf32>
    %761 = tpu.matmul %755, %760, %cst_80 {dimension_numbers = #tpu.dot_dimension_numbers<[1], [1], [0], [0], [0, 0, 1, 0], [], []>} : vector<8x32xbf16>, vector<25x32xbf16>, vector<8x25xf32> -> vector<8x25xf32>
    %762 = vector.extract_strided_slice %761 {offsets = [0, 0], sizes = [8, 8], strides = [1, 1]} : vector<8x25xf32> to vector<8x8xf32>
    %763 = vector.extract_strided_slice %761 {offsets = [0, 8], sizes = [8, 17], strides = [1, 1]} : vector<8x25xf32> to vector<8x17xf32>
    %764 = arith.addf %762, %754 : vector<8x8xf32>
    %765 = vector.extract_strided_slice %763 {offsets = [0, 1], sizes = [8, 1], strides = [1, 1]} : vector<8x17xf32> to vector<8x1xf32>
    %766 = vector.broadcast %765 : vector<8x1xf32> to vector<8x8xf32>
    %767 = arith.mulf %28, %766 : vector<8x8xf32>
    %768 = arith.addf %764, %767 : vector<8x8xf32>
    %769 = vector.extract_strided_slice %763 {offsets = [0, 2], sizes = [8, 1], strides = [1, 1]} : vector<8x17xf32> to vector<8x1xf32>
    %770 = vector.broadcast %769 : vector<8x1xf32> to vector<8x8xf32>
    %771 = arith.mulf %32, %770 : vector<8x8xf32>
    %772 = arith.addf %768, %771 : vector<8x8xf32>
    %773 = vector.extract_strided_slice %763 {offsets = [0, 3], sizes = [8, 1], strides = [1, 1]} : vector<8x17xf32> to vector<8x1xf32>
    %774 = vector.broadcast %773 : vector<8x1xf32> to vector<8x8xf32>
    %775 = arith.mulf %36, %774 : vector<8x8xf32>
    %776 = arith.addf %772, %775 : vector<8x8xf32>
    %777 = vector.extract_strided_slice %763 {offsets = [0, 4], sizes = [8, 1], strides = [1, 1]} : vector<8x17xf32> to vector<8x1xf32>
    %778 = vector.broadcast %777 : vector<8x1xf32> to vector<8x8xf32>
    %779 = arith.mulf %40, %778 : vector<8x8xf32>
    %780 = arith.addf %776, %779 : vector<8x8xf32>
    %781 = vector.extract_strided_slice %763 {offsets = [0, 5], sizes = [8, 1], strides = [1, 1]} : vector<8x17xf32> to vector<8x1xf32>
    %782 = vector.broadcast %781 : vector<8x1xf32> to vector<8x8xf32>
    %783 = arith.mulf %44, %782 : vector<8x8xf32>
    %784 = arith.addf %780, %783 : vector<8x8xf32>
    %785 = vector.extract_strided_slice %763 {offsets = [0, 6], sizes = [8, 1], strides = [1, 1]} : vector<8x17xf32> to vector<8x1xf32>
    %786 = vector.broadcast %785 : vector<8x1xf32> to vector<8x8xf32>
    %787 = arith.mulf %48, %786 : vector<8x8xf32>
    %788 = arith.addf %784, %787 : vector<8x8xf32>
    %789 = vector.extract_strided_slice %763 {offsets = [0, 7], sizes = [8, 1], strides = [1, 1]} : vector<8x17xf32> to vector<8x1xf32>
    %790 = vector.broadcast %789 : vector<8x1xf32> to vector<8x8xf32>
    %791 = arith.mulf %52, %790 : vector<8x8xf32>
    %792 = arith.addf %788, %791 : vector<8x8xf32>
    %793 = vector.extract_strided_slice %763 {offsets = [0, 8], sizes = [8, 1], strides = [1, 1]} : vector<8x17xf32> to vector<8x1xf32>
    %794 = vector.broadcast %793 : vector<8x1xf32> to vector<8x8xf32>
    %795 = arith.mulf %56, %794 : vector<8x8xf32>
    %796 = arith.addf %792, %795 : vector<8x8xf32>
    %797 = vector.extract_strided_slice %763 {offsets = [0, 9], sizes = [8, 1], strides = [1, 1]} : vector<8x17xf32> to vector<8x1xf32>
    %798 = vector.broadcast %797 : vector<8x1xf32> to vector<8x8xf32>
    %799 = arith.mulf %60, %798 : vector<8x8xf32>
    %800 = arith.addf %796, %799 : vector<8x8xf32>
    %801 = vector.extract_strided_slice %763 {offsets = [0, 10], sizes = [8, 1], strides = [1, 1]} : vector<8x17xf32> to vector<8x1xf32>
    %802 = vector.broadcast %801 : vector<8x1xf32> to vector<8x8xf32>
    %803 = arith.mulf %64, %802 : vector<8x8xf32>
    %804 = arith.addf %800, %803 : vector<8x8xf32>
    %805 = vector.extract_strided_slice %763 {offsets = [0, 11], sizes = [8, 1], strides = [1, 1]} : vector<8x17xf32> to vector<8x1xf32>
    %806 = vector.broadcast %805 : vector<8x1xf32> to vector<8x8xf32>
    %807 = arith.mulf %68, %806 : vector<8x8xf32>
    %808 = arith.addf %804, %807 : vector<8x8xf32>
    %809 = vector.extract_strided_slice %763 {offsets = [0, 12], sizes = [8, 1], strides = [1, 1]} : vector<8x17xf32> to vector<8x1xf32>
    %810 = vector.broadcast %809 : vector<8x1xf32> to vector<8x8xf32>
    %811 = arith.mulf %72, %810 : vector<8x8xf32>
    %812 = arith.addf %808, %811 : vector<8x8xf32>
    %813 = vector.extract_strided_slice %763 {offsets = [0, 13], sizes = [8, 1], strides = [1, 1]} : vector<8x17xf32> to vector<8x1xf32>
    %814 = vector.broadcast %813 : vector<8x1xf32> to vector<8x8xf32>
    %815 = arith.mulf %76, %814 : vector<8x8xf32>
    %816 = arith.addf %812, %815 : vector<8x8xf32>
    %817 = vector.extract_strided_slice %763 {offsets = [0, 14], sizes = [8, 1], strides = [1, 1]} : vector<8x17xf32> to vector<8x1xf32>
    %818 = vector.broadcast %817 : vector<8x1xf32> to vector<8x8xf32>
    %819 = arith.mulf %80, %818 : vector<8x8xf32>
    %820 = arith.addf %816, %819 : vector<8x8xf32>
    %821 = vector.extract_strided_slice %763 {offsets = [0, 15], sizes = [8, 1], strides = [1, 1]} : vector<8x17xf32> to vector<8x1xf32>
    %822 = vector.broadcast %821 : vector<8x1xf32> to vector<8x8xf32>
    %823 = arith.mulf %84, %822 : vector<8x8xf32>
    %824 = arith.addf %820, %823 : vector<8x8xf32>
    %cst_81 = arith.constant dense<0xFF800000> : vector<8xf32>
    %825 = vector.multi_reduction <maximumf>, %824, %cst_81 [1] : vector<8x8xf32> to vector<8xf32>
    %826 = vector.shape_cast %825 : vector<8xf32> to vector<8x1xf32>
    %827 = vector.broadcast %826 : vector<8x1xf32> to vector<8x8xf32>
    %828 = arith.subf %824, %827 : vector<8x8xf32>
    %829 = math.exp %828 : vector<8x8xf32>
    %cst_82 = arith.constant dense<0.000000e+00> : vector<8xf32>
    %830 = vector.multi_reduction <add>, %829, %cst_82 [1] : vector<8x8xf32> to vector<8xf32>
    %831 = vector.shape_cast %830 : vector<8xf32> to vector<8x1xf32>
    %832 = tpu.reciprocal %831 {approx = true} : vector<8x1xf32> -> vector<8x1xf32>
    %833 = vector.broadcast %832 : vector<8x1xf32> to vector<8x8xf32>
    %834 = arith.mulf %829, %833 : vector<8x8xf32>
    %835 = arith.truncf %834 : vector<8x8xf32> to vector<8x8xbf16>
    %cst_83 = arith.constant dense<0.000000e+00> : vector<8x32xf32>
    %836 = tpu.matmul %835, %757, %cst_83 {dimension_numbers = #tpu.dot_dimension_numbers<[1], [0], [0], [1], [0, 0, 1, 1], [], []>} : vector<8x8xbf16>, vector<8x32xbf16>, vector<8x32xf32> -> vector<8x32xf32>
    %837 = vector.extract_strided_slice %11 {offsets = [16, 32], sizes = [8, 32], strides = [1, 1]} : vector<32x128xbf16> to vector<8x32xbf16>
    %838 = vector.extract_strided_slice %13 {offsets = [16, 32], sizes = [8, 32], strides = [1, 1]} : vector<32x128xbf16> to vector<8x32xbf16>
    %839 = vector.extract_strided_slice %15 {offsets = [16, 32], sizes = [8, 32], strides = [1, 1]} : vector<32x128xbf16> to vector<8x32xbf16>
    %c1_84 = arith.constant 1 : index
    %c0_85 = arith.constant 0 : index
    %c0_86 = arith.constant 0 : index
    %840 = vector.load %arg4[%c1_84, %c0_85, %c0_86] : memref<4x17x32xbf16, #tpu.memory_space<vmem>>, vector<1x17x32xbf16>
    %841 = vector.shape_cast %840 : vector<1x17x32xbf16> to vector<17x32xbf16>
    %842 = tpu.concatenate %838, %841 in 0 : vector<8x32xbf16>, vector<17x32xbf16> -> vector<25x32xbf16>
    %cst_87 = arith.constant dense<0.000000e+00> : vector<8x25xf32>
    %843 = tpu.matmul %837, %842, %cst_87 {dimension_numbers = #tpu.dot_dimension_numbers<[1], [1], [0], [0], [0, 0, 1, 0], [], []>} : vector<8x32xbf16>, vector<25x32xbf16>, vector<8x25xf32> -> vector<8x25xf32>
    %844 = vector.extract_strided_slice %843 {offsets = [0, 0], sizes = [8, 8], strides = [1, 1]} : vector<8x25xf32> to vector<8x8xf32>
    %845 = vector.extract_strided_slice %843 {offsets = [0, 8], sizes = [8, 17], strides = [1, 1]} : vector<8x25xf32> to vector<8x17xf32>
    %846 = arith.addf %844, %754 : vector<8x8xf32>
    %847 = vector.extract_strided_slice %845 {offsets = [0, 1], sizes = [8, 1], strides = [1, 1]} : vector<8x17xf32> to vector<8x1xf32>
    %848 = vector.broadcast %847 : vector<8x1xf32> to vector<8x8xf32>
    %849 = arith.mulf %28, %848 : vector<8x8xf32>
    %850 = arith.addf %846, %849 : vector<8x8xf32>
    %851 = vector.extract_strided_slice %845 {offsets = [0, 2], sizes = [8, 1], strides = [1, 1]} : vector<8x17xf32> to vector<8x1xf32>
    %852 = vector.broadcast %851 : vector<8x1xf32> to vector<8x8xf32>
    %853 = arith.mulf %32, %852 : vector<8x8xf32>
    %854 = arith.addf %850, %853 : vector<8x8xf32>
    %855 = vector.extract_strided_slice %845 {offsets = [0, 3], sizes = [8, 1], strides = [1, 1]} : vector<8x17xf32> to vector<8x1xf32>
    %856 = vector.broadcast %855 : vector<8x1xf32> to vector<8x8xf32>
    %857 = arith.mulf %36, %856 : vector<8x8xf32>
    %858 = arith.addf %854, %857 : vector<8x8xf32>
    %859 = vector.extract_strided_slice %845 {offsets = [0, 4], sizes = [8, 1], strides = [1, 1]} : vector<8x17xf32> to vector<8x1xf32>
    %860 = vector.broadcast %859 : vector<8x1xf32> to vector<8x8xf32>
    %861 = arith.mulf %40, %860 : vector<8x8xf32>
    %862 = arith.addf %858, %861 : vector<8x8xf32>
    %863 = vector.extract_strided_slice %845 {offsets = [0, 5], sizes = [8, 1], strides = [1, 1]} : vector<8x17xf32> to vector<8x1xf32>
    %864 = vector.broadcast %863 : vector<8x1xf32> to vector<8x8xf32>
    %865 = arith.mulf %44, %864 : vector<8x8xf32>
    %866 = arith.addf %862, %865 : vector<8x8xf32>
    %867 = vector.extract_strided_slice %845 {offsets = [0, 6], sizes = [8, 1], strides = [1, 1]} : vector<8x17xf32> to vector<8x1xf32>
    %868 = vector.broadcast %867 : vector<8x1xf32> to vector<8x8xf32>
    %869 = arith.mulf %48, %868 : vector<8x8xf32>
    %870 = arith.addf %866, %869 : vector<8x8xf32>
    %871 = vector.extract_strided_slice %845 {offsets = [0, 7], sizes = [8, 1], strides = [1, 1]} : vector<8x17xf32> to vector<8x1xf32>
    %872 = vector.broadcast %871 : vector<8x1xf32> to vector<8x8xf32>
    %873 = arith.mulf %52, %872 : vector<8x8xf32>
    %874 = arith.addf %870, %873 : vector<8x8xf32>
    %875 = vector.extract_strided_slice %845 {offsets = [0, 8], sizes = [8, 1], strides = [1, 1]} : vector<8x17xf32> to vector<8x1xf32>
    %876 = vector.broadcast %875 : vector<8x1xf32> to vector<8x8xf32>
    %877 = arith.mulf %56, %876 : vector<8x8xf32>
    %878 = arith.addf %874, %877 : vector<8x8xf32>
    %879 = vector.extract_strided_slice %845 {offsets = [0, 9], sizes = [8, 1], strides = [1, 1]} : vector<8x17xf32> to vector<8x1xf32>
    %880 = vector.broadcast %879 : vector<8x1xf32> to vector<8x8xf32>
    %881 = arith.mulf %60, %880 : vector<8x8xf32>
    %882 = arith.addf %878, %881 : vector<8x8xf32>
    %883 = vector.extract_strided_slice %845 {offsets = [0, 10], sizes = [8, 1], strides = [1, 1]} : vector<8x17xf32> to vector<8x1xf32>
    %884 = vector.broadcast %883 : vector<8x1xf32> to vector<8x8xf32>
    %885 = arith.mulf %64, %884 : vector<8x8xf32>
    %886 = arith.addf %882, %885 : vector<8x8xf32>
    %887 = vector.extract_strided_slice %845 {offsets = [0, 11], sizes = [8, 1], strides = [1, 1]} : vector<8x17xf32> to vector<8x1xf32>
    %888 = vector.broadcast %887 : vector<8x1xf32> to vector<8x8xf32>
    %889 = arith.mulf %68, %888 : vector<8x8xf32>
    %890 = arith.addf %886, %889 : vector<8x8xf32>
    %891 = vector.extract_strided_slice %845 {offsets = [0, 12], sizes = [8, 1], strides = [1, 1]} : vector<8x17xf32> to vector<8x1xf32>
    %892 = vector.broadcast %891 : vector<8x1xf32> to vector<8x8xf32>
    %893 = arith.mulf %72, %892 : vector<8x8xf32>
    %894 = arith.addf %890, %893 : vector<8x8xf32>
    %895 = vector.extract_strided_slice %845 {offsets = [0, 13], sizes = [8, 1], strides = [1, 1]} : vector<8x17xf32> to vector<8x1xf32>
    %896 = vector.broadcast %895 : vector<8x1xf32> to vector<8x8xf32>
    %897 = arith.mulf %76, %896 : vector<8x8xf32>
    %898 = arith.addf %894, %897 : vector<8x8xf32>
    %899 = vector.extract_strided_slice %845 {offsets = [0, 14], sizes = [8, 1], strides = [1, 1]} : vector<8x17xf32> to vector<8x1xf32>
    %900 = vector.broadcast %899 : vector<8x1xf32> to vector<8x8xf32>
    %901 = arith.mulf %80, %900 : vector<8x8xf32>
    %902 = arith.addf %898, %901 : vector<8x8xf32>
    %903 = vector.extract_strided_slice %845 {offsets = [0, 15], sizes = [8, 1], strides = [1, 1]} : vector<8x17xf32> to vector<8x1xf32>
    %904 = vector.broadcast %903 : vector<8x1xf32> to vector<8x8xf32>
    %905 = arith.mulf %84, %904 : vector<8x8xf32>
    %906 = arith.addf %902, %905 : vector<8x8xf32>
    %cst_88 = arith.constant dense<0xFF800000> : vector<8xf32>
    %907 = vector.multi_reduction <maximumf>, %906, %cst_88 [1] : vector<8x8xf32> to vector<8xf32>
    %908 = vector.shape_cast %907 : vector<8xf32> to vector<8x1xf32>
    %909 = vector.broadcast %908 : vector<8x1xf32> to vector<8x8xf32>
    %910 = arith.subf %906, %909 : vector<8x8xf32>
    %911 = math.exp %910 : vector<8x8xf32>
    %cst_89 = arith.constant dense<0.000000e+00> : vector<8xf32>
    %912 = vector.multi_reduction <add>, %911, %cst_89 [1] : vector<8x8xf32> to vector<8xf32>
    %913 = vector.shape_cast %912 : vector<8xf32> to vector<8x1xf32>
    %914 = tpu.reciprocal %913 {approx = true} : vector<8x1xf32> -> vector<8x1xf32>
    %915 = vector.broadcast %914 : vector<8x1xf32> to vector<8x8xf32>
    %916 = arith.mulf %911, %915 : vector<8x8xf32>
    %917 = arith.truncf %916 : vector<8x8xf32> to vector<8x8xbf16>
    %cst_90 = arith.constant dense<0.000000e+00> : vector<8x32xf32>
    %918 = tpu.matmul %917, %839, %cst_90 {dimension_numbers = #tpu.dot_dimension_numbers<[1], [0], [0], [1], [0, 0, 1, 1], [], []>} : vector<8x8xbf16>, vector<8x32xbf16>, vector<8x32xf32> -> vector<8x32xf32>
    %919 = vector.extract_strided_slice %11 {offsets = [16, 64], sizes = [8, 32], strides = [1, 1]} : vector<32x128xbf16> to vector<8x32xbf16>
    %920 = vector.extract_strided_slice %13 {offsets = [16, 64], sizes = [8, 32], strides = [1, 1]} : vector<32x128xbf16> to vector<8x32xbf16>
    %921 = vector.extract_strided_slice %15 {offsets = [16, 64], sizes = [8, 32], strides = [1, 1]} : vector<32x128xbf16> to vector<8x32xbf16>
    %c2_91 = arith.constant 2 : index
    %c0_92 = arith.constant 0 : index
    %c0_93 = arith.constant 0 : index
    %922 = vector.load %arg4[%c2_91, %c0_92, %c0_93] : memref<4x17x32xbf16, #tpu.memory_space<vmem>>, vector<1x17x32xbf16>
    %923 = vector.shape_cast %922 : vector<1x17x32xbf16> to vector<17x32xbf16>
    %924 = tpu.concatenate %920, %923 in 0 : vector<8x32xbf16>, vector<17x32xbf16> -> vector<25x32xbf16>
    %cst_94 = arith.constant dense<0.000000e+00> : vector<8x25xf32>
    %925 = tpu.matmul %919, %924, %cst_94 {dimension_numbers = #tpu.dot_dimension_numbers<[1], [1], [0], [0], [0, 0, 1, 0], [], []>} : vector<8x32xbf16>, vector<25x32xbf16>, vector<8x25xf32> -> vector<8x25xf32>
    %926 = vector.extract_strided_slice %925 {offsets = [0, 0], sizes = [8, 8], strides = [1, 1]} : vector<8x25xf32> to vector<8x8xf32>
    %927 = vector.extract_strided_slice %925 {offsets = [0, 8], sizes = [8, 17], strides = [1, 1]} : vector<8x25xf32> to vector<8x17xf32>
    %928 = arith.addf %926, %754 : vector<8x8xf32>
    %929 = vector.extract_strided_slice %927 {offsets = [0, 1], sizes = [8, 1], strides = [1, 1]} : vector<8x17xf32> to vector<8x1xf32>
    %930 = vector.broadcast %929 : vector<8x1xf32> to vector<8x8xf32>
    %931 = arith.mulf %28, %930 : vector<8x8xf32>
    %932 = arith.addf %928, %931 : vector<8x8xf32>
    %933 = vector.extract_strided_slice %927 {offsets = [0, 2], sizes = [8, 1], strides = [1, 1]} : vector<8x17xf32> to vector<8x1xf32>
    %934 = vector.broadcast %933 : vector<8x1xf32> to vector<8x8xf32>
    %935 = arith.mulf %32, %934 : vector<8x8xf32>
    %936 = arith.addf %932, %935 : vector<8x8xf32>
    %937 = vector.extract_strided_slice %927 {offsets = [0, 3], sizes = [8, 1], strides = [1, 1]} : vector<8x17xf32> to vector<8x1xf32>
    %938 = vector.broadcast %937 : vector<8x1xf32> to vector<8x8xf32>
    %939 = arith.mulf %36, %938 : vector<8x8xf32>
    %940 = arith.addf %936, %939 : vector<8x8xf32>
    %941 = vector.extract_strided_slice %927 {offsets = [0, 4], sizes = [8, 1], strides = [1, 1]} : vector<8x17xf32> to vector<8x1xf32>
    %942 = vector.broadcast %941 : vector<8x1xf32> to vector<8x8xf32>
    %943 = arith.mulf %40, %942 : vector<8x8xf32>
    %944 = arith.addf %940, %943 : vector<8x8xf32>
    %945 = vector.extract_strided_slice %927 {offsets = [0, 5], sizes = [8, 1], strides = [1, 1]} : vector<8x17xf32> to vector<8x1xf32>
    %946 = vector.broadcast %945 : vector<8x1xf32> to vector<8x8xf32>
    %947 = arith.mulf %44, %946 : vector<8x8xf32>
    %948 = arith.addf %944, %947 : vector<8x8xf32>
    %949 = vector.extract_strided_slice %927 {offsets = [0, 6], sizes = [8, 1], strides = [1, 1]} : vector<8x17xf32> to vector<8x1xf32>
    %950 = vector.broadcast %949 : vector<8x1xf32> to vector<8x8xf32>
    %951 = arith.mulf %48, %950 : vector<8x8xf32>
    %952 = arith.addf %948, %951 : vector<8x8xf32>
    %953 = vector.extract_strided_slice %927 {offsets = [0, 7], sizes = [8, 1], strides = [1, 1]} : vector<8x17xf32> to vector<8x1xf32>
    %954 = vector.broadcast %953 : vector<8x1xf32> to vector<8x8xf32>
    %955 = arith.mulf %52, %954 : vector<8x8xf32>
    %956 = arith.addf %952, %955 : vector<8x8xf32>
    %957 = vector.extract_strided_slice %927 {offsets = [0, 8], sizes = [8, 1], strides = [1, 1]} : vector<8x17xf32> to vector<8x1xf32>
    %958 = vector.broadcast %957 : vector<8x1xf32> to vector<8x8xf32>
    %959 = arith.mulf %56, %958 : vector<8x8xf32>
    %960 = arith.addf %956, %959 : vector<8x8xf32>
    %961 = vector.extract_strided_slice %927 {offsets = [0, 9], sizes = [8, 1], strides = [1, 1]} : vector<8x17xf32> to vector<8x1xf32>
    %962 = vector.broadcast %961 : vector<8x1xf32> to vector<8x8xf32>
    %963 = arith.mulf %60, %962 : vector<8x8xf32>
    %964 = arith.addf %960, %963 : vector<8x8xf32>
    %965 = vector.extract_strided_slice %927 {offsets = [0, 10], sizes = [8, 1], strides = [1, 1]} : vector<8x17xf32> to vector<8x1xf32>
    %966 = vector.broadcast %965 : vector<8x1xf32> to vector<8x8xf32>
    %967 = arith.mulf %64, %966 : vector<8x8xf32>
    %968 = arith.addf %964, %967 : vector<8x8xf32>
    %969 = vector.extract_strided_slice %927 {offsets = [0, 11], sizes = [8, 1], strides = [1, 1]} : vector<8x17xf32> to vector<8x1xf32>
    %970 = vector.broadcast %969 : vector<8x1xf32> to vector<8x8xf32>
    %971 = arith.mulf %68, %970 : vector<8x8xf32>
    %972 = arith.addf %968, %971 : vector<8x8xf32>
    %973 = vector.extract_strided_slice %927 {offsets = [0, 12], sizes = [8, 1], strides = [1, 1]} : vector<8x17xf32> to vector<8x1xf32>
    %974 = vector.broadcast %973 : vector<8x1xf32> to vector<8x8xf32>
    %975 = arith.mulf %72, %974 : vector<8x8xf32>
    %976 = arith.addf %972, %975 : vector<8x8xf32>
    %977 = vector.extract_strided_slice %927 {offsets = [0, 13], sizes = [8, 1], strides = [1, 1]} : vector<8x17xf32> to vector<8x1xf32>
    %978 = vector.broadcast %977 : vector<8x1xf32> to vector<8x8xf32>
    %979 = arith.mulf %76, %978 : vector<8x8xf32>
    %980 = arith.addf %976, %979 : vector<8x8xf32>
    %981 = vector.extract_strided_slice %927 {offsets = [0, 14], sizes = [8, 1], strides = [1, 1]} : vector<8x17xf32> to vector<8x1xf32>
    %982 = vector.broadcast %981 : vector<8x1xf32> to vector<8x8xf32>
    %983 = arith.mulf %80, %982 : vector<8x8xf32>
    %984 = arith.addf %980, %983 : vector<8x8xf32>
    %985 = vector.extract_strided_slice %927 {offsets = [0, 15], sizes = [8, 1], strides = [1, 1]} : vector<8x17xf32> to vector<8x1xf32>
    %986 = vector.broadcast %985 : vector<8x1xf32> to vector<8x8xf32>
    %987 = arith.mulf %84, %986 : vector<8x8xf32>
    %988 = arith.addf %984, %987 : vector<8x8xf32>
    %cst_95 = arith.constant dense<0xFF800000> : vector<8xf32>
    %989 = vector.multi_reduction <maximumf>, %988, %cst_95 [1] : vector<8x8xf32> to vector<8xf32>
    %990 = vector.shape_cast %989 : vector<8xf32> to vector<8x1xf32>
    %991 = vector.broadcast %990 : vector<8x1xf32> to vector<8x8xf32>
    %992 = arith.subf %988, %991 : vector<8x8xf32>
    %993 = math.exp %992 : vector<8x8xf32>
    %cst_96 = arith.constant dense<0.000000e+00> : vector<8xf32>
    %994 = vector.multi_reduction <add>, %993, %cst_96 [1] : vector<8x8xf32> to vector<8xf32>
    %995 = vector.shape_cast %994 : vector<8xf32> to vector<8x1xf32>
    %996 = tpu.reciprocal %995 {approx = true} : vector<8x1xf32> -> vector<8x1xf32>
    %997 = vector.broadcast %996 : vector<8x1xf32> to vector<8x8xf32>
    %998 = arith.mulf %993, %997 : vector<8x8xf32>
    %999 = arith.truncf %998 : vector<8x8xf32> to vector<8x8xbf16>
    %cst_97 = arith.constant dense<0.000000e+00> : vector<8x32xf32>
    %1000 = tpu.matmul %999, %921, %cst_97 {dimension_numbers = #tpu.dot_dimension_numbers<[1], [0], [0], [1], [0, 0, 1, 1], [], []>} : vector<8x8xbf16>, vector<8x32xbf16>, vector<8x32xf32> -> vector<8x32xf32>
    %1001 = vector.extract_strided_slice %11 {offsets = [16, 96], sizes = [8, 32], strides = [1, 1]} : vector<32x128xbf16> to vector<8x32xbf16>
    %1002 = vector.extract_strided_slice %13 {offsets = [16, 96], sizes = [8, 32], strides = [1, 1]} : vector<32x128xbf16> to vector<8x32xbf16>
    %1003 = vector.extract_strided_slice %15 {offsets = [16, 96], sizes = [8, 32], strides = [1, 1]} : vector<32x128xbf16> to vector<8x32xbf16>
    %c3_98 = arith.constant 3 : index
    %c0_99 = arith.constant 0 : index
    %c0_100 = arith.constant 0 : index
    %1004 = vector.load %arg4[%c3_98, %c0_99, %c0_100] : memref<4x17x32xbf16, #tpu.memory_space<vmem>>, vector<1x17x32xbf16>
    %1005 = vector.shape_cast %1004 : vector<1x17x32xbf16> to vector<17x32xbf16>
    %1006 = tpu.concatenate %1002, %1005 in 0 : vector<8x32xbf16>, vector<17x32xbf16> -> vector<25x32xbf16>
    %cst_101 = arith.constant dense<0.000000e+00> : vector<8x25xf32>
    %1007 = tpu.matmul %1001, %1006, %cst_101 {dimension_numbers = #tpu.dot_dimension_numbers<[1], [1], [0], [0], [0, 0, 1, 0], [], []>} : vector<8x32xbf16>, vector<25x32xbf16>, vector<8x25xf32> -> vector<8x25xf32>
    %1008 = vector.extract_strided_slice %1007 {offsets = [0, 0], sizes = [8, 8], strides = [1, 1]} : vector<8x25xf32> to vector<8x8xf32>
    %1009 = vector.extract_strided_slice %1007 {offsets = [0, 8], sizes = [8, 17], strides = [1, 1]} : vector<8x25xf32> to vector<8x17xf32>
    %1010 = arith.addf %1008, %754 : vector<8x8xf32>
    %1011 = vector.extract_strided_slice %1009 {offsets = [0, 1], sizes = [8, 1], strides = [1, 1]} : vector<8x17xf32> to vector<8x1xf32>
    %1012 = vector.broadcast %1011 : vector<8x1xf32> to vector<8x8xf32>
    %1013 = arith.mulf %28, %1012 : vector<8x8xf32>
    %1014 = arith.addf %1010, %1013 : vector<8x8xf32>
    %1015 = vector.extract_strided_slice %1009 {offsets = [0, 2], sizes = [8, 1], strides = [1, 1]} : vector<8x17xf32> to vector<8x1xf32>
    %1016 = vector.broadcast %1015 : vector<8x1xf32> to vector<8x8xf32>
    %1017 = arith.mulf %32, %1016 : vector<8x8xf32>
    %1018 = arith.addf %1014, %1017 : vector<8x8xf32>
    %1019 = vector.extract_strided_slice %1009 {offsets = [0, 3], sizes = [8, 1], strides = [1, 1]} : vector<8x17xf32> to vector<8x1xf32>
    %1020 = vector.broadcast %1019 : vector<8x1xf32> to vector<8x8xf32>
    %1021 = arith.mulf %36, %1020 : vector<8x8xf32>
    %1022 = arith.addf %1018, %1021 : vector<8x8xf32>
    %1023 = vector.extract_strided_slice %1009 {offsets = [0, 4], sizes = [8, 1], strides = [1, 1]} : vector<8x17xf32> to vector<8x1xf32>
    %1024 = vector.broadcast %1023 : vector<8x1xf32> to vector<8x8xf32>
    %1025 = arith.mulf %40, %1024 : vector<8x8xf32>
    %1026 = arith.addf %1022, %1025 : vector<8x8xf32>
    %1027 = vector.extract_strided_slice %1009 {offsets = [0, 5], sizes = [8, 1], strides = [1, 1]} : vector<8x17xf32> to vector<8x1xf32>
    %1028 = vector.broadcast %1027 : vector<8x1xf32> to vector<8x8xf32>
    %1029 = arith.mulf %44, %1028 : vector<8x8xf32>
    %1030 = arith.addf %1026, %1029 : vector<8x8xf32>
    %1031 = vector.extract_strided_slice %1009 {offsets = [0, 6], sizes = [8, 1], strides = [1, 1]} : vector<8x17xf32> to vector<8x1xf32>
    %1032 = vector.broadcast %1031 : vector<8x1xf32> to vector<8x8xf32>
    %1033 = arith.mulf %48, %1032 : vector<8x8xf32>
    %1034 = arith.addf %1030, %1033 : vector<8x8xf32>
    %1035 = vector.extract_strided_slice %1009 {offsets = [0, 7], sizes = [8, 1], strides = [1, 1]} : vector<8x17xf32> to vector<8x1xf32>
    %1036 = vector.broadcast %1035 : vector<8x1xf32> to vector<8x8xf32>
    %1037 = arith.mulf %52, %1036 : vector<8x8xf32>
    %1038 = arith.addf %1034, %1037 : vector<8x8xf32>
    %1039 = vector.extract_strided_slice %1009 {offsets = [0, 8], sizes = [8, 1], strides = [1, 1]} : vector<8x17xf32> to vector<8x1xf32>
    %1040 = vector.broadcast %1039 : vector<8x1xf32> to vector<8x8xf32>
    %1041 = arith.mulf %56, %1040 : vector<8x8xf32>
    %1042 = arith.addf %1038, %1041 : vector<8x8xf32>
    %1043 = vector.extract_strided_slice %1009 {offsets = [0, 9], sizes = [8, 1], strides = [1, 1]} : vector<8x17xf32> to vector<8x1xf32>
    %1044 = vector.broadcast %1043 : vector<8x1xf32> to vector<8x8xf32>
    %1045 = arith.mulf %60, %1044 : vector<8x8xf32>
    %1046 = arith.addf %1042, %1045 : vector<8x8xf32>
    %1047 = vector.extract_strided_slice %1009 {offsets = [0, 10], sizes = [8, 1], strides = [1, 1]} : vector<8x17xf32> to vector<8x1xf32>
    %1048 = vector.broadcast %1047 : vector<8x1xf32> to vector<8x8xf32>
    %1049 = arith.mulf %64, %1048 : vector<8x8xf32>
    %1050 = arith.addf %1046, %1049 : vector<8x8xf32>
    %1051 = vector.extract_strided_slice %1009 {offsets = [0, 11], sizes = [8, 1], strides = [1, 1]} : vector<8x17xf32> to vector<8x1xf32>
    %1052 = vector.broadcast %1051 : vector<8x1xf32> to vector<8x8xf32>
    %1053 = arith.mulf %68, %1052 : vector<8x8xf32>
    %1054 = arith.addf %1050, %1053 : vector<8x8xf32>
    %1055 = vector.extract_strided_slice %1009 {offsets = [0, 12], sizes = [8, 1], strides = [1, 1]} : vector<8x17xf32> to vector<8x1xf32>
    %1056 = vector.broadcast %1055 : vector<8x1xf32> to vector<8x8xf32>
    %1057 = arith.mulf %72, %1056 : vector<8x8xf32>
    %1058 = arith.addf %1054, %1057 : vector<8x8xf32>
    %1059 = vector.extract_strided_slice %1009 {offsets = [0, 13], sizes = [8, 1], strides = [1, 1]} : vector<8x17xf32> to vector<8x1xf32>
    %1060 = vector.broadcast %1059 : vector<8x1xf32> to vector<8x8xf32>
    %1061 = arith.mulf %76, %1060 : vector<8x8xf32>
    %1062 = arith.addf %1058, %1061 : vector<8x8xf32>
    %1063 = vector.extract_strided_slice %1009 {offsets = [0, 14], sizes = [8, 1], strides = [1, 1]} : vector<8x17xf32> to vector<8x1xf32>
    %1064 = vector.broadcast %1063 : vector<8x1xf32> to vector<8x8xf32>
    %1065 = arith.mulf %80, %1064 : vector<8x8xf32>
    %1066 = arith.addf %1062, %1065 : vector<8x8xf32>
    %1067 = vector.extract_strided_slice %1009 {offsets = [0, 15], sizes = [8, 1], strides = [1, 1]} : vector<8x17xf32> to vector<8x1xf32>
    %1068 = vector.broadcast %1067 : vector<8x1xf32> to vector<8x8xf32>
    %1069 = arith.mulf %84, %1068 : vector<8x8xf32>
    %1070 = arith.addf %1066, %1069 : vector<8x8xf32>
    %cst_102 = arith.constant dense<0xFF800000> : vector<8xf32>
    %1071 = vector.multi_reduction <maximumf>, %1070, %cst_102 [1] : vector<8x8xf32> to vector<8xf32>
    %1072 = vector.shape_cast %1071 : vector<8xf32> to vector<8x1xf32>
    %1073 = vector.broadcast %1072 : vector<8x1xf32> to vector<8x8xf32>
    %1074 = arith.subf %1070, %1073 : vector<8x8xf32>
    %1075 = math.exp %1074 : vector<8x8xf32>
    %cst_103 = arith.constant dense<0.000000e+00> : vector<8xf32>
    %1076 = vector.multi_reduction <add>, %1075, %cst_103 [1] : vector<8x8xf32> to vector<8xf32>
    %1077 = vector.shape_cast %1076 : vector<8xf32> to vector<8x1xf32>
    %1078 = tpu.reciprocal %1077 {approx = true} : vector<8x1xf32> -> vector<8x1xf32>
    %1079 = vector.broadcast %1078 : vector<8x1xf32> to vector<8x8xf32>
    %1080 = arith.mulf %1075, %1079 : vector<8x8xf32>
    %1081 = arith.truncf %1080 : vector<8x8xf32> to vector<8x8xbf16>
    %cst_104 = arith.constant dense<0.000000e+00> : vector<8x32xf32>
    %1082 = tpu.matmul %1081, %1003, %cst_104 {dimension_numbers = #tpu.dot_dimension_numbers<[1], [0], [0], [1], [0, 0, 1, 1], [], []>} : vector<8x8xbf16>, vector<8x32xbf16>, vector<8x32xf32> -> vector<8x32xf32>
    %1083 = tpu.concatenate %836, %918, %1000, %1082 in 1 : vector<8x32xf32>, vector<8x32xf32>, vector<8x32xf32>, vector<8x32xf32> -> vector<8x128xf32>
    %c2_105 = arith.constant 2 : index
    %c0_106 = arith.constant 0 : index
    %c0_107 = arith.constant 0 : index
    %1084 = vector.load %arg6[%c2_105, %c0_106, %c0_107] : memref<4x8x128xf32, #tpu.memory_space<vmem>>, vector<1x8x128xf32>
    %1085 = vector.shape_cast %1084 : vector<1x8x128xf32> to vector<8x128xf32>
    %1086 = vector.shape_cast %1083 : vector<8x128xf32> to vector<1x8x128xf32>
    tpu.vector_store %arg6[%c2_105, %c0_106, %c0_107], %1086 {strides = array<i32>} : memref<4x8x128xf32, #tpu.memory_space<vmem>>, vector<1x8x128xf32>,
    %c0_108 = arith.constant 0 : index
    %c0_109 = arith.constant 0 : index
    %c0_110 = arith.constant 0 : index
    %1087 = vector.load %arg5[%c0_108, %c0_109, %c0_110] : memref<1x8x8xf32, #tpu.memory_space<vmem>>, vector<1x8x8xf32>
    %1088 = vector.shape_cast %1087 : vector<1x8x8xf32> to vector<8x8xf32>
    %1089 = vector.extract_strided_slice %11 {offsets = [24, 0], sizes = [8, 32], strides = [1, 1]} : vector<32x128xbf16> to vector<8x32xbf16>
    %1090 = vector.extract_strided_slice %13 {offsets = [24, 0], sizes = [8, 32], strides = [1, 1]} : vector<32x128xbf16> to vector<8x32xbf16>
    %1091 = vector.extract_strided_slice %15 {offsets = [24, 0], sizes = [8, 32], strides = [1, 1]} : vector<32x128xbf16> to vector<8x32xbf16>
    %c0_111 = arith.constant 0 : index
    %c0_112 = arith.constant 0 : index
    %c0_113 = arith.constant 0 : index
    %1092 = vector.load %arg4[%c0_111, %c0_112, %c0_113] : memref<4x17x32xbf16, #tpu.memory_space<vmem>>, vector<1x17x32xbf16>
    %1093 = vector.shape_cast %1092 : vector<1x17x32xbf16> to vector<17x32xbf16>
    %1094 = tpu.concatenate %1090, %1093 in 0 : vector<8x32xbf16>, vector<17x32xbf16> -> vector<25x32xbf16>
    %cst_114 = arith.constant dense<0.000000e+00> : vector<8x25xf32>
    %1095 = tpu.matmul %1089, %1094, %cst_114 {dimension_numbers = #tpu.dot_dimension_numbers<[1], [1], [0], [0], [0, 0, 1, 0], [], []>} : vector<8x32xbf16>, vector<25x32xbf16>, vector<8x25xf32> -> vector<8x25xf32>
    %1096 = vector.extract_strided_slice %1095 {offsets = [0, 0], sizes = [8, 8], strides = [1, 1]} : vector<8x25xf32> to vector<8x8xf32>
    %1097 = vector.extract_strided_slice %1095 {offsets = [0, 8], sizes = [8, 17], strides = [1, 1]} : vector<8x25xf32> to vector<8x17xf32>
    %1098 = arith.addf %1096, %1088 : vector<8x8xf32>
    %1099 = vector.extract_strided_slice %1097 {offsets = [0, 1], sizes = [8, 1], strides = [1, 1]} : vector<8x17xf32> to vector<8x1xf32>
    %1100 = vector.broadcast %1099 : vector<8x1xf32> to vector<8x8xf32>
    %1101 = arith.mulf %28, %1100 : vector<8x8xf32>
    %1102 = arith.addf %1098, %1101 : vector<8x8xf32>
    %1103 = vector.extract_strided_slice %1097 {offsets = [0, 2], sizes = [8, 1], strides = [1, 1]} : vector<8x17xf32> to vector<8x1xf32>
    %1104 = vector.broadcast %1103 : vector<8x1xf32> to vector<8x8xf32>
    %1105 = arith.mulf %32, %1104 : vector<8x8xf32>
    %1106 = arith.addf %1102, %1105 : vector<8x8xf32>
    %1107 = vector.extract_strided_slice %1097 {offsets = [0, 3], sizes = [8, 1], strides = [1, 1]} : vector<8x17xf32> to vector<8x1xf32>
    %1108 = vector.broadcast %1107 : vector<8x1xf32> to vector<8x8xf32>
    %1109 = arith.mulf %36, %1108 : vector<8x8xf32>
    %1110 = arith.addf %1106, %1109 : vector<8x8xf32>
    %1111 = vector.extract_strided_slice %1097 {offsets = [0, 4], sizes = [8, 1], strides = [1, 1]} : vector<8x17xf32> to vector<8x1xf32>
    %1112 = vector.broadcast %1111 : vector<8x1xf32> to vector<8x8xf32>
    %1113 = arith.mulf %40, %1112 : vector<8x8xf32>
    %1114 = arith.addf %1110, %1113 : vector<8x8xf32>
    %1115 = vector.extract_strided_slice %1097 {offsets = [0, 5], sizes = [8, 1], strides = [1, 1]} : vector<8x17xf32> to vector<8x1xf32>
    %1116 = vector.broadcast %1115 : vector<8x1xf32> to vector<8x8xf32>
    %1117 = arith.mulf %44, %1116 : vector<8x8xf32>
    %1118 = arith.addf %1114, %1117 : vector<8x8xf32>
    %1119 = vector.extract_strided_slice %1097 {offsets = [0, 6], sizes = [8, 1], strides = [1, 1]} : vector<8x17xf32> to vector<8x1xf32>
    %1120 = vector.broadcast %1119 : vector<8x1xf32> to vector<8x8xf32>
    %1121 = arith.mulf %48, %1120 : vector<8x8xf32>
    %1122 = arith.addf %1118, %1121 : vector<8x8xf32>
    %1123 = vector.extract_strided_slice %1097 {offsets = [0, 7], sizes = [8, 1], strides = [1, 1]} : vector<8x17xf32> to vector<8x1xf32>
    %1124 = vector.broadcast %1123 : vector<8x1xf32> to vector<8x8xf32>
    %1125 = arith.mulf %52, %1124 : vector<8x8xf32>
    %1126 = arith.addf %1122, %1125 : vector<8x8xf32>
    %1127 = vector.extract_strided_slice %1097 {offsets = [0, 8], sizes = [8, 1], strides = [1, 1]} : vector<8x17xf32> to vector<8x1xf32>
    %1128 = vector.broadcast %1127 : vector<8x1xf32> to vector<8x8xf32>
    %1129 = arith.mulf %56, %1128 : vector<8x8xf32>
    %1130 = arith.addf %1126, %1129 : vector<8x8xf32>
    %1131 = vector.extract_strided_slice %1097 {offsets = [0, 9], sizes = [8, 1], strides = [1, 1]} : vector<8x17xf32> to vector<8x1xf32>
    %1132 = vector.broadcast %1131 : vector<8x1xf32> to vector<8x8xf32>
    %1133 = arith.mulf %60, %1132 : vector<8x8xf32>
    %1134 = arith.addf %1130, %1133 : vector<8x8xf32>
    %1135 = vector.extract_strided_slice %1097 {offsets = [0, 10], sizes = [8, 1], strides = [1, 1]} : vector<8x17xf32> to vector<8x1xf32>
    %1136 = vector.broadcast %1135 : vector<8x1xf32> to vector<8x8xf32>
    %1137 = arith.mulf %64, %1136 : vector<8x8xf32>
    %1138 = arith.addf %1134, %1137 : vector<8x8xf32>
    %1139 = vector.extract_strided_slice %1097 {offsets = [0, 11], sizes = [8, 1], strides = [1, 1]} : vector<8x17xf32> to vector<8x1xf32>
    %1140 = vector.broadcast %1139 : vector<8x1xf32> to vector<8x8xf32>
    %1141 = arith.mulf %68, %1140 : vector<8x8xf32>
    %1142 = arith.addf %1138, %1141 : vector<8x8xf32>
    %1143 = vector.extract_strided_slice %1097 {offsets = [0, 12], sizes = [8, 1], strides = [1, 1]} : vector<8x17xf32> to vector<8x1xf32>
    %1144 = vector.broadcast %1143 : vector<8x1xf32> to vector<8x8xf32>
    %1145 = arith.mulf %72, %1144 : vector<8x8xf32>
    %1146 = arith.addf %1142, %1145 : vector<8x8xf32>
    %1147 = vector.extract_strided_slice %1097 {offsets = [0, 13], sizes = [8, 1], strides = [1, 1]} : vector<8x17xf32> to vector<8x1xf32>
    %1148 = vector.broadcast %1147 : vector<8x1xf32> to vector<8x8xf32>
    %1149 = arith.mulf %76, %1148 : vector<8x8xf32>
    %1150 = arith.addf %1146, %1149 : vector<8x8xf32>
    %1151 = vector.extract_strided_slice %1097 {offsets = [0, 14], sizes = [8, 1], strides = [1, 1]} : vector<8x17xf32> to vector<8x1xf32>
    %1152 = vector.broadcast %1151 : vector<8x1xf32> to vector<8x8xf32>
    %1153 = arith.mulf %80, %1152 : vector<8x8xf32>
    %1154 = arith.addf %1150, %1153 : vector<8x8xf32>
    %1155 = vector.extract_strided_slice %1097 {offsets = [0, 15], sizes = [8, 1], strides = [1, 1]} : vector<8x17xf32> to vector<8x1xf32>
    %1156 = vector.broadcast %1155 : vector<8x1xf32> to vector<8x8xf32>
    %1157 = arith.mulf %84, %1156 : vector<8x8xf32>
    %1158 = arith.addf %1154, %1157 : vector<8x8xf32>
    %cst_115 = arith.constant dense<0xFF800000> : vector<8xf32>
    %1159 = vector.multi_reduction <maximumf>, %1158, %cst_115 [1] : vector<8x8xf32> to vector<8xf32>
    %1160 = vector.shape_cast %1159 : vector<8xf32> to vector<8x1xf32>
    %1161 = vector.broadcast %1160 : vector<8x1xf32> to vector<8x8xf32>
    %1162 = arith.subf %1158, %1161 : vector<8x8xf32>
    %1163 = math.exp %1162 : vector<8x8xf32>
    %cst_116 = arith.constant dense<0.000000e+00> : vector<8xf32>
    %1164 = vector.multi_reduction <add>, %1163, %cst_116 [1] : vector<8x8xf32> to vector<8xf32>
    %1165 = vector.shape_cast %1164 : vector<8xf32> to vector<8x1xf32>
    %1166 = tpu.reciprocal %1165 {approx = true} : vector<8x1xf32> -> vector<8x1xf32>
    %1167 = vector.broadcast %1166 : vector<8x1xf32> to vector<8x8xf32>
    %1168 = arith.mulf %1163, %1167 : vector<8x8xf32>
    %1169 = arith.truncf %1168 : vector<8x8xf32> to vector<8x8xbf16>
    %cst_117 = arith.constant dense<0.000000e+00> : vector<8x32xf32>
    %1170 = tpu.matmul %1169, %1091, %cst_117 {dimension_numbers = #tpu.dot_dimension_numbers<[1], [0], [0], [1], [0, 0, 1, 1], [], []>} : vector<8x8xbf16>, vector<8x32xbf16>, vector<8x32xf32> -> vector<8x32xf32>
    %1171 = vector.extract_strided_slice %11 {offsets = [24, 32], sizes = [8, 32], strides = [1, 1]} : vector<32x128xbf16> to vector<8x32xbf16>
    %1172 = vector.extract_strided_slice %13 {offsets = [24, 32], sizes = [8, 32], strides = [1, 1]} : vector<32x128xbf16> to vector<8x32xbf16>
    %1173 = vector.extract_strided_slice %15 {offsets = [24, 32], sizes = [8, 32], strides = [1, 1]} : vector<32x128xbf16> to vector<8x32xbf16>
    %c1_118 = arith.constant 1 : index
    %c0_119 = arith.constant 0 : index
    %c0_120 = arith.constant 0 : index
    %1174 = vector.load %arg4[%c1_118, %c0_119, %c0_120] : memref<4x17x32xbf16, #tpu.memory_space<vmem>>, vector<1x17x32xbf16>
    %1175 = vector.shape_cast %1174 : vector<1x17x32xbf16> to vector<17x32xbf16>
    %1176 = tpu.concatenate %1172, %1175 in 0 : vector<8x32xbf16>, vector<17x32xbf16> -> vector<25x32xbf16>
    %cst_121 = arith.constant dense<0.000000e+00> : vector<8x25xf32>
    %1177 = tpu.matmul %1171, %1176, %cst_121 {dimension_numbers = #tpu.dot_dimension_numbers<[1], [1], [0], [0], [0, 0, 1, 0], [], []>} : vector<8x32xbf16>, vector<25x32xbf16>, vector<8x25xf32> -> vector<8x25xf32>
    %1178 = vector.extract_strided_slice %1177 {offsets = [0, 0], sizes = [8, 8], strides = [1, 1]} : vector<8x25xf32> to vector<8x8xf32>
    %1179 = vector.extract_strided_slice %1177 {offsets = [0, 8], sizes = [8, 17], strides = [1, 1]} : vector<8x25xf32> to vector<8x17xf32>
    %1180 = arith.addf %1178, %1088 : vector<8x8xf32>
    %1181 = vector.extract_strided_slice %1179 {offsets = [0, 1], sizes = [8, 1], strides = [1, 1]} : vector<8x17xf32> to vector<8x1xf32>
    %1182 = vector.broadcast %1181 : vector<8x1xf32> to vector<8x8xf32>
    %1183 = arith.mulf %28, %1182 : vector<8x8xf32>
    %1184 = arith.addf %1180, %1183 : vector<8x8xf32>
    %1185 = vector.extract_strided_slice %1179 {offsets = [0, 2], sizes = [8, 1], strides = [1, 1]} : vector<8x17xf32> to vector<8x1xf32>
    %1186 = vector.broadcast %1185 : vector<8x1xf32> to vector<8x8xf32>
    %1187 = arith.mulf %32, %1186 : vector<8x8xf32>
    %1188 = arith.addf %1184, %1187 : vector<8x8xf32>
    %1189 = vector.extract_strided_slice %1179 {offsets = [0, 3], sizes = [8, 1], strides = [1, 1]} : vector<8x17xf32> to vector<8x1xf32>
    %1190 = vector.broadcast %1189 : vector<8x1xf32> to vector<8x8xf32>
    %1191 = arith.mulf %36, %1190 : vector<8x8xf32>
    %1192 = arith.addf %1188, %1191 : vector<8x8xf32>
    %1193 = vector.extract_strided_slice %1179 {offsets = [0, 4], sizes = [8, 1], strides = [1, 1]} : vector<8x17xf32> to vector<8x1xf32>
    %1194 = vector.broadcast %1193 : vector<8x1xf32> to vector<8x8xf32>
    %1195 = arith.mulf %40, %1194 : vector<8x8xf32>
    %1196 = arith.addf %1192, %1195 : vector<8x8xf32>
    %1197 = vector.extract_strided_slice %1179 {offsets = [0, 5], sizes = [8, 1], strides = [1, 1]} : vector<8x17xf32> to vector<8x1xf32>
    %1198 = vector.broadcast %1197 : vector<8x1xf32> to vector<8x8xf32>
    %1199 = arith.mulf %44, %1198 : vector<8x8xf32>
    %1200 = arith.addf %1196, %1199 : vector<8x8xf32>
    %1201 = vector.extract_strided_slice %1179 {offsets = [0, 6], sizes = [8, 1], strides = [1, 1]} : vector<8x17xf32> to vector<8x1xf32>
    %1202 = vector.broadcast %1201 : vector<8x1xf32> to vector<8x8xf32>
    %1203 = arith.mulf %48, %1202 : vector<8x8xf32>
    %1204 = arith.addf %1200, %1203 : vector<8x8xf32>
    %1205 = vector.extract_strided_slice %1179 {offsets = [0, 7], sizes = [8, 1], strides = [1, 1]} : vector<8x17xf32> to vector<8x1xf32>
    %1206 = vector.broadcast %1205 : vector<8x1xf32> to vector<8x8xf32>
    %1207 = arith.mulf %52, %1206 : vector<8x8xf32>
    %1208 = arith.addf %1204, %1207 : vector<8x8xf32>
    %1209 = vector.extract_strided_slice %1179 {offsets = [0, 8], sizes = [8, 1], strides = [1, 1]} : vector<8x17xf32> to vector<8x1xf32>
    %1210 = vector.broadcast %1209 : vector<8x1xf32> to vector<8x8xf32>
    %1211 = arith.mulf %56, %1210 : vector<8x8xf32>
    %1212 = arith.addf %1208, %1211 : vector<8x8xf32>
    %1213 = vector.extract_strided_slice %1179 {offsets = [0, 9], sizes = [8, 1], strides = [1, 1]} : vector<8x17xf32> to vector<8x1xf32>
    %1214 = vector.broadcast %1213 : vector<8x1xf32> to vector<8x8xf32>
    %1215 = arith.mulf %60, %1214 : vector<8x8xf32>
    %1216 = arith.addf %1212, %1215 : vector<8x8xf32>
    %1217 = vector.extract_strided_slice %1179 {offsets = [0, 10], sizes = [8, 1], strides = [1, 1]} : vector<8x17xf32> to vector<8x1xf32>
    %1218 = vector.broadcast %1217 : vector<8x1xf32> to vector<8x8xf32>
    %1219 = arith.mulf %64, %1218 : vector<8x8xf32>
    %1220 = arith.addf %1216, %1219 : vector<8x8xf32>
    %1221 = vector.extract_strided_slice %1179 {offsets = [0, 11], sizes = [8, 1], strides = [1, 1]} : vector<8x17xf32> to vector<8x1xf32>
    %1222 = vector.broadcast %1221 : vector<8x1xf32> to vector<8x8xf32>
    %1223 = arith.mulf %68, %1222 : vector<8x8xf32>
    %1224 = arith.addf %1220, %1223 : vector<8x8xf32>
    %1225 = vector.extract_strided_slice %1179 {offsets = [0, 12], sizes = [8, 1], strides = [1, 1]} : vector<8x17xf32> to vector<8x1xf32>
    %1226 = vector.broadcast %1225 : vector<8x1xf32> to vector<8x8xf32>
    %1227 = arith.mulf %72, %1226 : vector<8x8xf32>
    %1228 = arith.addf %1224, %1227 : vector<8x8xf32>
    %1229 = vector.extract_strided_slice %1179 {offsets = [0, 13], sizes = [8, 1], strides = [1, 1]} : vector<8x17xf32> to vector<8x1xf32>
    %1230 = vector.broadcast %1229 : vector<8x1xf32> to vector<8x8xf32>
    %1231 = arith.mulf %76, %1230 : vector<8x8xf32>
    %1232 = arith.addf %1228, %1231 : vector<8x8xf32>
    %1233 = vector.extract_strided_slice %1179 {offsets = [0, 14], sizes = [8, 1], strides = [1, 1]} : vector<8x17xf32> to vector<8x1xf32>
    %1234 = vector.broadcast %1233 : vector<8x1xf32> to vector<8x8xf32>
    %1235 = arith.mulf %80, %1234 : vector<8x8xf32>
    %1236 = arith.addf %1232, %1235 : vector<8x8xf32>
    %1237 = vector.extract_strided_slice %1179 {offsets = [0, 15], sizes = [8, 1], strides = [1, 1]} : vector<8x17xf32> to vector<8x1xf32>
    %1238 = vector.broadcast %1237 : vector<8x1xf32> to vector<8x8xf32>
    %1239 = arith.mulf %84, %1238 : vector<8x8xf32>
    %1240 = arith.addf %1236, %1239 : vector<8x8xf32>
    %cst_122 = arith.constant dense<0xFF800000> : vector<8xf32>
    %1241 = vector.multi_reduction <maximumf>, %1240, %cst_122 [1] : vector<8x8xf32> to vector<8xf32>
    %1242 = vector.shape_cast %1241 : vector<8xf32> to vector<8x1xf32>
    %1243 = vector.broadcast %1242 : vector<8x1xf32> to vector<8x8xf32>
    %1244 = arith.subf %1240, %1243 : vector<8x8xf32>
    %1245 = math.exp %1244 : vector<8x8xf32>
    %cst_123 = arith.constant dense<0.000000e+00> : vector<8xf32>
    %1246 = vector.multi_reduction <add>, %1245, %cst_123 [1] : vector<8x8xf32> to vector<8xf32>
    %1247 = vector.shape_cast %1246 : vector<8xf32> to vector<8x1xf32>
    %1248 = tpu.reciprocal %1247 {approx = true} : vector<8x1xf32> -> vector<8x1xf32>
    %1249 = vector.broadcast %1248 : vector<8x1xf32> to vector<8x8xf32>
    %1250 = arith.mulf %1245, %1249 : vector<8x8xf32>
    %1251 = arith.truncf %1250 : vector<8x8xf32> to vector<8x8xbf16>
    %cst_124 = arith.constant dense<0.000000e+00> : vector<8x32xf32>
    %1252 = tpu.matmul %1251, %1173, %cst_124 {dimension_numbers = #tpu.dot_dimension_numbers<[1], [0], [0], [1], [0, 0, 1, 1], [], []>} : vector<8x8xbf16>, vector<8x32xbf16>, vector<8x32xf32> -> vector<8x32xf32>
    %1253 = vector.extract_strided_slice %11 {offsets = [24, 64], sizes = [8, 32], strides = [1, 1]} : vector<32x128xbf16> to vector<8x32xbf16>
    %1254 = vector.extract_strided_slice %13 {offsets = [24, 64], sizes = [8, 32], strides = [1, 1]} : vector<32x128xbf16> to vector<8x32xbf16>
    %1255 = vector.extract_strided_slice %15 {offsets = [24, 64], sizes = [8, 32], strides = [1, 1]} : vector<32x128xbf16> to vector<8x32xbf16>
    %c2_125 = arith.constant 2 : index
    %c0_126 = arith.constant 0 : index
    %c0_127 = arith.constant 0 : index
    %1256 = vector.load %arg4[%c2_125, %c0_126, %c0_127] : memref<4x17x32xbf16, #tpu.memory_space<vmem>>, vector<1x17x32xbf16>
    %1257 = vector.shape_cast %1256 : vector<1x17x32xbf16> to vector<17x32xbf16>
    %1258 = tpu.concatenate %1254, %1257 in 0 : vector<8x32xbf16>, vector<17x32xbf16> -> vector<25x32xbf16>
    %cst_128 = arith.constant dense<0.000000e+00> : vector<8x25xf32>
    %1259 = tpu.matmul %1253, %1258, %cst_128 {dimension_numbers = #tpu.dot_dimension_numbers<[1], [1], [0], [0], [0, 0, 1, 0], [], []>} : vector<8x32xbf16>, vector<25x32xbf16>, vector<8x25xf32> -> vector<8x25xf32>
    %1260 = vector.extract_strided_slice %1259 {offsets = [0, 0], sizes = [8, 8], strides = [1, 1]} : vector<8x25xf32> to vector<8x8xf32>
    %1261 = vector.extract_strided_slice %1259 {offsets = [0, 8], sizes = [8, 17], strides = [1, 1]} : vector<8x25xf32> to vector<8x17xf32>
    %1262 = arith.addf %1260, %1088 : vector<8x8xf32>
    %1263 = vector.extract_strided_slice %1261 {offsets = [0, 1], sizes = [8, 1], strides = [1, 1]} : vector<8x17xf32> to vector<8x1xf32>
    %1264 = vector.broadcast %1263 : vector<8x1xf32> to vector<8x8xf32>
    %1265 = arith.mulf %28, %1264 : vector<8x8xf32>
    %1266 = arith.addf %1262, %1265 : vector<8x8xf32>
    %1267 = vector.extract_strided_slice %1261 {offsets = [0, 2], sizes = [8, 1], strides = [1, 1]} : vector<8x17xf32> to vector<8x1xf32>
    %1268 = vector.broadcast %1267 : vector<8x1xf32> to vector<8x8xf32>
    %1269 = arith.mulf %32, %1268 : vector<8x8xf32>
    %1270 = arith.addf %1266, %1269 : vector<8x8xf32>
    %1271 = vector.extract_strided_slice %1261 {offsets = [0, 3], sizes = [8, 1], strides = [1, 1]} : vector<8x17xf32> to vector<8x1xf32>
    %1272 = vector.broadcast %1271 : vector<8x1xf32> to vector<8x8xf32>
    %1273 = arith.mulf %36, %1272 : vector<8x8xf32>
    %1274 = arith.addf %1270, %1273 : vector<8x8xf32>
    %1275 = vector.extract_strided_slice %1261 {offsets = [0, 4], sizes = [8, 1], strides = [1, 1]} : vector<8x17xf32> to vector<8x1xf32>
    %1276 = vector.broadcast %1275 : vector<8x1xf32> to vector<8x8xf32>
    %1277 = arith.mulf %40, %1276 : vector<8x8xf32>
    %1278 = arith.addf %1274, %1277 : vector<8x8xf32>
    %1279 = vector.extract_strided_slice %1261 {offsets = [0, 5], sizes = [8, 1], strides = [1, 1]} : vector<8x17xf32> to vector<8x1xf32>
    %1280 = vector.broadcast %1279 : vector<8x1xf32> to vector<8x8xf32>
    %1281 = arith.mulf %44, %1280 : vector<8x8xf32>
    %1282 = arith.addf %1278, %1281 : vector<8x8xf32>
    %1283 = vector.extract_strided_slice %1261 {offsets = [0, 6], sizes = [8, 1], strides = [1, 1]} : vector<8x17xf32> to vector<8x1xf32>
    %1284 = vector.broadcast %1283 : vector<8x1xf32> to vector<8x8xf32>
    %1285 = arith.mulf %48, %1284 : vector<8x8xf32>
    %1286 = arith.addf %1282, %1285 : vector<8x8xf32>
    %1287 = vector.extract_strided_slice %1261 {offsets = [0, 7], sizes = [8, 1], strides = [1, 1]} : vector<8x17xf32> to vector<8x1xf32>
    %1288 = vector.broadcast %1287 : vector<8x1xf32> to vector<8x8xf32>
    %1289 = arith.mulf %52, %1288 : vector<8x8xf32>
    %1290 = arith.addf %1286, %1289 : vector<8x8xf32>
    %1291 = vector.extract_strided_slice %1261 {offsets = [0, 8], sizes = [8, 1], strides = [1, 1]} : vector<8x17xf32> to vector<8x1xf32>
    %1292 = vector.broadcast %1291 : vector<8x1xf32> to vector<8x8xf32>
    %1293 = arith.mulf %56, %1292 : vector<8x8xf32>
    %1294 = arith.addf %1290, %1293 : vector<8x8xf32>
    %1295 = vector.extract_strided_slice %1261 {offsets = [0, 9], sizes = [8, 1], strides = [1, 1]} : vector<8x17xf32> to vector<8x1xf32>
    %1296 = vector.broadcast %1295 : vector<8x1xf32> to vector<8x8xf32>
    %1297 = arith.mulf %60, %1296 : vector<8x8xf32>
    %1298 = arith.addf %1294, %1297 : vector<8x8xf32>
    %1299 = vector.extract_strided_slice %1261 {offsets = [0, 10], sizes = [8, 1], strides = [1, 1]} : vector<8x17xf32> to vector<8x1xf32>
    %1300 = vector.broadcast %1299 : vector<8x1xf32> to vector<8x8xf32>
    %1301 = arith.mulf %64, %1300 : vector<8x8xf32>
    %1302 = arith.addf %1298, %1301 : vector<8x8xf32>
    %1303 = vector.extract_strided_slice %1261 {offsets = [0, 11], sizes = [8, 1], strides = [1, 1]} : vector<8x17xf32> to vector<8x1xf32>
    %1304 = vector.broadcast %1303 : vector<8x1xf32> to vector<8x8xf32>
    %1305 = arith.mulf %68, %1304 : vector<8x8xf32>
    %1306 = arith.addf %1302, %1305 : vector<8x8xf32>
    %1307 = vector.extract_strided_slice %1261 {offsets = [0, 12], sizes = [8, 1], strides = [1, 1]} : vector<8x17xf32> to vector<8x1xf32>
    %1308 = vector.broadcast %1307 : vector<8x1xf32> to vector<8x8xf32>
    %1309 = arith.mulf %72, %1308 : vector<8x8xf32>
    %1310 = arith.addf %1306, %1309 : vector<8x8xf32>
    %1311 = vector.extract_strided_slice %1261 {offsets = [0, 13], sizes = [8, 1], strides = [1, 1]} : vector<8x17xf32> to vector<8x1xf32>
    %1312 = vector.broadcast %1311 : vector<8x1xf32> to vector<8x8xf32>
    %1313 = arith.mulf %76, %1312 : vector<8x8xf32>
    %1314 = arith.addf %1310, %1313 : vector<8x8xf32>
    %1315 = vector.extract_strided_slice %1261 {offsets = [0, 14], sizes = [8, 1], strides = [1, 1]} : vector<8x17xf32> to vector<8x1xf32>
    %1316 = vector.broadcast %1315 : vector<8x1xf32> to vector<8x8xf32>
    %1317 = arith.mulf %80, %1316 : vector<8x8xf32>
    %1318 = arith.addf %1314, %1317 : vector<8x8xf32>
    %1319 = vector.extract_strided_slice %1261 {offsets = [0, 15], sizes = [8, 1], strides = [1, 1]} : vector<8x17xf32> to vector<8x1xf32>
    %1320 = vector.broadcast %1319 : vector<8x1xf32> to vector<8x8xf32>
    %1321 = arith.mulf %84, %1320 : vector<8x8xf32>
    %1322 = arith.addf %1318, %1321 : vector<8x8xf32>
    %cst_129 = arith.constant dense<0xFF800000> : vector<8xf32>
    %1323 = vector.multi_reduction <maximumf>, %1322, %cst_129 [1] : vector<8x8xf32> to vector<8xf32>
    %1324 = vector.shape_cast %1323 : vector<8xf32> to vector<8x1xf32>
    %1325 = vector.broadcast %1324 : vector<8x1xf32> to vector<8x8xf32>
    %1326 = arith.subf %1322, %1325 : vector<8x8xf32>
    %1327 = math.exp %1326 : vector<8x8xf32>
    %cst_130 = arith.constant dense<0.000000e+00> : vector<8xf32>
    %1328 = vector.multi_reduction <add>, %1327, %cst_130 [1] : vector<8x8xf32> to vector<8xf32>
    %1329 = vector.shape_cast %1328 : vector<8xf32> to vector<8x1xf32>
    %1330 = tpu.reciprocal %1329 {approx = true} : vector<8x1xf32> -> vector<8x1xf32>
    %1331 = vector.broadcast %1330 : vector<8x1xf32> to vector<8x8xf32>
    %1332 = arith.mulf %1327, %1331 : vector<8x8xf32>
    %1333 = arith.truncf %1332 : vector<8x8xf32> to vector<8x8xbf16>
    %cst_131 = arith.constant dense<0.000000e+00> : vector<8x32xf32>
    %1334 = tpu.matmul %1333, %1255, %cst_131 {dimension_numbers = #tpu.dot_dimension_numbers<[1], [0], [0], [1], [0, 0, 1, 1], [], []>} : vector<8x8xbf16>, vector<8x32xbf16>, vector<8x32xf32> -> vector<8x32xf32>
    %1335 = vector.extract_strided_slice %11 {offsets = [24, 96], sizes = [8, 32], strides = [1, 1]} : vector<32x128xbf16> to vector<8x32xbf16>
    %1336 = vector.extract_strided_slice %13 {offsets = [24, 96], sizes = [8, 32], strides = [1, 1]} : vector<32x128xbf16> to vector<8x32xbf16>
    %1337 = vector.extract_strided_slice %15 {offsets = [24, 96], sizes = [8, 32], strides = [1, 1]} : vector<32x128xbf16> to vector<8x32xbf16>
    %c3_132 = arith.constant 3 : index
    %c0_133 = arith.constant 0 : index
    %c0_134 = arith.constant 0 : index
    %1338 = vector.load %arg4[%c3_132, %c0_133, %c0_134] : memref<4x17x32xbf16, #tpu.memory_space<vmem>>, vector<1x17x32xbf16>
    %1339 = vector.shape_cast %1338 : vector<1x17x32xbf16> to vector<17x32xbf16>
    %1340 = tpu.concatenate %1336, %1339 in 0 : vector<8x32xbf16>, vector<17x32xbf16> -> vector<25x32xbf16>
    %cst_135 = arith.constant dense<0.000000e+00> : vector<8x25xf32>
    %1341 = tpu.matmul %1335, %1340, %cst_135 {dimension_numbers = #tpu.dot_dimension_numbers<[1], [1], [0], [0], [0, 0, 1, 0], [], []>} : vector<8x32xbf16>, vector<25x32xbf16>, vector<8x25xf32> -> vector<8x25xf32>
    %1342 = vector.extract_strided_slice %1341 {offsets = [0, 0], sizes = [8, 8], strides = [1, 1]} : vector<8x25xf32> to vector<8x8xf32>
    %1343 = vector.extract_strided_slice %1341 {offsets = [0, 8], sizes = [8, 17], strides = [1, 1]} : vector<8x25xf32> to vector<8x17xf32>
    %1344 = arith.addf %1342, %1088 : vector<8x8xf32>
    %1345 = vector.extract_strided_slice %1343 {offsets = [0, 1], sizes = [8, 1], strides = [1, 1]} : vector<8x17xf32> to vector<8x1xf32>
    %1346 = vector.broadcast %1345 : vector<8x1xf32> to vector<8x8xf32>
    %1347 = arith.mulf %28, %1346 : vector<8x8xf32>
    %1348 = arith.addf %1344, %1347 : vector<8x8xf32>
    %1349 = vector.extract_strided_slice %1343 {offsets = [0, 2], sizes = [8, 1], strides = [1, 1]} : vector<8x17xf32> to vector<8x1xf32>
    %1350 = vector.broadcast %1349 : vector<8x1xf32> to vector<8x8xf32>
    %1351 = arith.mulf %32, %1350 : vector<8x8xf32>
    %1352 = arith.addf %1348, %1351 : vector<8x8xf32>
    %1353 = vector.extract_strided_slice %1343 {offsets = [0, 3], sizes = [8, 1], strides = [1, 1]} : vector<8x17xf32> to vector<8x1xf32>
    %1354 = vector.broadcast %1353 : vector<8x1xf32> to vector<8x8xf32>
    %1355 = arith.mulf %36, %1354 : vector<8x8xf32>
    %1356 = arith.addf %1352, %1355 : vector<8x8xf32>
    %1357 = vector.extract_strided_slice %1343 {offsets = [0, 4], sizes = [8, 1], strides = [1, 1]} : vector<8x17xf32> to vector<8x1xf32>
    %1358 = vector.broadcast %1357 : vector<8x1xf32> to vector<8x8xf32>
    %1359 = arith.mulf %40, %1358 : vector<8x8xf32>
    %1360 = arith.addf %1356, %1359 : vector<8x8xf32>
    %1361 = vector.extract_strided_slice %1343 {offsets = [0, 5], sizes = [8, 1], strides = [1, 1]} : vector<8x17xf32> to vector<8x1xf32>
    %1362 = vector.broadcast %1361 : vector<8x1xf32> to vector<8x8xf32>
    %1363 = arith.mulf %44, %1362 : vector<8x8xf32>
    %1364 = arith.addf %1360, %1363 : vector<8x8xf32>
    %1365 = vector.extract_strided_slice %1343 {offsets = [0, 6], sizes = [8, 1], strides = [1, 1]} : vector<8x17xf32> to vector<8x1xf32>
    %1366 = vector.broadcast %1365 : vector<8x1xf32> to vector<8x8xf32>
    %1367 = arith.mulf %48, %1366 : vector<8x8xf32>
    %1368 = arith.addf %1364, %1367 : vector<8x8xf32>
    %1369 = vector.extract_strided_slice %1343 {offsets = [0, 7], sizes = [8, 1], strides = [1, 1]} : vector<8x17xf32> to vector<8x1xf32>
    %1370 = vector.broadcast %1369 : vector<8x1xf32> to vector<8x8xf32>
    %1371 = arith.mulf %52, %1370 : vector<8x8xf32>
    %1372 = arith.addf %1368, %1371 : vector<8x8xf32>
    %1373 = vector.extract_strided_slice %1343 {offsets = [0, 8], sizes = [8, 1], strides = [1, 1]} : vector<8x17xf32> to vector<8x1xf32>
    %1374 = vector.broadcast %1373 : vector<8x1xf32> to vector<8x8xf32>
    %1375 = arith.mulf %56, %1374 : vector<8x8xf32>
    %1376 = arith.addf %1372, %1375 : vector<8x8xf32>
    %1377 = vector.extract_strided_slice %1343 {offsets = [0, 9], sizes = [8, 1], strides = [1, 1]} : vector<8x17xf32> to vector<8x1xf32>
    %1378 = vector.broadcast %1377 : vector<8x1xf32> to vector<8x8xf32>
    %1379 = arith.mulf %60, %1378 : vector<8x8xf32>
    %1380 = arith.addf %1376, %1379 : vector<8x8xf32>
    %1381 = vector.extract_strided_slice %1343 {offsets = [0, 10], sizes = [8, 1], strides = [1, 1]} : vector<8x17xf32> to vector<8x1xf32>
    %1382 = vector.broadcast %1381 : vector<8x1xf32> to vector<8x8xf32>
    %1383 = arith.mulf %64, %1382 : vector<8x8xf32>
    %1384 = arith.addf %1380, %1383 : vector<8x8xf32>
    %1385 = vector.extract_strided_slice %1343 {offsets = [0, 11], sizes = [8, 1], strides = [1, 1]} : vector<8x17xf32> to vector<8x1xf32>
    %1386 = vector.broadcast %1385 : vector<8x1xf32> to vector<8x8xf32>
    %1387 = arith.mulf %68, %1386 : vector<8x8xf32>
    %1388 = arith.addf %1384, %1387 : vector<8x8xf32>
    %1389 = vector.extract_strided_slice %1343 {offsets = [0, 12], sizes = [8, 1], strides = [1, 1]} : vector<8x17xf32> to vector<8x1xf32>
    %1390 = vector.broadcast %1389 : vector<8x1xf32> to vector<8x8xf32>
    %1391 = arith.mulf %72, %1390 : vector<8x8xf32>
    %1392 = arith.addf %1388, %1391 : vector<8x8xf32>
    %1393 = vector.extract_strided_slice %1343 {offsets = [0, 13], sizes = [8, 1], strides = [1, 1]} : vector<8x17xf32> to vector<8x1xf32>
    %1394 = vector.broadcast %1393 : vector<8x1xf32> to vector<8x8xf32>
    %1395 = arith.mulf %76, %1394 : vector<8x8xf32>
    %1396 = arith.addf %1392, %1395 : vector<8x8xf32>
    %1397 = vector.extract_strided_slice %1343 {offsets = [0, 14], sizes = [8, 1], strides = [1, 1]} : vector<8x17xf32> to vector<8x1xf32>
    %1398 = vector.broadcast %1397 : vector<8x1xf32> to vector<8x8xf32>
    %1399 = arith.mulf %80, %1398 : vector<8x8xf32>
    %1400 = arith.addf %1396, %1399 : vector<8x8xf32>
    %1401 = vector.extract_strided_slice %1343 {offsets = [0, 15], sizes = [8, 1], strides = [1, 1]} : vector<8x17xf32> to vector<8x1xf32>
    %1402 = vector.broadcast %1401 : vector<8x1xf32> to vector<8x8xf32>
    %1403 = arith.mulf %84, %1402 : vector<8x8xf32>
    %1404 = arith.addf %1400, %1403 : vector<8x8xf32>
    %cst_136 = arith.constant dense<0xFF800000> : vector<8xf32>
    %1405 = vector.multi_reduction <maximumf>, %1404, %cst_136 [1] : vector<8x8xf32> to vector<8xf32>
    %1406 = vector.shape_cast %1405 : vector<8xf32> to vector<8x1xf32>
    %1407 = vector.broadcast %1406 : vector<8x1xf32> to vector<8x8xf32>
    %1408 = arith.subf %1404, %1407 : vector<8x8xf32>
    %1409 = math.exp %1408 : vector<8x8xf32>
    %cst_137 = arith.constant dense<0.000000e+00> : vector<8xf32>
    %1410 = vector.multi_reduction <add>, %1409, %cst_137 [1] : vector<8x8xf32> to vector<8xf32>
    %1411 = vector.shape_cast %1410 : vector<8xf32> to vector<8x1xf32>
    %1412 = tpu.reciprocal %1411 {approx = true} : vector<8x1xf32> -> vector<8x1xf32>
    %1413 = vector.broadcast %1412 : vector<8x1xf32> to vector<8x8xf32>
    %1414 = arith.mulf %1409, %1413 : vector<8x8xf32>
    %1415 = arith.truncf %1414 : vector<8x8xf32> to vector<8x8xbf16>
    %cst_138 = arith.constant dense<0.000000e+00> : vector<8x32xf32>
    %1416 = tpu.matmul %1415, %1337, %cst_138 {dimension_numbers = #tpu.dot_dimension_numbers<[1], [0], [0], [1], [0, 0, 1, 1], [], []>} : vector<8x8xbf16>, vector<8x32xbf16>, vector<8x32xf32> -> vector<8x32xf32>
    %1417 = tpu.concatenate %1170, %1252, %1334, %1416 in 1 : vector<8x32xf32>, vector<8x32xf32>, vector<8x32xf32>, vector<8x32xf32> -> vector<8x128xf32>
    %c3_139 = arith.constant 3 : index
    %c0_140 = arith.constant 0 : index
    %c0_141 = arith.constant 0 : index
    %1418 = vector.load %arg6[%c3_139, %c0_140, %c0_141] : memref<4x8x128xf32, #tpu.memory_space<vmem>>, vector<1x8x128xf32>
    %1419 = vector.shape_cast %1418 : vector<1x8x128xf32> to vector<8x128xf32>
    %1420 = vector.shape_cast %1417 : vector<8x128xf32> to vector<1x8x128xf32>
    tpu.vector_store %arg6[%c3_139, %c0_140, %c0_141], %1420 {strides = array<i32>} : memref<4x8x128xf32, #tpu.memory_space<vmem>>, vector<1x8x128xf32>,
    return
  }
  func.func @transform_0(%arg0: i32) -> (i32, i32, i32) {
    %c0_i32 = arith.constant 0 : i32
    %c0_i32_0 = arith.constant 0 : i32
    %c0_i32_1 = arith.constant 0 : i32
    return %arg0, %c0_i32, %c0_i32_0 : i32, i32, i32
  }
  func.func @transform_1(%arg0: i32) -> (i32, i32) {
    %c0_i32 = arith.constant 0 : i32
    %c0_i32_0 = arith.constant 0 : i32
    %c0_i32_1 = arith.constant 0 : i32
    return %c0_i32, %c0_i32_0 : i32, i32
  }
  func.func @transform_2(%arg0: i32) -> (i32, i32) {
    %c0_i32 = arith.constant 0 : i32
    %c0_i32_0 = arith.constant 0 : i32
    %c0_i32_1 = arith.constant 0 : i32
    return %c0_i32, %c0_i32_0 : i32, i32
  }
  func.func @transform_3(%arg0: i32) -> (i32, i32, i32) {
    %c0_i32 = arith.constant 0 : i32
    %c0_i32_0 = arith.constant 0 : i32
    %c0_i32_1 = arith.constant 0 : i32
    %c0_i32_2 = arith.constant 0 : i32
    return %c0_i32, %c0_i32_0, %c0_i32_1 : i32, i32, i32
  }
  func.func @transform_4(%arg0: i32) -> (i32, i32, i32) {
    %c0_i32 = arith.constant 0 : i32
    %c0_i32_0 = arith.constant 0 : i32
    %c0_i32_1 = arith.constant 0 : i32
    %c0_i32_2 = arith.constant 0 : i32
    return %c0_i32, %c0_i32_0, %c0_i32_1 : i32, i32, i32
  }
  func.func @transform_5(%arg0: i32) -> (i32, i32, i32) {
    %c0_i32 = arith.constant 0 : i32
    %c0_i32_0 = arith.constant 0 : i32
    %c0_i32_1 = arith.constant 0 : i32
    return %arg0, %c0_i32, %c0_i32_0 : i32, i32, i32
  }
}

</mosaic_0001>

<bundles_post_ra>
// kernel: tpu_custom_call.1
= control target key start
LH: loop header
LB: loop body
LE: loop exit
PB: predicated region body
PF: predicated region fallthrough
CT: control target
= control target key end

     0   :  { %10 = vsyncpa [#allocation3], 0  ;;  %s6724_s0 = inlined_call_operand.vmem [shape: f32[8,8,128], index: 0, kind: input, shape index: {}]   ;;  %s6725_s1 = inlined_call_operand.hbm [shape: bf16[128,384], index: 1, kind: input, shape index: {}]   ;;  %s6726_s2 = inlined_call_operand.vmem [shape: f32[1,384], index: 2, kind: input, shape index: {}]   ;;  %s6727_s3 = inlined_call_operand.vmem [shape: bf16[4,17,32], index: 3, kind: input, shape index: {}]   ;;  %s6728_s4 = inlined_call_operand.vmem [shape: f32[1,8,8], index: 4, kind: input, shape index: {}]   ;;  %s6729_s5 = inlined_call_operand.hbm [shape: f32[8,8,128], index: 5, kind: output, shape index: {}]  }
   0x1   :  { %11 = vsyncpa [#allocation4], 0 }
   0x2   :  { %13 = vsyncpa [#allocation4 + $0x1], 0  ;;  %s5404_s18 = smov 0   ;;  %s5406_s19 = smov 0  }
   0x3   :  { %s5408_s20 = smov 0   ;;  %s5410_s21 = smov 0  }
   0x4 LB: > { %s5425_s22 = sadd.s32 4294967295, %s5345_s21   ;;  %s4319_s23 = sadd.s32 4294967294, %s5345_s21   ;;  %s5345_s21 = sphi %s5410_s21, %s6755_s21   ;;  %s5341_s20 = sphi %s5408_s20, %s6754_s20   ;;  %s5337_s19 = sphi %s5406_s19, %s6753_s19   ;;  %s5333_s18 = sphi %s5404_s18, %s6752_s18  }
   0x5   : > { %s5429_s24 = sadd.s32 1, %s5345_s21   ;;  %s136_s25 = sadd.s32 1, %s5341_s20 }
   0x6   : > { %s133_s26 = ssub.s32 %s5345_s21, %s5429_s24  ;;  %p146_p0 = scmp.ne.s32.totalorder %s5341_s20, %s5337_s19 }
   0x7   : > { %p134_p1 = scmp.eq.s32.totalorder %s133_s26, 0  ;;  %p147_p2 = scmp.eq.s32.totalorder %s5425_s22, 1 }
   0x8   : > { %p152_p3 = scmp.ne.s32.totalorder %s5337_s19, %s5333_s18  ;;  %p153_p4 = scmp.eq.s32.totalorder %s4319_s23, 1 }
   0x9   : > { %s5440_s27 = scalar_select %p134_p1, %s5341_s20, %s136_s25  }
   0xa   : > { %p5442_p5 = por %p147_p2, %p146_p0  ;;  %p5446_p6 = por %p153_p4, %p152_p3 }
   0xb   : > { %p4320_p7 = scmp.ge.s32.totalorder %s5345_s21, 1  ;;  %p160_p8 = scmp.lt.s32.totalorder %s5345_s21, 3 }
   0xc   : > { %s6742_s29 = scalar_select %p5446_p6, 1, 0 }
   0xd   : > { %p4824_p9 = scmp.eq.s32.totalorder %s5425_s22, 0  ;;  %p5453_p10 = pnand %p4320_p7, %p160_p8 }
   0xe   : > { %s5347_s6 = smov [#allocation2]  }
   0xf   : > { %s172_s7 = sshll.u32 %s5347_s6, 4  ;;  %p4816_p11 = pneg %p5453_p10  ;;  %s173_s7 = int_to_ptr.vmem [resolvable:$true] %s172_s7 }
  0x10   : > { %s5266_s8 = scalar_lea.vmem %s173_s7, 3072  ;;  %p5274_p3 = scmp.lt.s32.totalorder %s173_s7, %s173_s7 }
  0x11   : > { %p4817_p12 = pnand %p4824_p9, %p4816_p11  ;;  %p5267_p0 = scmp.ne.s32.totalorder %s173_s7, %s5266_s8 }
  0x12   : > { %p5275_p4 = scmp.lt.s32.totalorder %s5266_s8, %s5266_s8 }
  0x13   : > { %p5257_p13 = pneg %p4817_p12 }
  0x14   : > { %p5276_p6 = por %p5275_p4, %p5274_p3 }
  0x15   : > { %p5269_p1 = pnand %p5267_p0, %p5257_p13 }
  0x17   : > { %p5270_p2 = pneg %p5269_p1 }
  0x19   : > { %p5277_p7 = pnand %p5276_p6, %p5270_p2 }
  0x1b   : > { %5280 = shalt.err (!%p5277_p7)
}
  0x1c   : > { %s5348_s9 = smov 192   ;;  %s5349_s10 = smov 12  }
  0x1d   : > { %4819 = dma.hbm_to_vmem [thread:$0]  (!%p4817_p12), %s6725_s1, 3072, %s173_s7, [#allocation3], %s5348_s9, %s5348_s9, %s5349_s10  }
  0x1e   : > { %206 = sbr.rel (%p5453_p10) target bundleno = 11755 (0x2deb), region = 40 }
  0x23   : > { %5324 = dma.done.wait (%p4824_p9), [#allocation3], 3072  }
  0x24   : > { %5326 = vsyncadd (%p4824_p9), [#allocation3], 4294964224  ;;  %s4326_s13 = sshll.u32 %s5425_s22, 2  ;;  %v5350_v0 = vmov 0   ;;  %v5126_v1 = vld [vmem:[#allocation2 + $0xac] ss:$12 sps:$4 sm:$0xff]   ;;  %v282_v28 = vlaneseq }
  0x25   : > { %457 = vmatprep.mubr.bf16.mxu0 %v5350_v0  ;;  %p235_p6 = scmp.lt.s32.totalorder %s4326_s13, 7  ;;  %v5128_v2 = vld [vmem:[#allocation2 + $0xa8] ss:$12 sps:$4 sm:$0xff]   ;;  %425 = vmatprep.subr.bf16.mxu0 %v5126_v1  ;;  %v5131_v4 = vld [vmem:[#allocation2 + $0x90] ss:$12 sps:$4 sm:$0xff]   ;;  %vm608_vm0 = vcmask 261120  }
  0x26   : > { %v5129_v3 = vld [vmem:[#allocation2 + $0x94] ss:$12 sps:$4 sm:$0xff]   ;;  %426 = vmatpush1.bf16.msra.mxu0 %v5128_v2  ;;  %v5132_v5 = vld [vmem:[#allocation2 + $0x7c] ss:$12 sps:$4 sm:$0xff]   ;;  %v5134_v6 = vld [vmem:[#allocation2 + $0x78] ss:$12 sps:$4 sm:$0xff]  }
  0x27   : > { %s6757_s13 = smov (!%p235_p6, %s4326_s13), 7  ;;  %427 = vmatprep.subr.bf16.mxu0 %v5129_v3  ;;  %v5135_v7 = vld [vmem:[#allocation2 + $0x64] ss:$12 sps:$4 sm:$0xff]   ;;  %v5137_v8 = vld [vmem:[#allocation2 + $0x60] ss:$12 sps:$4 sm:$0xff]   ;;  %v5351_v23 = vmov 0.0  }
  0x28   : > { %s4327_s14 = sshll.u32 %s6757_s13, 3  ;;  %v5138_v10 = vld [vmem:[#allocation2 + $0x4c] ss:$12 sps:$4 sm:$0xff]   ;;  %v5140_v13 = vld [vmem:[#allocation2 + $0x48] ss:$12 sps:$4 sm:$0xff]   ;;  %vm5352_vm1 = vmmov 0  }
  0x29   : > { %s5474_s17 = scalar_lea.vmem %s6724_s0, %s4327_s14  ;;  %v5141_v14 = vld [vmem:[#allocation2 + $0x34] ss:$12 sps:$4 sm:$0xff]   ;;  %v5143_v15 = vld [vmem:[#allocation2 + $0x30] ss:$12 sps:$4 sm:$0xff]   ;;  %v5146_v17 = vld [vmem:[#allocation2 + $0x18] ss:$12 sps:$4 sm:$0xff]  }
  0x2a   : > { %428 = vmatpush1.bf16.msra.mxu0 %v5131_v4  ;;  %v242_v9 = vld [vmem:[%s5474_s17] sm:$0xff]  ;;  %v243_v11 = vld [vmem:[%s5474_s17 + $0x8] sm:$0xff]  ;;  %v244_v21 = vld [vmem:[%s5474_s17 + $0x10] sm:$0xff]  ;;  %v5353_v26 = vmov 11   ;;  %v5354_v27 = vmov 9   ;;  %v5494_v29 = vshrl.u32 %v282_v28, 7 }
  0x2b   : > { %429 = vmatprep.subr.bf16.mxu0 %v5132_v5  ;;  %v246_v12 = vpack.c.bf16 %v243_v11, %v242_v9  ;;  %v5144_v16 = vld [vmem:[#allocation2 + $0x1c] ss:$12 sps:$4 sm:$0xff]   ;;  %v5147_v18 = vld [vmem:[#allocation2 + $0x4] ss:$12 sps:$4 sm:$0xff]   ;;  %v5149_v19 = vld [vmem:[#allocation2] ss:$12 sps:$4 sm:$0xff]   ;;  %4887 = vset.pattern.permute.xlu1 %v5353_v26 }
  0x2c   : > { %v5150_v20 = vld [vmem:[%s6727_s3 + $0x4] sm:$0x1f]   ;;  %v245_v22 = vld [vmem:[%s5474_s17 + $0x18] sm:$0xff]  ;;  %4885 = vset.pattern.permute.xlu0 %v5354_v27  ;;  %v288_v30 = vsub.s32 1, %v5494_v29  ;;  %v5500_v32 = vld [vmem:[%s6726_s2] sm:$0x7] }
  0x2d   : > { %4582 = vmatprep.mubr.bf16.mxu1 %v246_v12  ;;  %v615_v24 = vsel %vm608_vm0, %v5150_v20, 0  ;;  %v5485_v25 = vpack.c.bf16 %v245_v22, %v244_v21  ;;  %v284_v35 = vsub.s32 0, %v5494_v29  ;;  %v5151_v40 = vld [vmem:[%s6727_s3] ss:$0 sps:$4 sm:$0xff]   ;;  %vm604_vm2 = vcmask 1043456   ;;  %s5366_s10 = smov 32  }
  0x2e   : > { %430 = vmatpush1.bf16.msra.mxu0 %v5134_v6  ;;  %v5503_v34 = vrot.slane %v5500_v32, %v288_v30  ;;  %v6730_v62 = vmov 12   ;;  %v6736_v63 = vmov 10   ;;  %v5357_v1 = vmov 13   ;;  %v5152_v9 = vld [vmem:[%s6727_s3 + $0x10] sm:$0x1f]   ;;  %s5369_s15 = smov 96  }
  0x2f   : > { %431 = vmatprep.subr.bf16.mxu0 %v5135_v7  ;;  %v285_v41 = vrot.slane %v5500_v32, %v284_v35  ;;  %v5358_v2 = vmov 14   ;;  %v5359_v3 = vmov 15   ;;  %v6740_v4 = vmov 17   ;;  %v5153_v11 = vld [vmem:[%s6727_s3 + $0xc] ss:$0 sps:$4 sm:$0xff]   ;;  %s5370_s23 = smov 64  }
  0x30   : > { %v5361_v5 = vmov 16   ;;  %v6737_v6 = vmov 20   ;;  %v5363_v7 = vmov 18   ;;  %v5160_v20 = vld [vmem:[#allocation2 + $0x20] ss:$12 sps:$4 sm:$0xff]   ;;  %v540_v22 = vand.u32 127, %v282_v28 }
  0x31   : > { %v5161_v21 = vld [vmem:[#allocation2 + $0x8] ss:$12 sps:$4 sm:$0xff]   ;;  %s231_s12 = sand.u32 1, %s5337_s19  }
  0x32   : > { %432 = vmatpush1.bf16.msra.mxu0 %v5137_v8  ;;  %v6732_v8 = vmov 23   ;;  %s4325_s13 = sshll.u32 %s231_s12, 5 }
  0x33   : > { %433 = vmatprep.subr.bf16.mxu0 %v5138_v10  ;;  %v6739_v10 = vmov 19   ;;  %s6644_s14 = scalar_lea.vmem [#allocation5], %s4325_s13 }
  0x36   : > { %434 = vmatpush1.bf16.msra.mxu0 %v5140_v13  ;;  %v6734_v13 = vmov 22  }
  0x37   : > { %435 = vmatprep.subr.bf16.mxu0 %v5141_v14  ;;  %v5154_v14 = vld [vmem:[#allocation2 + $0xb0] ss:$12 sps:$4 sm:$0xff]  }
  0x38   : > { %4566 = vmatprep.subr.bf16.mxu1 %v5154_v14 }
  0x39   : > { %4567 = vmatpush3.bf16.msra.mxu1 %v5154_v14 }
  0x3a   : > { %436 = vmatpush1.bf16.msra.mxu0 %v5143_v15  ;;  %v5155_v15 = vld [vmem:[#allocation2 + $0x98] ss:$12 sps:$4 sm:$0xff]  }
  0x3b   : > { %437 = vmatprep.subr.bf16.mxu0 %v5144_v16  ;;  %4568 = vmatprep.subr.bf16.mxu1 %v5155_v15  ;;  %v5156_v16 = vld [vmem:[#allocation2 + $0x80] ss:$12 sps:$4 sm:$0xff]  }
  0x3d   : > { %4569 = vmatpush3.bf16.msra.mxu1 %v5155_v15 }
  0x3e   : > { %438 = vmatpush1.bf16.msra.mxu0 %v5146_v17  ;;  %4570 = vmatprep.subr.bf16.mxu1 %v5156_v16  ;;  %v5157_v17 = vld [vmem:[#allocation2 + $0x68] ss:$12 sps:$4 sm:$0xff]  }
  0x3f   : > { %439 = vmatprep.subr.bf16.mxu0 %v5147_v18  ;;  %v5158_v18 = vld [vmem:[#allocation2 + $0x50] ss:$12 sps:$4 sm:$0xff]  }
  0x41   : > { %4571 = vmatpush3.bf16.msra.mxu1 %v5156_v16 }
  0x42   : > { %440 = vmatpush1.bf16.msra.mxu0 %v5149_v19  ;;  %4572 = vmatprep.subr.bf16.mxu1 %v5157_v17  ;;  %v5159_v19 = vld [vmem:[#allocation2 + $0x38] ss:$12 sps:$4 sm:$0xff]  }
  0x43   : > { %4586 = vmatprep.subr.bf16.mxu0 %v5351_v23 }
  0x45   : > { %458 = vmatmul.mubr.bf16.vlgmr.msra.gmra.mxu0 %v246_v12  ;;  %v5367_v12 = vmov 21   ;;  %4573 = vmatpush3.bf16.msra.mxu1 %v5157_v17 }
  0x46   : > { %467 = vmatprep.mubr.bf16.mxu0 %v5350_v0  ;;  %4587 = vmatpush3.bf16.xpose.msra.mxu0 %v615_v24  ;;  %v541_v24 = vsub.s32 %v540_v22, %v5494_v29 }
  0x47   : > { %4588 = vmatprep.subr.bf16.mxu0 %v5351_v23  ;;  %4574 = vmatprep.subr.bf16.mxu1 %v5158_v18 }
  0x48   : > { %vm544_vm3 = vcmp.lt.s32.totalorder %v541_v24, 8 }
  0x49   : > { %4575 = vmatpush3.bf16.msra.mxu1 %v5158_v18  ;;  %v545_v30 = vsel %vm544_vm3, %v541_v24, 8 }
  0x4a   : > { %4576 = vmatprep.subr.bf16.mxu1 %v5159_v19 }
  0x4d   : > { %468 = vmatmul.mubr.bf16.gmra.mxu0 %v5485_v25  ;;  %4577 = vmatpush3.bf16.msra.mxu1 %v5159_v19 }
  0x4e   : > { %4590 = vmatprep.mubr.msk.bf16.mxu0 %vm5352_vm1, %v5351_v23  ;;  %4578 = vmatprep.subr.bf16.mxu1 %v5160_v20 }
  0x51   : > { %4579 = vmatpush3.bf16.msra.mxu1 %v5160_v20 }
  0x52   : > { %4580 = vmatprep.subr.bf16.mxu1 %v5161_v21 }
  0x55   : > { %4581 = vmatpush3.bf16.msra.mxu1 %v5161_v21 }
  0x56   : > { %4594 = vmatprep.subr.bf16.mxu1 %v5351_v23 }
  0x58   : > { %4583 = vmatmul.mubr.bf16.vlgmr.msra.gmra.mxu1 %v5485_v25  ;;  %v5586_v25 = vld [vmem:[%s6728_s4] sm:$0xff] }
  0x59   : > { %4596 = vmatprep.mubr.msk.bf16.mxu1 %vm5352_vm1, %v5351_v23 }
 0x105   : > { %v459_v31 = vpop.f32.mrf.mxu0 }
 0x106   : > { %v460_v45 = vadd.f32 %v459_v31, %v285_v41  ;;  %v5576_v31 = vadd.s32 8, %v545_v30 }
 0x107   : > { %v461_v33 = vpop.f32.mrf.mxu0 }
 0x108   : > { %v462_v38 = vadd.f32 %v461_v33, %v5503_v34  ;;  %v527_v48 = vmul.f32 0.088388346, %v460_v45  ;;  %vm547_vm4 = vcmp.eq.s32.totalorder %v5576_v31, 1  ;;  %vm550_vm5 = vcmp.eq.s32.totalorder %v5576_v31, 2 }
 0x109   : > { %v463_v36 = vpop.f32.mrf.mxu0  ;;  %v5580_v33 = vsel %vm547_vm4, 1.0, %v5351_v23  ;;  %vm553_vm6 = vcmp.eq.s32.totalorder %v5576_v31, 3  ;;  %vm556_vm7 = vcmp.eq.s32.totalorder %v5576_v31, 4  ;;  %vm559_vm8 = vcmp.eq.s32.totalorder %v5576_v31, 5 }
 0x10a   : > { %v464_v43 = vadd.f32 %v463_v36, %v285_v41  ;;  %v5602_v45 = vsel %vm556_vm7, 1.0, %v5351_v23  ;;  %vm562_vm9 = vcmp.eq.s32.totalorder %v5576_v31, 6  ;;  %vm565_vm10 = vcmp.eq.s32.totalorder %v5576_v31, 7 }
 0x10b   : > { %v465_v37 = vpop.f32.mrf.mxu0  ;;  %vm568_vm11 = vcmp.eq.s32.totalorder %v5576_v31, 8  ;;  %vm571_vm12 = vcmp.eq.s32.totalorder %v5576_v31, 9  ;;  %vm574_vm13 = vcmp.eq.s32.totalorder %v5576_v31, 10  ;;  %vm577_vm14 = vcmp.eq.s32.totalorder %v5576_v31, 11 }
 0x10c   : > { %v466_v39 = vadd.f32 %v465_v37, %v5503_v34  ;;  %v528_v47 = vmul.f32 0.088388346, %v464_v43  ;;  %v5591_v37 = vsel %vm550_vm5, 1.0, %v5351_v23  ;;  %v5622_v15 = vsel %vm568_vm11, 1.0, %v5351_v23 }
 0x10d   : > { %v469_v50 = vpop.f32.mrf.mxu0  ;;  %v5628_v19 = vsel %vm571_vm12, 1.0, %v5351_v23  ;;  %v5631_v22 = vsel %vm574_vm13, 1.0, %v5351_v23  ;;  %vm580_vm15 = vcmp.eq.s32.totalorder %v5576_v31, 12  ;;  %vm583_vm3 = vcmp.eq.s32.totalorder %v5576_v31, 13 }
 0x10e   : > { %v5512_v42 = vpack.c.bf16 %v466_v39, %v462_v38  ;;  %v5518_v49 = vpack.c.bf16 %v528_v47, %v527_v48  ;;  %v470_v51 = vadd.f32 %v469_v50, %v285_v41  ;;  %v5597_v39 = vsel %vm553_vm6, 1.0, %v5351_v23 }
 0x10f   : > { %v5524_v52 = vpop.f32.mrf.mxu0  ;;  %v5606_v48 = vsel %vm559_vm8, 1.0, %v5351_v23  ;;  %vm586_vm4 = vcmp.eq.s32.totalorder %v5576_v31, 14  ;;  %vm589_vm5 = vcmp.eq.s32.totalorder %v5576_v31, 15  ;;  %vm749_vm6 = vcmask 64512  }
 0x110   : > { %v607_v44 = vsel %vm604_vm2, %v5512_v42, %v5151_v40  ;;  %v529_v54 = vmul.f32 0.088388346, %v470_v51  ;;  %vm1503_vm7 = vcmask 785408  }
 0x111   : > { %v612_v46 = vsel %vm608_vm0, %v607_v44, 0  ;;  %v473_v53 = vpop.f32.mrf.mxu0 }
 0x112   : > { %4589 = vmatpush3.bf16.xpose.msra.mxu0 %v612_v46  ;;  %v474_v55 = vadd.f32 %v473_v53, %v285_v41 }
 0x113   : > { %4608 = vmatprep.subr.bf16.mxu0 %v5351_v23  ;;  %v5528_v58 = vpop.f32.mrf.mxu0 }
 0x114   : > { %v530_v56 = vmul.f32 0.088388346, %v474_v55 }
 0x116   : > { %v5526_v57 = vpack.c.bf16 %v530_v56, %v529_v54  ;;  %v5613_v56 = vsel %vm562_vm9, 1.0, %v5351_v23 }
 0x119   : > { %4591 = vmatmul.mubr.msk.bf16.vlgmr.msra.gmra.mxu0 %vm608_vm0, %v5518_v49 }
 0x11a   : > { %4610 = vmatprep.mubr.msk.bf16.mxu0 %vm5352_vm1, %v5351_v23 }
 0x1d9   : > { %v5530_v59 = vpop.f32.mrf.mxu0 }
 0x1da   : > { %672 = vperm.xlu1 %4887, %v5530_v59   ;;  %660 = vperm.xlu0 %4885, %v5530_v59   ;;  %v657_v38 = vadd.f32 %v5530_v59, %v5586_v25 }
 0x1db   : > { %v4592_v60 = vpop.f32.mrf.mxu0 }
 0x1dd   : > { %v654_v61 = vpop.f32.mrf.mxu0 }
 0x1de   : > { %4888 = vset.pattern.permute.xlu1 %v6730_v62  ;;  %4886 = vset.pattern.permute.xlu0 %v6736_v63  ;;  %v5616_v61 = vsel %vm565_vm10, 1.0, %v5351_v23 }
 0x1df   : > { %678 = vperm.xlu1 %4888, %v5530_v59   ;;  %666 = vperm.xlu0 %4886, %v5530_v59   ;;  %v4593_v0 = vpop.f32.mrf.mxu0 }
 0x1e3   : > { %4889 = vset.pattern.permute.xlu1 %v5357_v1  ;;  %4890 = vset.pattern.permute.xlu0 %v5358_v2 }
 0x1e4   : > { %684 = vperm.xlu1 %4889, %v5530_v59   ;;  %690 = vperm.xlu0 %4890, %v5530_v59  }
 0x1e8   : > { %4891 = vset.pattern.permute.xlu1 %v5359_v3  ;;  %4893 = vset.pattern.permute.xlu0 %v6740_v4 }
 0x1e9   : > { %696 = vperm.xlu1 %4891, %v5530_v59   ;;  %708 = vperm.xlu0 %4893, %v5530_v59  }
 0x1ed   : > { %4892 = vset.pattern.permute.xlu1 %v5361_v5  ;;  %4896 = vset.pattern.permute.xlu0 %v6737_v6 }
 0x1ee   : > { %702 = vperm.xlu1 %4892, %v5530_v59   ;;  %726 = vperm.xlu0 %4896, %v5530_v59  }
 0x1f2   : > { %4894 = vset.pattern.permute.xlu1 %v5363_v7  ;;  %4899 = vset.pattern.permute.xlu0 %v6732_v8 }
 0x1f3   : > { %714 = vperm.xlu1 %4894, %v5530_v59   ;;  %744 = vperm.xlu0 %4899, %v5530_v59  }
 0x1f7   : > { %4895 = vset.pattern.permute.xlu1 %v6739_v10  ;;  %822 = vrot.lane.b32.xlu0 %v5152_v9, %s5366_s10 }
 0x1f8   : > { %720 = vperm.xlu1 %4895, %v5530_v59   ;;  %4903 = vset.pattern.permute.xlu0 %v6730_v62 }
 0x1fb   : > { %820 = vrot.lane.b32.xlu0 %v5153_v11, %s5366_s10 }
 0x1fc   : > { %4897 = vset.pattern.permute.xlu1 %v5367_v12 }
 0x1fd   : > { %732 = vperm.xlu1 %4897, %v5530_v59  }
 0x201   : > { %4898 = vset.pattern.permute.xlu1 %v6734_v13 }
 0x202   : > { %738 = vperm.xlu1 %4898, %v5530_v59  }
 0x206   : > { %4900 = vset.pattern.permute.xlu1 %v5354_v27 }
 0x255   : > { %v673_v35 = vpop.permute.xlu1 %672  ;;  %v661_v36 = vpop.permute.xlu0 %660 }
 0x256   : > { %v663_v28 = vmul.f32 %v5580_v33, %v661_v36  ;;  %v675_v46 = vmul.f32 %v5597_v39, %v673_v35 }
 0x258   : > { %v664_v43 = vadd.f32 %v663_v28, %v657_v38  ;;  %v5637_v28 = vsel %vm577_vm14, 1.0, %v5351_v23 }
 0x25a   : > { %v679_v40 = vpop.permute.xlu1 %678  ;;  %v667_v41 = vpop.permute.xlu0 %666 }
 0x25b   : > { %v669_v44 = vmul.f32 %v5591_v37, %v667_v41  ;;  %v681_v50 = vmul.f32 %v5602_v45, %v679_v40 }
 0x25d   : > { %v670_v47 = vadd.f32 %v669_v44, %v664_v43  ;;  %v5643_v43 = vsel %vm580_vm15, 1.0, %v5351_v23 }
 0x25f   : > { %v676_v51 = vadd.f32 %v675_v46, %v670_v47  ;;  %v685_v53 = vpop.permute.xlu1 %684  ;;  %v691_v59 = vpop.permute.xlu0 %690  ;;  %v5646_v47 = vsel %vm583_vm3, 1.0, %v5351_v23 }
 0x260   : > { %v687_v54 = vmul.f32 %v5606_v48, %v685_v53  ;;  %v693_v0 = vmul.f32 %v5613_v56, %v691_v59  ;;  %v5656_v59 = vsel %vm589_vm5, 1.0, %v5351_v23 }
 0x261   : > { %v682_v55 = vadd.f32 %v681_v50, %v676_v51 }
 0x263   : > { %v688_v60 = vadd.f32 %v687_v54, %v682_v55  ;;  %v5653_v55 = vsel %vm586_vm4, 1.0, %v5351_v23 }
 0x264   : > { %v697_v9 = vpop.permute.xlu1 %696  ;;  %v709_v20 = vpop.permute.xlu0 %708 }
 0x265   : > { %v694_v11 = vadd.f32 %v693_v0, %v688_v60  ;;  %v699_v14 = vmul.f32 %v5616_v61, %v697_v9  ;;  %v711_v24 = vmul.f32 %v5628_v19, %v709_v20  ;;  %v292_v20 = vsub.s32 2, %v5494_v29 }
 0x267   : > { %v700_v17 = vadd.f32 %v699_v14, %v694_v11 }
 0x269   : > { %v703_v16 = vpop.permute.xlu1 %702  ;;  %v727_v44 = vpop.permute.xlu0 %726 }
 0x26a   : > { %v705_v18 = vmul.f32 %v5622_v15, %v703_v16  ;;  %v729_v50 = vmul.f32 %v5643_v43, %v727_v44 }
 0x26c   : > { %v706_v21 = vadd.f32 %v705_v18, %v700_v17 }
 0x26e   : > { %v715_v30 = vpop.permute.xlu1 %714  ;;  %v712_v35 = vadd.f32 %v711_v24, %v706_v21  ;;  %v745_v60 = vpop.permute.xlu0 %744  ;;  %v293_v21 = vrot.slane %v5500_v32, %v292_v20 }
 0x26f   : > { %v717_v36 = vmul.f32 %v5631_v22, %v715_v30  ;;  %v747_v14 = vmul.f32 %v5656_v59, %v745_v60  ;;  %v4584_v24 = vpop.f32.mrf.mxu1 }
 0x270   : > { %v521_v30 = vadd.f32 %v4584_v24, %v293_v21 }
 0x271   : > { %v718_v40 = vadd.f32 %v717_v36, %v712_v35  ;;  %v512_v35 = vpop.f32.mrf.mxu1 }
 0x272   : > { %v823_v18 = vpop.permute.xlu0 %822 }
 0x273   : > { %v721_v38 = vpop.permute.xlu1 %720  ;;  %v4585_v36 = vpop.f32.mrf.mxu1 }
 0x274   : > { %v723_v41 = vmul.f32 %v5637_v28, %v721_v38  ;;  %v524_v38 = vadd.f32 %v4585_v36, %v293_v21 }
 0x276   : > { %v724_v46 = vadd.f32 %v723_v41, %v718_v40  ;;  %v5666_v40 = vpack.c.bf16 %v524_v38, %v521_v30 }
 0x278   : > { %v733_v51 = vpop.permute.xlu1 %732  ;;  %v730_v53 = vadd.f32 %v729_v50, %v724_v46 }
 0x279   : > { %v735_v54 = vmul.f32 %v5646_v47, %v733_v51 }
 0x27b   : > { %v736_v9 = vadd.f32 %v735_v54, %v730_v53  ;;  %v515_v53 = vpop.f32.mrf.mxu1  ;;  %v513_v54 = vadd.f32 %v512_v35, %v293_v21 }
 0x27c   : > { %v516_v29 = vadd.f32 %v515_v53, %v293_v21  ;;  %v5163_v53 = vld [vmem:[%s6727_s3 + $0x18] ss:$0 sps:$4 sm:$0xff]  }
 0x27d   : > { %v739_v0 = vpop.permute.xlu1 %738 }
 0x27e   : > { %v741_v11 = vmul.f32 %v5653_v55, %v739_v0  ;;  %v5669_v60 = vpack.c.bf16 %v516_v29, %v513_v54  ;;  %v821_v0 = vpop.permute.xlu0 %820 }
 0x280   : > { %v742_v16 = vadd.f32 %v741_v11, %v736_v9  ;;  %v766_v32 = vsel %vm604_vm2, %v5669_v60, 0  ;;  %v825_v9 = vsel %vm604_vm2, %v5512_v42, %v821_v0 }
 0x281   : > { %4595 = vmatpush3.bf16.msra.mxu1 %v766_v32 }
 0x282   : > { %v748_v17 = vadd.f32 %v747_v14, %v742_v16  ;;  %4600 = vmatprep.subr.bf16.mxu1 %v5351_v23 }
 0x284   : > { %v750_v31 = vsel %vm749_vm6, %v748_v17, -inf }
 0x285   : > { %751 = vmax.xlane.f32.xlu1 %v750_v31 }
 0x296   : > { %832 = vrot.lane.b32.xlu1 %v823_v18, %s5369_s15 }
 0x29a   : > { %827 = vrot.lane.b32.xlu1 %v5518_v49, %s5369_s15 }
 0x30e   : > { %v752_v41 = vpop.xlane.xlu1 %751 }
 0x30f   : > { %v753_v44 = vsub.f32 %v748_v17, %v752_v41 }
 0x311   : > { %v754_v46 = vmul.f32 1.442695, %v753_v44 }
 0x312   : > { %v833_v17 = vpop.permute.xlu1 %832 }
 0x313   : > { %5190 = vpow2.f32 %v754_v46  ;;  %v841_v31 = vsel %vm608_vm0, %v833_v17, 0 }
 0x316   : > { %v828_v24 = vpop.permute.xlu1 %827 }
 0x320   : > { %v5191_v50 = vpop.eup %5190 }
 0x321   : > { %v756_v51 = vsel %vm749_vm6, %v5191_v50, 0.0 }
 0x322   : > { %757 = vadd.xlane.f32.xlu0 %v756_v51  ;;  %v5162_v51 = vld [vmem:[%s6727_s3 + $0x1c] sm:$0x1f]  }
 0x338   : > { %830 = vrot.lane.b32.xlu0 %v825_v9, %s5369_s15 }
 0x3ab   : > { %v758_v11 = vpop.xlane.xlu0 %757 }
 0x3ac   : > { %5192 = vrcp.f32 %v758_v11 }
 0x3af   : > { %v831_v20 = vpop.permute.xlu0 %830 }
 0x3b0   : > { %v838_v21 = vsel %vm608_vm0, %v831_v20, 0 }
 0x3b9   : > { %v5193_v14 = vpop.eup %5192 }
 0x3ba   : > { %v760_v16 = vmul.f32 %v5193_v14, %v5191_v50 }
 0x3bc   : > { %v761_v18 = vpack.c.bf16 %v760_v16, %v760_v16 }
 0x3be   : > { %4597 = vmatmul.mubr.msk.bf16.vlgmr.msra.gmra.mxu1 %vm749_vm6, %v761_v18 }
 0x3bf   : > { %4601 = vmatpush3.bf16.xpose.msra.mxu1 %v841_v31  ;;  %4604 = vmatprep.mubr.msk.bf16.mxu1 %vm5352_vm1, %v5351_v23 }
 0x3c0   : > { %4602 = vmatprep.subr.bf16.mxu1 %v5351_v23 }
 0x3c7   : > { %4603 = vmatpush3.bf16.xpose.msra.mxu1 %v838_v21 }
 0x3c8   : > { %4622 = vmatprep.subr.bf16.mxu1 %v5351_v23 }
 0x3ce   : > { %4605 = vmatmul.mubr.msk.bf16.vlgmr.msra.gmra.mxu1 %vm608_vm0, %v828_v24 }
 0x3cf   : > { %4624 = vmatprep.mubr.msk.bf16.mxu1 %vm5352_vm1, %v5351_v23 }
 0x47e   : > { %v5687_v30 = vpop.f32.mrf.mxu1 }
 0x480   : > { %v4598_v35 = vpop.f32.mrf.mxu1 }
 0x482   : > { %v805_v36 = vpop.f32.mrf.mxu1 }
 0x484   : > { %v4599_v38 = vpop.f32.mrf.mxu1 }
 0x48e   : > { %v877_v41 = vpop.f32.mrf.mxu1 }
 0x48f   : > { %904 = vperm.xlu0 %4903, %v877_v41   ;;  %886 = vperm.xlu1 %4900, %v877_v41   ;;  %v883_v0 = vadd.f32 %v877_v41, %v5586_v25 }
 0x490   : > { %v4606_v44 = vpop.f32.mrf.mxu1 }
 0x492   : > { %v880_v46 = vpop.f32.mrf.mxu1 }
 0x493   : > { %4906 = vset.pattern.permute.xlu0 %v5359_v3  ;;  %4901 = vset.pattern.permute.xlu1 %v6736_v63 }
 0x494   : > { %922 = vperm.xlu0 %4906, %v877_v41   ;;  %892 = vperm.xlu1 %4901, %v877_v41   ;;  %v4607_v50 = vpop.f32.mrf.mxu1 }
 0x498   : > { %4909 = vset.pattern.permute.xlu0 %v5363_v7  ;;  %4902 = vset.pattern.permute.xlu1 %v5353_v26 }
 0x499   : > { %940 = vperm.xlu0 %4909, %v877_v41   ;;  %898 = vperm.xlu1 %4902, %v877_v41  }
 0x49d   : > { %4912 = vset.pattern.permute.xlu0 %v5367_v12  ;;  %4904 = vset.pattern.permute.xlu1 %v5357_v1 }
 0x49e   : > { %958 = vperm.xlu0 %4912, %v877_v41   ;;  %910 = vperm.xlu1 %4904, %v877_v41  }
 0x4a2   : > { %4905 = vset.pattern.permute.xlu1 %v5358_v2  ;;  %4915 = vset.pattern.permute.xlu0 %v5354_v27 }
 0x4a3   : > { %916 = vperm.xlu1 %4905, %v877_v41  }
 0x4a7   : > { %4907 = vset.pattern.permute.xlu1 %v5361_v5 }
 0x4a8   : > { %928 = vperm.xlu1 %4907, %v877_v41  }
 0x4ac   : > { %4908 = vset.pattern.permute.xlu1 %v6740_v4 }
 0x4ad   : > { %934 = vperm.xlu1 %4908, %v877_v41  }
 0x4b1   : > { %4910 = vset.pattern.permute.xlu1 %v6739_v10 }
 0x4b2   : > { %946 = vperm.xlu1 %4910, %v877_v41  }
 0x4b6   : > { %4911 = vset.pattern.permute.xlu1 %v6737_v6 }
 0x4b7   : > { %952 = vperm.xlu1 %4911, %v877_v41  }
 0x4bb   : > { %4913 = vset.pattern.permute.xlu1 %v6734_v13 }
 0x4bc   : > { %964 = vperm.xlu1 %4913, %v877_v41  }
 0x4c0   : > { %4914 = vset.pattern.permute.xlu1 %v6732_v8 }
 0x4c1   : > { %970 = vperm.xlu1 %4914, %v877_v41  }
 0x4c5   : > { %1050 = vrot.lane.b32.xlu1 %v5162_v51, %s5370_s23 }
 0x4c6   : > { %4916 = vset.pattern.permute.xlu1 %v6736_v63 }
 0x4c9   : > { %1048 = vrot.lane.b32.xlu1 %v5163_v53, %s5370_s23 }
 0x50a   : > { %v887_v54 = vpop.permute.xlu1 %886  ;;  %v905_v31 = vpop.permute.xlu0 %904 }
 0x50b   : > { %v889_v29 = vmul.f32 %v5580_v33, %v887_v54  ;;  %v907_v20 = vmul.f32 %v5602_v45, %v905_v31 }
 0x50d   : > { %v890_v11 = vadd.f32 %v889_v29, %v883_v0 }
 0x50f   : > { %v893_v32 = vpop.permute.xlu1 %892  ;;  %v923_v41 = vpop.permute.xlu0 %922 }
 0x510   : > { %v895_v9 = vmul.f32 %v5591_v37, %v893_v32  ;;  %v925_v50 = vmul.f32 %v5616_v61, %v923_v41 }
 0x512   : > { %v896_v16 = vadd.f32 %v895_v9, %v890_v11 }
 0x514   : > { %v899_v14 = vpop.permute.xlu1 %898  ;;  %v941_v9 = vpop.permute.xlu0 %940 }
 0x515   : > { %v901_v17 = vmul.f32 %v5597_v39, %v899_v14  ;;  %v943_v14 = vmul.f32 %v5631_v22, %v941_v9 }
 0x517   : > { %v902_v18 = vadd.f32 %v901_v17, %v896_v16 }
 0x519   : > { %v911_v21 = vpop.permute.xlu1 %910  ;;  %v908_v24 = vadd.f32 %v907_v20, %v902_v18 }
 0x51a   : > { %v913_v35 = vmul.f32 %v5606_v48, %v911_v21 }
 0x51c   : > { %v914_v38 = vadd.f32 %v913_v35, %v908_v24  ;;  %v959_v24 = vpop.permute.xlu0 %958 }
 0x51e   : > { %v917_v36 = vpop.permute.xlu1 %916 }
 0x51f   : > { %v919_v44 = vmul.f32 %v5613_v56, %v917_v36  ;;  %v961_v36 = vmul.f32 %v5646_v47, %v959_v24 }
 0x521   : > { %v920_v46 = vadd.f32 %v919_v44, %v914_v38 }
 0x523   : > { %v929_v51 = vpop.permute.xlu1 %928  ;;  %v926_v53 = vadd.f32 %v925_v50, %v920_v46 }
 0x524   : > { %v931_v54 = vmul.f32 %v5622_v15, %v929_v51 }
 0x526   : > { %v932_v32 = vadd.f32 %v931_v54, %v926_v53 }
 0x528   : > { %v935_v29 = vpop.permute.xlu1 %934 }
 0x529   : > { %v937_v0 = vmul.f32 %v5628_v19, %v935_v29 }
 0x52b   : > { %v938_v11 = vadd.f32 %v937_v0, %v932_v32 }
 0x52d   : > { %v947_v16 = vpop.permute.xlu1 %946  ;;  %v944_v17 = vadd.f32 %v943_v14, %v938_v11 }
 0x52e   : > { %v949_v31 = vmul.f32 %v5637_v28, %v947_v16 }
 0x530   : > { %v950_v20 = vadd.f32 %v949_v31, %v944_v17 }
 0x532   : > { %v953_v18 = vpop.permute.xlu1 %952 }
 0x533   : > { %v955_v21 = vmul.f32 %v5643_v43, %v953_v18 }
 0x535   : > { %v956_v35 = vadd.f32 %v955_v21, %v950_v20 }
 0x537   : > { %v965_v38 = vpop.permute.xlu1 %964  ;;  %v962_v44 = vadd.f32 %v961_v36, %v956_v35 }
 0x538   : > { %v967_v41 = vmul.f32 %v5653_v55, %v965_v38 }
 0x53a   : > { %v968_v50 = vadd.f32 %v967_v41, %v962_v44 }
 0x53c   : > { %v971_v46 = vpop.permute.xlu1 %970 }
 0x53d   : > { %v973_v51 = vmul.f32 %v5656_v59, %v971_v46 }
 0x53f   : > { %v974_v53 = vadd.f32 %v973_v51, %v968_v50 }
 0x540   : > { %v1051_v29 = vpop.permute.xlu1 %1050 }
 0x541   : > { %v975_v54 = vsel %vm749_vm6, %v974_v53, -inf }
 0x542   : > { %976 = vmax.xlane.f32.xlu0 %v975_v54 }
 0x544   : > { %v1049_v32 = vpop.permute.xlu1 %1048 }
 0x545   : > { %v1053_v0 = vsel %vm604_vm2, %v5512_v42, %v1049_v32 }
 0x558   : > { %988 = vrot.lane.b32.xlu0 %v5669_v60, %s5369_s15 }
 0x55c   : > { %1057 = vrot.lane.b32.xlu0 %v1053_v0, %s5370_s23 }
 0x560   : > { %1054 = vrot.lane.b32.xlu0 %v5518_v49, %s5370_s23 }
 0x5cb   : > { %v977_v9 = vpop.xlane.xlu0 %976 }
 0x5cc   : > { %v978_v11 = vsub.f32 %v974_v53, %v977_v9 }
 0x5ce   : > { %v979_v14 = vmul.f32 1.442695, %v978_v11  ;;  %v5164_v11 = vld [vmem:[%s6727_s3 + $0x28] sm:$0x1f]  }
 0x5cf   : > { %v989_v16 = vpop.permute.xlu0 %988 }
 0x5d0   : > { %5194 = vpow2.f32 %v979_v14  ;;  %v994_v17 = vsel %vm604_vm2, %v989_v16, 0  ;;  %v5165_v14 = vld [vmem:[%s6727_s3 + $0x24] ss:$0 sps:$4 sm:$0xff]  }
 0x5d1   : > { %4609 = vmatpush3.bf16.msra.mxu0 %v994_v17 }
 0x5d2   : > { %4614 = vmatprep.subr.bf16.mxu0 %v5351_v23 }
 0x5d3   : > { %v1058_v44 = vpop.permute.xlu0 %1057 }
 0x5d4   : > { %v1065_v41 = vsel %vm608_vm0, %v1058_v44, 0 }
 0x5d7   : > { %v1055_v46 = vpop.permute.xlu0 %1054 }
 0x5dd   : > { %v5195_v31 = vpop.eup %5194 }
 0x5de   : > { %v981_v18 = vsel %vm749_vm6, %v5195_v31, 0.0 }
 0x5df   : > { %982 = vadd.xlane.f32.xlu1 %v981_v18 }
 0x5f0   : > { %1059 = vrot.lane.b32.xlu1 %v1051_v29, %s5370_s23 }
 0x668   : > { %v983_v20 = vpop.xlane.xlu1 %982 }
 0x669   : > { %5196 = vrcp.f32 %v983_v20 }
 0x66c   : > { %v1060_v24 = vpop.permute.xlu1 %1059 }
 0x66d   : > { %v1068_v36 = vsel %vm608_vm0, %v1060_v24, 0 }
 0x676   : > { %v5197_v21 = vpop.eup %5196 }
 0x677   : > { %v985_v35 = vmul.f32 %v5197_v21, %v5195_v31 }
 0x679   : > { %v986_v38 = vpack.c.bf16 %v985_v35, %v985_v35 }
 0x67b   : > { %4611 = vmatmul.mubr.msk.bf16.vlgmr.msra.gmra.mxu0 %vm749_vm6, %v986_v38 }
 0x67c   : > { %4615 = vmatpush3.bf16.xpose.msra.mxu0 %v1068_v36  ;;  %4618 = vmatprep.mubr.msk.bf16.mxu0 %vm5352_vm1, %v5351_v23 }
 0x67d   : > { %4616 = vmatprep.subr.bf16.mxu0 %v5351_v23 }
 0x684   : > { %4617 = vmatpush3.bf16.xpose.msra.mxu0 %v1065_v41 }
 0x685   : > { %4636 = vmatprep.subr.bf16.mxu0 %v5351_v23 }
 0x68b   : > { %4619 = vmatmul.mubr.msk.bf16.vlgmr.msra.gmra.mxu0 %vm608_vm0, %v1055_v46 }
 0x68c   : > { %4638 = vmatprep.mubr.msk.bf16.mxu0 %vm5352_vm1, %v5351_v23 }
 0x73b   : > { %v5750_v50 = vpop.f32.mrf.mxu0 }
 0x73d   : > { %v4612_v51 = vpop.f32.mrf.mxu0 }
 0x73f   : > { %v1033_v53 = vpop.f32.mrf.mxu0 }
 0x741   : > { %v4613_v54 = vpop.f32.mrf.mxu0 }
 0x74b   : > { %v1104_v29 = vpop.f32.mrf.mxu0 }
 0x74c   : > { %1119 = vperm.xlu1 %4916, %v1104_v29   ;;  %1113 = vperm.xlu0 %4915, %v1104_v29   ;;  %v1110_v31 = vadd.f32 %v1104_v29, %v5586_v25 }
 0x74d   : > { %v4620_v32 = vpop.f32.mrf.mxu0 }
 0x74f   : > { %v1107_v0 = vpop.f32.mrf.mxu0 }
 0x750   : > { %4917 = vset.pattern.permute.xlu1 %v5353_v26  ;;  %4918 = vset.pattern.permute.xlu0 %v6730_v62 }
 0x751   : > { %1125 = vperm.xlu1 %4917, %v1104_v29   ;;  %1131 = vperm.xlu0 %4918, %v1104_v29   ;;  %v4621_v9 = vpop.f32.mrf.mxu0 }
 0x755   : > { %4919 = vset.pattern.permute.xlu1 %v5357_v1  ;;  %4921 = vset.pattern.permute.xlu0 %v5359_v3 }
 0x756   : > { %1137 = vperm.xlu1 %4919, %v1104_v29   ;;  %1149 = vperm.xlu0 %4921, %v1104_v29  }
 0x75a   : > { %4920 = vset.pattern.permute.xlu1 %v5358_v2  ;;  %4924 = vset.pattern.permute.xlu0 %v5363_v7 }
 0x75b   : > { %1143 = vperm.xlu1 %4920, %v1104_v29   ;;  %1167 = vperm.xlu0 %4924, %v1104_v29  }
 0x75f   : > { %4922 = vset.pattern.permute.xlu1 %v5361_v5  ;;  %4927 = vset.pattern.permute.xlu0 %v5367_v12 }
 0x760   : > { %1155 = vperm.xlu1 %4922, %v1104_v29   ;;  %1185 = vperm.xlu0 %4927, %v1104_v29  }
 0x764   : > { %4923 = vset.pattern.permute.xlu1 %v6740_v4  ;;  %4930 = vset.pattern.permute.xlu0 %v5354_v27 }
 0x765   : > { %1161 = vperm.xlu1 %4923, %v1104_v29  }
 0x769   : > { %4925 = vset.pattern.permute.xlu1 %v6739_v10 }
 0x76a   : > { %1173 = vperm.xlu1 %4925, %v1104_v29  }
 0x76e   : > { %4926 = vset.pattern.permute.xlu1 %v6737_v6 }
 0x76f   : > { %1179 = vperm.xlu1 %4926, %v1104_v29  }
 0x773   : > { %4928 = vset.pattern.permute.xlu1 %v6734_v13 }
 0x774   : > { %1191 = vperm.xlu1 %4928, %v1104_v29  }
 0x778   : > { %4929 = vset.pattern.permute.xlu1 %v6732_v8 }
 0x779   : > { %1197 = vperm.xlu1 %4929, %v1104_v29  }
 0x77d   : > { %1276 = vrot.lane.b32.xlu1 %v5164_v11, %s5369_s15 }
 0x77e   : > { %4931 = vset.pattern.permute.xlu1 %v6736_v63 }
 0x781   : > { %1274 = vrot.lane.b32.xlu1 %v5165_v14, %s5369_s15 }
 0x7c7   : > { %v1120_v16 = vpop.permute.xlu1 %1119  ;;  %v1114_v17 = vpop.permute.xlu0 %1113 }
 0x7c8   : > { %v1116_v18 = vmul.f32 %v5580_v33, %v1114_v17  ;;  %v1122_v20 = vmul.f32 %v5591_v37, %v1120_v16 }
 0x7ca   : > { %v1117_v21 = vadd.f32 %v1116_v18, %v1110_v31 }
 0x7cc   : > { %v1126_v24 = vpop.permute.xlu1 %1125  ;;  %v1123_v35 = vadd.f32 %v1122_v20, %v1117_v21  ;;  %v1132_v38 = vpop.permute.xlu0 %1131 }
 0x7cd   : > { %v1128_v36 = vmul.f32 %v5597_v39, %v1126_v24  ;;  %v1134_v41 = vmul.f32 %v5602_v45, %v1132_v38 }
 0x7cf   : > { %v1129_v44 = vadd.f32 %v1128_v36, %v1123_v35 }
 0x7d1   : > { %v1138_v46 = vpop.permute.xlu1 %1137  ;;  %v1135_v51 = vadd.f32 %v1134_v41, %v1129_v44  ;;  %v1150_v0 = vpop.permute.xlu0 %1149 }
 0x7d2   : > { %v1140_v53 = vmul.f32 %v5606_v48, %v1138_v46  ;;  %v1152_v11 = vmul.f32 %v5616_v61, %v1150_v0 }
 0x7d4   : > { %v1141_v32 = vadd.f32 %v1140_v53, %v1135_v51 }
 0x7d6   : > { %v1144_v54 = vpop.permute.xlu1 %1143  ;;  %v1168_v21 = vpop.permute.xlu0 %1167 }
 0x7d7   : > { %v1146_v29 = vmul.f32 %v5613_v56, %v1144_v54  ;;  %v1170_v35 = vmul.f32 %v5631_v22, %v1168_v21 }
 0x7d9   : > { %v1147_v9 = vadd.f32 %v1146_v29, %v1141_v32 }
 0x7db   : > { %v1156_v14 = vpop.permute.xlu1 %1155  ;;  %v1153_v16 = vadd.f32 %v1152_v11, %v1147_v9  ;;  %v1186_v53 = vpop.permute.xlu0 %1185 }
 0x7dc   : > { %v1158_v17 = vmul.f32 %v5622_v15, %v1156_v14  ;;  %v1188_v32 = vmul.f32 %v5646_v47, %v1186_v53 }
 0x7de   : > { %v1159_v18 = vadd.f32 %v1158_v17, %v1153_v16 }
 0x7e0   : > { %v1162_v31 = vpop.permute.xlu1 %1161 }
 0x7e1   : > { %v1164_v20 = vmul.f32 %v5628_v19, %v1162_v31 }
 0x7e3   : > { %v1165_v24 = vadd.f32 %v1164_v20, %v1159_v18 }
 0x7e5   : > { %v1174_v36 = vpop.permute.xlu1 %1173  ;;  %v1171_v38 = vadd.f32 %v1170_v35, %v1165_v24 }
 0x7e6   : > { %v1176_v44 = vmul.f32 %v5637_v28, %v1174_v36 }
 0x7e8   : > { %v1177_v46 = vadd.f32 %v1176_v44, %v1171_v38 }
 0x7ea   : > { %v1180_v41 = vpop.permute.xlu1 %1179 }
 0x7eb   : > { %v1182_v51 = vmul.f32 %v5643_v43, %v1180_v41 }
 0x7ed   : > { %v1183_v54 = vadd.f32 %v1182_v51, %v1177_v46 }
 0x7ef   : > { %v1192_v29 = vpop.permute.xlu1 %1191  ;;  %v1189_v0 = vadd.f32 %v1188_v32, %v1183_v54 }
 0x7f0   : > { %v1194_v9 = vmul.f32 %v5653_v55, %v1192_v29 }
 0x7f2   : > { %v1195_v14 = vadd.f32 %v1194_v9, %v1189_v0 }
 0x7f4   : > { %v1198_v11 = vpop.permute.xlu1 %1197 }
 0x7f5   : > { %v1200_v16 = vmul.f32 %v5656_v59, %v1198_v11 }
 0x7f7   : > { %v1201_v17 = vadd.f32 %v1200_v16, %v1195_v14  ;;  %v5811_v14 = vrot.slane %v5669_v60, 4 }
 0x7f8   : > { %v1277_v18 = vpop.permute.xlu1 %1276 }
 0x7f9   : > { %v1202_v31 = vsel %vm749_vm6, %v1201_v17, -inf }
 0x7fa   : > { %1203 = vmax.xlane.f32.xlu0 %v1202_v31 }
 0x7fc   : > { %v1275_v20 = vpop.permute.xlu1 %1274 }
 0x7fd   : > { %v1279_v21 = vsel %vm604_vm2, %v5512_v42, %v1275_v20 }
 0x810   : > { %1214 = vrot.lane.b32.xlu0 %v5669_v60, %s5370_s23 }
 0x814   : > { %1283 = vrot.lane.b32.xlu0 %v1279_v21, %s5366_s10 }
 0x818   : > { %1280 = vrot.lane.b32.xlu0 %v5518_v49, %s5366_s10 }
 0x883   : > { %v1204_v24 = vpop.xlane.xlu0 %1203 }
 0x884   : > { %v1205_v35 = vsub.f32 %v1201_v17, %v1204_v24  ;;  %v1681_v17 = vsel %vm604_vm2, %v5811_v14, 0 }
 0x886   : > { %v1206_v36 = vmul.f32 1.442695, %v1205_v35 }
 0x887   : > { %v1215_v38 = vpop.permute.xlu0 %1214 }
 0x888   : > { %5198 = vpow2.f32 %v1206_v36  ;;  %v1220_v44 = vsel %vm604_vm2, %v1215_v38, 0 }
 0x889   : > { %4623 = vmatpush3.bf16.msra.mxu1 %v1220_v44 }
 0x88a   : > { %4628 = vmatprep.subr.bf16.mxu1 %v5351_v23 }
 0x88b   : > { %v1284_v9 = vpop.permute.xlu0 %1283 }
 0x88c   : > { %v1291_v11 = vsel %vm608_vm0, %v1284_v9, 0 }
 0x88f   : > { %v1281_v16 = vpop.permute.xlu0 %1280 }
 0x895   : > { %v5199_v41 = vpop.eup %5198 }
 0x896   : > { %v1208_v46 = vsel %vm749_vm6, %v5199_v41, 0.0 }
 0x897   : > { %1209 = vadd.xlane.f32.xlu1 %v1208_v46 }
 0x8a8   : > { %1285 = vrot.lane.b32.xlu1 %v1277_v18, %s5366_s10 }
 0x920   : > { %v1210_v51 = vpop.xlane.xlu1 %1209 }
 0x921   : > { %5200 = vrcp.f32 %v1210_v51 }
 0x924   : > { %v1286_v54 = vpop.permute.xlu1 %1285 }
 0x925   : > { %v1294_v29 = vsel %vm608_vm0, %v1286_v54, 0 }
 0x92e   : > { %v5201_v53 = vpop.eup %5200 }
 0x92f   : > { %v1212_v32 = vmul.f32 %v5201_v53, %v5199_v41 }
 0x931   : > { %v1213_v0 = vpack.c.bf16 %v1212_v32, %v1212_v32 }
 0x933   : > { %4625 = vmatmul.mubr.msk.bf16.vlgmr.msra.gmra.mxu1 %vm749_vm6, %v1213_v0 }
 0x934   : > { %4629 = vmatpush3.bf16.xpose.msra.mxu1 %v1294_v29  ;;  %4632 = vmatprep.mubr.msk.bf16.mxu1 %vm5352_vm1, %v5351_v23 }
 0x935   : > { %4630 = vmatprep.subr.bf16.mxu1 %v5351_v23 }
 0x93c   : > { %4631 = vmatpush3.bf16.xpose.msra.mxu1 %v1291_v11 }
 0x93d   : > { %4650 = vmatprep.subr.bf16.mxu1 %v5351_v23 }
 0x943   : > { %4633 = vmatmul.mubr.msk.bf16.vlgmr.msra.gmra.mxu1 %vm608_vm0, %v1281_v16 }
 0x944   : > { %4651 = vmatpush3.bf16.msra.mxu1 %v1681_v17  ;;  %4652 = vmatprep.mubr.msk.bf16.mxu1 %vm5352_vm1, %v5351_v23 }
 0x945   : > { %4656 = vmatprep.subr.bf16.mxu1 %v5351_v23 }
 0x9f3   : > { %v5819_v31 = vpop.f32.mrf.mxu1 }
 0x9f5   : > { %v4626_v18 = vpop.f32.mrf.mxu1 }
 0x9f7   : > { %v1259_v20 = vpop.f32.mrf.mxu1 }
 0x9f9   : > { %v4627_v21 = vpop.f32.mrf.mxu1 }
 0xa03   : > { %v1330_v24 = vpop.f32.mrf.mxu1 }
 0xa04   : > { %1345 = vperm.xlu1 %4931, %v1330_v24   ;;  %1339 = vperm.xlu0 %4930, %v1330_v24   ;;  %v1336_v46 = vadd.f32 %v1330_v24, %v5586_v25 }
 0xa05   : > { %v4634_v35 = vpop.f32.mrf.mxu1 }
 0xa07   : > { %v1333_v36 = vpop.f32.mrf.mxu1 }
 0xa08   : > { %4932 = vset.pattern.permute.xlu1 %v5353_v26  ;;  %4933 = vset.pattern.permute.xlu0 %v6730_v62 }
 0xa09   : > { %1351 = vperm.xlu1 %4932, %v1330_v24   ;;  %1357 = vperm.xlu0 %4933, %v1330_v24   ;;  %v4635_v38 = vpop.f32.mrf.mxu1 }
 0xa0d   : > { %4934 = vset.pattern.permute.xlu1 %v5357_v1  ;;  %4936 = vset.pattern.permute.xlu0 %v5359_v3 }
 0xa0e   : > { %1363 = vperm.xlu1 %4934, %v1330_v24   ;;  %1375 = vperm.xlu0 %4936, %v1330_v24  }
 0xa12   : > { %4935 = vset.pattern.permute.xlu1 %v5358_v2  ;;  %4939 = vset.pattern.permute.xlu0 %v5363_v7 }
 0xa13   : > { %1369 = vperm.xlu1 %4935, %v1330_v24   ;;  %1393 = vperm.xlu0 %4939, %v1330_v24  }
 0xa17   : > { %4937 = vset.pattern.permute.xlu1 %v5361_v5  ;;  %4942 = vset.pattern.permute.xlu0 %v5367_v12 }
 0xa18   : > { %1381 = vperm.xlu1 %4937, %v1330_v24   ;;  %1411 = vperm.xlu0 %4942, %v1330_v24  }
 0xa1c   : > { %4938 = vset.pattern.permute.xlu1 %v6740_v4  ;;  %4946 = vset.pattern.permute.xlu0 %v6736_v63 }
 0xa1d   : > { %1387 = vperm.xlu1 %4938, %v1330_v24  }
 0xa21   : > { %4940 = vset.pattern.permute.xlu1 %v6739_v10 }
 0xa22   : > { %1399 = vperm.xlu1 %4940, %v1330_v24  }
 0xa26   : > { %4941 = vset.pattern.permute.xlu1 %v6737_v6 }
 0xa27   : > { %1405 = vperm.xlu1 %4941, %v1330_v24  }
 0xa2b   : > { %4943 = vset.pattern.permute.xlu1 %v6734_v13 }
 0xa2c   : > { %1417 = vperm.xlu1 %4943, %v1330_v24  }
 0xa30   : > { %4944 = vset.pattern.permute.xlu1 %v6732_v8 }
 0xa31   : > { %1423 = vperm.xlu1 %4944, %v1330_v24  }
 0xa35   : > { %4945 = vset.pattern.permute.xlu1 %v5354_v27 }
 0xa7f   : > { %v1346_v44 = vpop.permute.xlu1 %1345  ;;  %v1340_v41 = vpop.permute.xlu0 %1339 }
 0xa80   : > { %v1342_v51 = vmul.f32 %v5580_v33, %v1340_v41  ;;  %v1348_v53 = vmul.f32 %v5591_v37, %v1346_v44 }
 0xa82   : > { %v1343_v54 = vadd.f32 %v1342_v51, %v1336_v46 }
 0xa84   : > { %v1352_v32 = vpop.permute.xlu1 %1351  ;;  %v1349_v29 = vadd.f32 %v1348_v53, %v1343_v54  ;;  %v1358_v9 = vpop.permute.xlu0 %1357 }
 0xa85   : > { %v1354_v0 = vmul.f32 %v5597_v39, %v1352_v32  ;;  %v1360_v16 = vmul.f32 %v5602_v45, %v1358_v9 }
 0xa87   : > { %v1355_v11 = vadd.f32 %v1354_v0, %v1349_v29 }
 0xa89   : > { %v1364_v17 = vpop.permute.xlu1 %1363  ;;  %v1361_v18 = vadd.f32 %v1360_v16, %v1355_v11  ;;  %v1376_v24 = vpop.permute.xlu0 %1375 }
 0xa8a   : > { %v1366_v20 = vmul.f32 %v5606_v48, %v1364_v17  ;;  %v1378_v38 = vmul.f32 %v5616_v61, %v1376_v24 }
 0xa8c   : > { %v1367_v35 = vadd.f32 %v1366_v20, %v1361_v18 }
 0xa8e   : > { %v1370_v21 = vpop.permute.xlu1 %1369  ;;  %v1394_v32 = vpop.permute.xlu0 %1393 }
 0xa8f   : > { %v1372_v25 = vmul.f32 %v5613_v56, %v1370_v21  ;;  %v1396_v0 = vmul.f32 %v5631_v22, %v1394_v32 }
 0xa91   : > { %v1373_v36 = vadd.f32 %v1372_v25, %v1367_v35 }
 0xa93   : > { %v1382_v44 = vpop.permute.xlu1 %1381  ;;  %v1379_v41 = vadd.f32 %v1378_v38, %v1373_v36  ;;  %v1412_v21 = vpop.permute.xlu0 %1411 }
 0xa94   : > { %v1384_v46 = vmul.f32 %v5622_v15, %v1382_v44  ;;  %v1414_v25 = vmul.f32 %v5646_v47, %v1412_v21 }
 0xa96   : > { %v1385_v53 = vadd.f32 %v1384_v46, %v1379_v41 }
 0xa98   : > { %v1388_v51 = vpop.permute.xlu1 %1387 }
 0xa99   : > { %v1390_v54 = vmul.f32 %v5628_v19, %v1388_v51 }
 0xa9b   : > { %v1391_v29 = vadd.f32 %v1390_v54, %v1385_v53 }
 0xa9d   : > { %v1400_v9 = vpop.permute.xlu1 %1399  ;;  %v1397_v11 = vadd.f32 %v1396_v0, %v1391_v29 }
 0xa9e   : > { %v1402_v16 = vmul.f32 %v5637_v28, %v1400_v9 }
 0xaa0   : > { %v1403_v18 = vadd.f32 %v1402_v16, %v1397_v11 }
 0xaa2   : > { %v1406_v17 = vpop.permute.xlu1 %1405 }
 0xaa3   : > { %v1408_v20 = vmul.f32 %v5643_v43, %v1406_v17 }
 0xaa5   : > { %v1409_v35 = vadd.f32 %v1408_v20, %v1403_v18 }
 0xaa7   : > { %v1418_v24 = vpop.permute.xlu1 %1417  ;;  %v1415_v36 = vadd.f32 %v1414_v25, %v1409_v35  ;;  %v5864_v25 = vrot.slane %v5512_v42, 4  ;;  %v5877_v42 = vrot.slane %v5518_v49, 4 }
 0xaa8   : > { %v1420_v38 = vmul.f32 %v5653_v55, %v1418_v24  ;;  %v5167_v24 = vld [vmem:[%s6727_s3] ss:$0 sps:$4 sm:$0xff]  }
 0xaaa   : > { %v1421_v41 = vadd.f32 %v1420_v38, %v1415_v36  ;;  %v1522_v36 = vsel %vm604_vm2, %v5864_v25, %v5167_v24 }
 0xaab   : > { %v1527_v38 = vsel %vm608_vm0, %v1522_v36, 0 }
 0xaac   : > { %v1424_v44 = vpop.permute.xlu1 %1423 }
 0xaad   : > { %v1426_v46 = vmul.f32 %v5656_v59, %v1424_v44 }
 0xaaf   : > { %v1427_v51 = vadd.f32 %v1426_v46, %v1421_v41 }
 0xab1   : > { %v1428_v53 = vsel %vm749_vm6, %v1427_v51, -inf }
 0xab2   : > { %1429 = vmax.xlane.f32.xlu0 %v1428_v53 }
 0xac8   : > { %1440 = vrot.lane.b32.xlu0 %v5669_v60, %s5366_s10  ;;  %v5166_v60 = vld [vmem:[%s6727_s3 + $0x4] sm:$0x1f]  }
 0xac9   : > { %v1530_v35 = vsel %vm608_vm0, %v5166_v60, 0 }
 0xb3b   : > { %v1430_v54 = vpop.xlane.xlu0 %1429 }
 0xb3c   : > { %v1431_v32 = vsub.f32 %v1427_v51, %v1430_v54 }
 0xb3e   : > { %v1432_v29 = vmul.f32 1.442695, %v1431_v32 }
 0xb3f   : > { %v1441_v0 = vpop.permute.xlu0 %1440 }
 0xb40   : > { %5202 = vpow2.f32 %v1432_v29  ;;  %v1446_v9 = vsel %vm604_vm2, %v1441_v0, 0  ;;  %v5168_v29 = vld [vmem:[%s6727_s3 + $0x10] sm:$0x1f]   ;;  %v5169_v0 = vld [vmem:[%s6727_s3 + $0xc] ss:$0 sps:$4 sm:$0xff]  }
 0xb41   : > { %4637 = vmatpush3.bf16.msra.mxu0 %v1446_v9  ;;  %v5911_v9 = vld [vmem:[%s6728_s4] sm:$0xff] }
 0xb42   : > { %4642 = vmatprep.subr.bf16.mxu0 %v5351_v23 }
 0xb4d   : > { %v5203_v11 = vpop.eup %5202 }
 0xb4e   : > { %v1434_v16 = vsel %vm749_vm6, %v5203_v11, 0.0 }
 0xb4f   : > { %1435 = vadd.xlane.f32.xlu1 %v1434_v16 }
 0xbd8   : > { %v1436_v17 = vpop.xlane.xlu1 %1435 }
 0xbd9   : > { %5204 = vrcp.f32 %v1436_v17 }
 0xbe6   : > { %v5205_v18 = vpop.eup %5204 }
 0xbe7   : > { %v1438_v20 = vmul.f32 %v5205_v18, %v5203_v11 }
 0xbe9   : > { %v1439_v21 = vpack.c.bf16 %v1438_v20, %v1438_v20 }
 0xbeb   : > { %4639 = vmatmul.mubr.msk.bf16.vlgmr.msra.gmra.mxu0 %vm749_vm6, %v1439_v21 }
 0xbec   : > { %4643 = vmatpush3.bf16.xpose.msra.mxu0 %v1530_v35  ;;  %4646 = vmatprep.mubr.msk.bf16.mxu0 %vm5352_vm1, %v5351_v23 }
 0xbed   : > { %4644 = vmatprep.subr.bf16.mxu0 %v5351_v23 }
 0xbf4   : > { %4645 = vmatpush3.bf16.xpose.msra.mxu0 %v1527_v38 }
 0xbf5   : > { %4664 = vmatprep.subr.bf16.mxu0 %v5351_v23 }
 0xbfb   : > { %4647 = vmatmul.mubr.msk.bf16.vlgmr.msra.gmra.mxu0 %vm608_vm0, %v5877_v42 }
 0xbfc   : > { %4666 = vmatprep.mubr.msk.bf16.mxu0 %vm5352_vm1, %v5351_v23 }
 0xcab   : > { %v5883_v44 = vpop.f32.mrf.mxu0 }
 0xcad   : > { %v4640_v41 = vpop.f32.mrf.mxu0 }
 0xcaf   : > { %v1485_v46 = vpop.f32.mrf.mxu0 }
 0xcb1   : > { %v4641_v51 = vpop.f32.mrf.mxu0 }
 0xcbb   : > { %v1566_v53 = vpop.f32.mrf.mxu0 }
 0xcbc   : > { %1581 = vperm.xlu0 %4946, %v1566_v53   ;;  %1575 = vperm.xlu1 %4945, %v1566_v53   ;;  %v1572_v16 = vadd.f32 %v1566_v53, %v5911_v9 }
 0xcbd   : > { %v4648_v54 = vpop.f32.mrf.mxu0 }
 0xcbf   : > { %v1569_v32 = vpop.f32.mrf.mxu0 }
 0xcc0   : > { %4949 = vset.pattern.permute.xlu0 %v5357_v1  ;;  %4947 = vset.pattern.permute.xlu1 %v5353_v26 }
 0xcc1   : > { %1599 = vperm.xlu0 %4949, %v1566_v53   ;;  %1587 = vperm.xlu1 %4947, %v1566_v53   ;;  %v4649_v49 = vpop.f32.mrf.mxu0 }
 0xcc5   : > { %4952 = vset.pattern.permute.xlu0 %v5361_v5  ;;  %4948 = vset.pattern.permute.xlu1 %v6730_v62 }
 0xcc6   : > { %1617 = vperm.xlu0 %4952, %v1566_v53   ;;  %1593 = vperm.xlu1 %4948, %v1566_v53  }
 0xcca   : > { %4955 = vset.pattern.permute.xlu0 %v6739_v10  ;;  %4950 = vset.pattern.permute.xlu1 %v5358_v2 }
 0xccb   : > { %1635 = vperm.xlu0 %4955, %v1566_v53   ;;  %1605 = vperm.xlu1 %4950, %v1566_v53  }
 0xccf   : > { %4958 = vset.pattern.permute.xlu0 %v6734_v13  ;;  %4951 = vset.pattern.permute.xlu1 %v5359_v3 }
 0xcd0   : > { %1653 = vperm.xlu0 %4958, %v1566_v53   ;;  %1611 = vperm.xlu1 %4951, %v1566_v53  }
 0xcd4   : > { %4953 = vset.pattern.permute.xlu1 %v6740_v4  ;;  %1736 = vrot.lane.b32.xlu0 %v5168_v29, %s5366_s10 }
 0xcd5   : > { %1623 = vperm.xlu1 %4953, %v1566_v53   ;;  %4962 = vset.pattern.permute.xlu0 %v5353_v26 }
 0xcd8   : > { %1734 = vrot.lane.b32.xlu0 %v5169_v0, %s5366_s10 }
 0xcd9   : > { %4954 = vset.pattern.permute.xlu1 %v5363_v7 }
 0xcda   : > { %1629 = vperm.xlu1 %4954, %v1566_v53  }
 0xcde   : > { %4956 = vset.pattern.permute.xlu1 %v6737_v6 }
 0xcdf   : > { %1641 = vperm.xlu1 %4956, %v1566_v53  }
 0xce3   : > { %4957 = vset.pattern.permute.xlu1 %v5367_v12 }
 0xce4   : > { %1647 = vperm.xlu1 %4957, %v1566_v53  }
 0xce8   : > { %4959 = vset.pattern.permute.xlu1 %v6732_v8 }
 0xce9   : > { %1659 = vperm.xlu1 %4959, %v1566_v53  }
 0xced   : > { %4960 = vset.pattern.permute.xlu1 %v5354_v27 }
 0xd37   : > { %v1576_v11 = vpop.permute.xlu1 %1575  ;;  %v1582_v60 = vpop.permute.xlu0 %1581 }
 0xd38   : > { %v1578_v17 = vmul.f32 %v5580_v33, %v1576_v11  ;;  %v1584_v20 = vmul.f32 %v5591_v37, %v1582_v60 }
 0xd3a   : > { %v1579_v18 = vadd.f32 %v1578_v17, %v1572_v16 }
 0xd3c   : > { %v1588_v21 = vpop.permute.xlu1 %1587  ;;  %v1585_v35 = vadd.f32 %v1584_v20, %v1579_v18  ;;  %v1600_v46 = vpop.permute.xlu0 %1599 }
 0xd3d   : > { %v1590_v24 = vmul.f32 %v5597_v39, %v1588_v21  ;;  %v1602_v54 = vmul.f32 %v5606_v48, %v1600_v46 }
 0xd3f   : > { %v1591_v38 = vadd.f32 %v1590_v24, %v1585_v35 }
 0xd41   : > { %v1594_v36 = vpop.permute.xlu1 %1593  ;;  %v1618_v16 = vpop.permute.xlu0 %1617 }
 0xd42   : > { %v1596_v41 = vmul.f32 %v5602_v45, %v1594_v36  ;;  %v1620_v60 = vmul.f32 %v5622_v15, %v1618_v16 }
 0xd44   : > { %v1597_v51 = vadd.f32 %v1596_v41, %v1591_v38 }
 0xd46   : > { %v1606_v32 = vpop.permute.xlu1 %1605  ;;  %v1603_v53 = vadd.f32 %v1602_v54, %v1597_v51  ;;  %v1636_v38 = vpop.permute.xlu0 %1635 }
 0xd47   : > { %v1608_v49 = vmul.f32 %v5613_v56, %v1606_v32  ;;  %v1638_v46 = vmul.f32 %v5637_v28, %v1636_v38 }
 0xd49   : > { %v1609_v0 = vadd.f32 %v1608_v49, %v1603_v53 }
 0xd4b   : > { %v1612_v29 = vpop.permute.xlu1 %1611  ;;  %v1654_v53 = vpop.permute.xlu0 %1653 }
 0xd4c   : > { %v1614_v11 = vmul.f32 %v5616_v61, %v1612_v29 }
 0xd4e   : > { %v1615_v17 = vadd.f32 %v1614_v11, %v1609_v0  ;;  %v1656_v11 = vmul.f32 %v5653_v55, %v1654_v53 }
 0xd50   : > { %v1624_v18 = vpop.permute.xlu1 %1623  ;;  %v1621_v20 = vadd.f32 %v1620_v60, %v1615_v17 }
 0xd51   : > { %v1626_v21 = vmul.f32 %v5628_v19, %v1624_v18 }
 0xd53   : > { %v1627_v24 = vadd.f32 %v1626_v21, %v1621_v20 }
 0xd55   : > { %v1630_v35 = vpop.permute.xlu1 %1629 }
 0xd56   : > { %v1632_v36 = vmul.f32 %v5631_v22, %v1630_v35  ;;  %v1737_v35 = vpop.permute.xlu0 %1736 }
 0xd58   : > { %v1633_v41 = vadd.f32 %v1632_v36, %v1627_v24 }
 0xd5a   : > { %v1642_v51 = vpop.permute.xlu1 %1641  ;;  %v1639_v54 = vadd.f32 %v1638_v46, %v1633_v41 }
 0xd5b   : > { %v1644_v32 = vmul.f32 %v5643_v43, %v1642_v51  ;;  %v1735_v51 = vpop.permute.xlu0 %1734 }
 0xd5d   : > { %v1645_v29 = vadd.f32 %v1644_v32, %v1639_v54  ;;  %v1739_v54 = vsel %vm604_vm2, %v5864_v25, %v1735_v51  ;;  %v5171_v51 = vld [vmem:[%s6727_s3 + $0x18] ss:$0 sps:$4 sm:$0xff]  }
 0xd5f   : > { %v1648_v49 = vpop.permute.xlu1 %1647 }
 0xd60   : > { %v1650_v0 = vmul.f32 %v5646_v47, %v1648_v49 }
 0xd62   : > { %v1651_v16 = vadd.f32 %v1650_v0, %v1645_v29 }
 0xd64   : > { %v1660_v17 = vpop.permute.xlu1 %1659  ;;  %v1657_v60 = vadd.f32 %v1656_v11, %v1651_v16 }
 0xd65   : > { %v1662_v18 = vmul.f32 %v5656_v59, %v1660_v17 }
 0xd67   : > { %v1663_v20 = vadd.f32 %v1662_v18, %v1657_v60 }
 0xd69   : > { %v1664_v21 = vsel %vm749_vm6, %v1663_v20, -inf }
 0xd6a   : > { %1665 = vmax.xlane.f32.xlu1 %v1664_v21 }
 0xd7b   : > { %1745 = vrot.lane.b32.xlu1 %v1737_v35, %s5369_s15 }
 0xd7f   : > { %1740 = vrot.lane.b32.xlu1 %v5877_v42, %s5369_s15 }
 0xdf3   : > { %v1666_v24 = vpop.xlane.xlu1 %1665 }
 0xdf4   : > { %v1667_v36 = vsub.f32 %v1663_v20, %v1666_v24 }
 0xdf6   : > { %v1668_v38 = vmul.f32 1.442695, %v1667_v36 }
 0xdf7   : > { %v1746_v29 = vpop.permute.xlu1 %1745 }
 0xdf8   : > { %5206 = vpow2.f32 %v1668_v38  ;;  %v1754_v0 = vsel %vm608_vm0, %v1746_v29, 0 }
 0xdfb   : > { %v1741_v60 = vpop.permute.xlu1 %1740 }
 0xe05   : > { %v5207_v41 = vpop.eup %5206 }
 0xe06   : > { %v1670_v46 = vsel %vm749_vm6, %v5207_v41, 0.0 }
 0xe07   : > { %1671 = vadd.xlane.f32.xlu0 %v1670_v46  ;;  %v5170_v46 = vld [vmem:[%s6727_s3 + $0x1c] sm:$0x1f]  }
 0xe1d   : > { %1743 = vrot.lane.b32.xlu0 %v1739_v54, %s5369_s15 }
 0xe90   : > { %v1672_v32 = vpop.xlane.xlu0 %1671 }
 0xe91   : > { %5208 = vrcp.f32 %v1672_v32 }
 0xe94   : > { %v1744_v16 = vpop.permute.xlu0 %1743 }
 0xe95   : > { %v1751_v17 = vsel %vm608_vm0, %v1744_v16, 0 }
 0xe9e   : > { %v5209_v53 = vpop.eup %5208 }
 0xe9f   : > { %v1674_v49 = vmul.f32 %v5209_v53, %v5207_v41 }
 0xea1   : > { %v1675_v11 = vpack.c.bf16 %v1674_v49, %v1674_v49 }
 0xea3   : > { %4653 = vmatmul.mubr.msk.bf16.vlgmr.msra.gmra.mxu1 %vm749_vm6, %v1675_v11 }
 0xea4   : > { %4657 = vmatpush3.bf16.xpose.msra.mxu1 %v1754_v0  ;;  %4660 = vmatprep.mubr.msk.bf16.mxu1 %vm5352_vm1, %v5351_v23 }
 0xea5   : > { %4658 = vmatprep.subr.bf16.mxu1 %v5351_v23 }
 0xeac   : > { %4659 = vmatpush3.bf16.xpose.msra.mxu1 %v1751_v17 }
 0xead   : > { %4678 = vmatprep.subr.bf16.mxu1 %v5351_v23 }
 0xeb3   : > { %4661 = vmatmul.mubr.msk.bf16.vlgmr.msra.gmra.mxu1 %vm608_vm0, %v1741_v60 }
 0xeb4   : > { %4680 = vmatprep.mubr.msk.bf16.mxu1 %vm5352_vm1, %v5351_v23 }
 0xf63   : > { %v5947_v18 = vpop.f32.mrf.mxu1 }
 0xf65   : > { %v4654_v20 = vpop.f32.mrf.mxu1 }
 0xf67   : > { %v1720_v21 = vpop.f32.mrf.mxu1 }
 0xf69   : > { %v4655_v35 = vpop.f32.mrf.mxu1 }
 0xf73   : > { %v1790_v24 = vpop.f32.mrf.mxu1 }
 0xf74   : > { %1811 = vperm.xlu0 %4962, %v1790_v24   ;;  %1799 = vperm.xlu1 %4960, %v1790_v24   ;;  %v1796_v53 = vadd.f32 %v1790_v24, %v5911_v9 }
 0xf75   : > { %v4662_v36 = vpop.f32.mrf.mxu1 }
 0xf77   : > { %v1793_v38 = vpop.f32.mrf.mxu1 }
 0xf78   : > { %4965 = vset.pattern.permute.xlu0 %v5358_v2  ;;  %4961 = vset.pattern.permute.xlu1 %v6736_v63 }
 0xf79   : > { %1829 = vperm.xlu0 %4965, %v1790_v24   ;;  %1805 = vperm.xlu1 %4961, %v1790_v24   ;;  %v4663_v41 = vpop.f32.mrf.mxu1 }
 0xf7d   : > { %4968 = vset.pattern.permute.xlu0 %v6740_v4  ;;  %4963 = vset.pattern.permute.xlu1 %v6730_v62 }
 0xf7e   : > { %1847 = vperm.xlu0 %4968, %v1790_v24   ;;  %1817 = vperm.xlu1 %4963, %v1790_v24  }
 0xf82   : > { %4971 = vset.pattern.permute.xlu0 %v6737_v6  ;;  %4964 = vset.pattern.permute.xlu1 %v5357_v1 }
 0xf83   : > { %1865 = vperm.xlu0 %4971, %v1790_v24   ;;  %1823 = vperm.xlu1 %4964, %v1790_v24  }
 0xf87   : > { %4974 = vset.pattern.permute.xlu0 %v6732_v8  ;;  %4966 = vset.pattern.permute.xlu1 %v5359_v3 }
 0xf88   : > { %1883 = vperm.xlu0 %4974, %v1790_v24   ;;  %1835 = vperm.xlu1 %4966, %v1790_v24  }
 0xf8c   : > { %4967 = vset.pattern.permute.xlu1 %v5361_v5  ;;  %1961 = vrot.lane.b32.xlu0 %v5170_v46, %s5370_s23 }
 0xf8d   : > { %1841 = vperm.xlu1 %4967, %v1790_v24   ;;  %4977 = vset.pattern.permute.xlu0 %v5353_v26 }
 0xf90   : > { %1959 = vrot.lane.b32.xlu0 %v5171_v51, %s5370_s23 }
 0xf91   : > { %4969 = vset.pattern.permute.xlu1 %v5363_v7 }
 0xf92   : > { %1853 = vperm.xlu1 %4969, %v1790_v24  }
 0xf96   : > { %4970 = vset.pattern.permute.xlu1 %v6739_v10 }
 0xf97   : > { %1859 = vperm.xlu1 %4970, %v1790_v24  }
 0xf9b   : > { %4972 = vset.pattern.permute.xlu1 %v5367_v12 }
 0xf9c   : > { %1871 = vperm.xlu1 %4972, %v1790_v24  }
 0xfa0   : > { %4973 = vset.pattern.permute.xlu1 %v6734_v13 }
 0xfa1   : > { %1877 = vperm.xlu1 %4973, %v1790_v24  }
 0xfa5   : > { %4975 = vset.pattern.permute.xlu1 %v5354_v27 }
 0xfef   : > { %v1800_v54 = vpop.permute.xlu1 %1799  ;;  %v1812_v11 = vpop.permute.xlu0 %1811 }
 0xff0   : > { %v1802_v32 = vmul.f32 %v5580_v33, %v1800_v54  ;;  %v1814_v17 = vmul.f32 %v5597_v39, %v1812_v11 }
 0xff2   : > { %v1803_v29 = vadd.f32 %v1802_v32, %v1796_v53 }
 0xff4   : > { %v1806_v49 = vpop.permute.xlu1 %1805  ;;  %v1830_v41 = vpop.permute.xlu0 %1829 }
 0xff5   : > { %v1808_v0 = vmul.f32 %v5591_v37, %v1806_v49  ;;  %v1832_v24 = vmul.f32 %v5613_v56, %v1830_v41 }
 0xff7   : > { %v1809_v16 = vadd.f32 %v1808_v0, %v1803_v29 }
 0xff9   : > { %v1818_v60 = vpop.permute.xlu1 %1817  ;;  %v1815_v20 = vadd.f32 %v1814_v17, %v1809_v16  ;;  %v1848_v0 = vpop.permute.xlu0 %1847 }
 0xffa   : > { %v1820_v21 = vmul.f32 %v5602_v45, %v1818_v60  ;;  %v1850_v16 = vmul.f32 %v5628_v19, %v1848_v0 }
 0xffc   : > { %v1821_v36 = vadd.f32 %v1820_v21, %v1815_v20 }
 0xffe   : > { %v1824_v35 = vpop.permute.xlu1 %1823 }
 0xfff   : > { %v1826_v38 = vmul.f32 %v5606_v48, %v1824_v35 }
0x1001   : > { %v1827_v46 = vadd.f32 %v1826_v38, %v1821_v36  ;;  %v1866_v38 = vpop.permute.xlu0 %1865 }
0x1003   : > { %v1836_v51 = vpop.permute.xlu1 %1835  ;;  %v1833_v54 = vadd.f32 %v1832_v24, %v1827_v46  ;;  %v1868_v46 = vmul.f32 %v5643_v43, %v1866_v38 }
0x1004   : > { %v1838_v32 = vmul.f32 %v5616_v61, %v1836_v51 }
0x1006   : > { %v1839_v49 = vadd.f32 %v1838_v32, %v1833_v54  ;;  %v1884_v32 = vpop.permute.xlu0 %1883 }
0x1007   : > { %v1886_v0 = vmul.f32 %v5656_v59, %v1884_v32 }
0x1008   : > { %v1842_v53 = vpop.permute.xlu1 %1841 }
0x1009   : > { %v1844_v29 = vmul.f32 %v5622_v15, %v1842_v53 }
0x100b   : > { %v1845_v11 = vadd.f32 %v1844_v29, %v1839_v49 }
0x100d   : > { %v1854_v17 = vpop.permute.xlu1 %1853  ;;  %v1851_v60 = vadd.f32 %v1850_v16, %v1845_v11 }
0x100e   : > { %v1856_v20 = vmul.f32 %v5631_v22, %v1854_v17 }
0x1010   : > { %v1857_v35 = vadd.f32 %v1856_v20, %v1851_v60  ;;  %v1962_v60 = vpop.permute.xlu0 %1961 }
0x1012   : > { %v1860_v21 = vpop.permute.xlu1 %1859 }
0x1013   : > { %v1862_v36 = vmul.f32 %v5637_v28, %v1860_v21 }
0x1014   : > { %v1960_v20 = vpop.permute.xlu0 %1959 }
0x1015   : > { %v1863_v41 = vadd.f32 %v1862_v36, %v1857_v35  ;;  %v1964_v21 = vsel %vm604_vm2, %v5864_v25, %v1960_v20 }
0x1017   : > { %v1872_v24 = vpop.permute.xlu1 %1871  ;;  %v1869_v51 = vadd.f32 %v1868_v46, %v1863_v41 }
0x1018   : > { %v1874_v54 = vmul.f32 %v5646_v47, %v1872_v24 }
0x101a   : > { %v1875_v49 = vadd.f32 %v1874_v54, %v1869_v51 }
0x101c   : > { %v1878_v53 = vpop.permute.xlu1 %1877 }
0x101d   : > { %v1880_v29 = vmul.f32 %v5653_v55, %v1878_v53 }
0x101f   : > { %v1881_v11 = vadd.f32 %v1880_v29, %v1875_v49 }
0x1021   : > { %v1887_v16 = vadd.f32 %v1886_v0, %v1881_v11 }
0x1023   : > { %v1888_v17 = vsel %vm749_vm6, %v1887_v16, -inf }
0x1024   : > { %1889 = vmax.xlane.f32.xlu1 %v1888_v17 }
0x1035   : > { %1900 = vrot.lane.b32.xlu1 %v5811_v14, %s5369_s15 }
0x1039   : > { %1968 = vrot.lane.b32.xlu1 %v1964_v21, %s5370_s23 }
0x103d   : > { %1965 = vrot.lane.b32.xlu1 %v5877_v42, %s5370_s23 }
0x10ad   : > { %v1890_v35 = vpop.xlane.xlu1 %1889 }
0x10ae   : > { %v1891_v36 = vsub.f32 %v1887_v16, %v1890_v35 }
0x10b0   : > { %v1892_v38 = vmul.f32 1.442695, %v1891_v36 }
0x10b1   : > { %v1901_v41 = vpop.permute.xlu1 %1900 }
0x10b2   : > { %5210 = vpow2.f32 %v1892_v38  ;;  %v1906_v46 = vsel %vm604_vm2, %v1901_v41, 0 }
0x10b3   : > { %4665 = vmatpush3.bf16.msra.mxu0 %v1906_v46 }
0x10b4   : > { %4670 = vmatprep.subr.bf16.mxu0 %v5351_v23 }
0x10b5   : > { %v1969_v11 = vpop.permute.xlu1 %1968 }
0x10b6   : > { %v1976_v16 = vsel %vm608_vm0, %v1969_v11, 0 }
0x10b9   : > { %v1966_v17 = vpop.permute.xlu1 %1965 }
0x10bf   : > { %v5211_v24 = vpop.eup %5210 }
0x10c0   : > { %v1894_v51 = vsel %vm749_vm6, %v5211_v24, 0.0 }
0x10c1   : > { %1895 = vadd.xlane.f32.xlu0 %v1894_v51  ;;  %v5173_v51 = vld [vmem:[%s6727_s3 + $0x24] ss:$0 sps:$4 sm:$0xff]  }
0x10d7   : > { %1970 = vrot.lane.b32.xlu0 %v1962_v60, %s5370_s23 }
0x114a   : > { %v1896_v54 = vpop.xlane.xlu0 %1895 }
0x114b   : > { %5212 = vrcp.f32 %v1896_v54 }
0x114e   : > { %v1971_v53 = vpop.permute.xlu0 %1970 }
0x114f   : > { %v1979_v29 = vsel %vm608_vm0, %v1971_v53, 0 }
0x1158   : > { %v5213_v32 = vpop.eup %5212 }
0x1159   : > { %v1898_v49 = vmul.f32 %v5213_v32, %v5211_v24  ;;  %v5172_v24 = vld [vmem:[%s6727_s3 + $0x28] sm:$0x1f]  }
0x115b   : > { %v1899_v0 = vpack.c.bf16 %v1898_v49, %v1898_v49 }
0x115d   : > { %4667 = vmatmul.mubr.msk.bf16.vlgmr.msra.gmra.mxu0 %vm749_vm6, %v1899_v0 }
0x115e   : > { %4671 = vmatpush3.bf16.xpose.msra.mxu0 %v1979_v29  ;;  %4674 = vmatprep.mubr.msk.bf16.mxu0 %vm5352_vm1, %v5351_v23 }
0x115f   : > { %4672 = vmatprep.subr.bf16.mxu0 %v5351_v23 }
0x1166   : > { %4673 = vmatpush3.bf16.xpose.msra.mxu0 %v1976_v16 }
0x1167   : > { %4692 = vmatprep.subr.bf16.mxu0 %v5351_v23 }
0x116d   : > { %4675 = vmatmul.mubr.msk.bf16.vlgmr.msra.gmra.mxu0 %vm608_vm0, %v1966_v17 }
0x116e   : > { %4694 = vmatprep.mubr.msk.bf16.mxu0 %vm5352_vm1, %v5351_v23 }
0x121d   : > { %v6010_v60 = vpop.f32.mrf.mxu0 }
0x121f   : > { %v4668_v20 = vpop.f32.mrf.mxu0 }
0x1221   : > { %v1945_v21 = vpop.f32.mrf.mxu0 }
0x1223   : > { %v4669_v35 = vpop.f32.mrf.mxu0 }
0x122d   : > { %v2015_v36 = vpop.f32.mrf.mxu0 }
0x122e   : > { %2036 = vperm.xlu0 %4977, %v2015_v36   ;;  %2024 = vperm.xlu1 %4975, %v2015_v36   ;;  %v2021_v53 = vadd.f32 %v2015_v36, %v5911_v9 }
0x122f   : > { %v4676_v38 = vpop.f32.mrf.mxu0 }
0x1231   : > { %v2018_v41 = vpop.f32.mrf.mxu0 }
0x1232   : > { %4980 = vset.pattern.permute.xlu0 %v5358_v2  ;;  %4976 = vset.pattern.permute.xlu1 %v6736_v63 }
0x1233   : > { %2054 = vperm.xlu0 %4980, %v2015_v36   ;;  %2030 = vperm.xlu1 %4976, %v2015_v36   ;;  %v4677_v46 = vpop.f32.mrf.mxu0 }
0x1237   : > { %4983 = vset.pattern.permute.xlu0 %v6740_v4  ;;  %4978 = vset.pattern.permute.xlu1 %v6730_v62 }
0x1238   : > { %2072 = vperm.xlu0 %4983, %v2015_v36   ;;  %2042 = vperm.xlu1 %4978, %v2015_v36  }
0x123c   : > { %4986 = vset.pattern.permute.xlu0 %v6737_v6  ;;  %4979 = vset.pattern.permute.xlu1 %v5357_v1 }
0x123d   : > { %2090 = vperm.xlu0 %4986, %v2015_v36   ;;  %2048 = vperm.xlu1 %4979, %v2015_v36  }
0x1241   : > { %4989 = vset.pattern.permute.xlu0 %v6732_v8  ;;  %4981 = vset.pattern.permute.xlu1 %v5359_v3 }
0x1242   : > { %2108 = vperm.xlu0 %4989, %v2015_v36   ;;  %2060 = vperm.xlu1 %4981, %v2015_v36  }
0x1246   : > { %4982 = vset.pattern.permute.xlu1 %v5361_v5  ;;  %2186 = vrot.lane.b32.xlu0 %v5172_v24, %s5369_s15 }
0x1247   : > { %2066 = vperm.xlu1 %4982, %v2015_v36   ;;  %4992 = vset.pattern.permute.xlu0 %v5353_v26 }
0x124a   : > { %2184 = vrot.lane.b32.xlu0 %v5173_v51, %s5369_s15 }
0x124b   : > { %4984 = vset.pattern.permute.xlu1 %v5363_v7 }
0x124c   : > { %2078 = vperm.xlu1 %4984, %v2015_v36  }
0x1250   : > { %4985 = vset.pattern.permute.xlu1 %v6739_v10 }
0x1251   : > { %2084 = vperm.xlu1 %4985, %v2015_v36  }
0x1255   : > { %4987 = vset.pattern.permute.xlu1 %v5367_v12 }
0x1256   : > { %2096 = vperm.xlu1 %4987, %v2015_v36  }
0x125a   : > { %4988 = vset.pattern.permute.xlu1 %v6734_v13 }
0x125b   : > { %2102 = vperm.xlu1 %4988, %v2015_v36  }
0x125f   : > { %4990 = vset.pattern.permute.xlu1 %v5354_v27 }
0x12a9   : > { %v2025_v54 = vpop.permute.xlu1 %2024  ;;  %v2037_v11 = vpop.permute.xlu0 %2036 }
0x12aa   : > { %v2027_v32 = vmul.f32 %v5580_v33, %v2025_v54  ;;  %v2039_v17 = vmul.f32 %v5597_v39, %v2037_v11 }
0x12ac   : > { %v2028_v29 = vadd.f32 %v2027_v32, %v2021_v53 }
0x12ae   : > { %v2031_v49 = vpop.permute.xlu1 %2030  ;;  %v2055_v24 = vpop.permute.xlu0 %2054 }
0x12af   : > { %v2033_v0 = vmul.f32 %v5591_v37, %v2031_v49  ;;  %v2057_v36 = vmul.f32 %v5613_v56, %v2055_v24 }
0x12b1   : > { %v2034_v16 = vadd.f32 %v2033_v0, %v2028_v29 }
0x12b3   : > { %v2043_v20 = vpop.permute.xlu1 %2042  ;;  %v2040_v21 = vadd.f32 %v2039_v17, %v2034_v16  ;;  %v2073_v11 = vpop.permute.xlu0 %2072 }
0x12b4   : > { %v2045_v35 = vmul.f32 %v5602_v45, %v2043_v20  ;;  %v2075_v17 = vmul.f32 %v5628_v19, %v2073_v11 }
0x12b6   : > { %v2046_v41 = vadd.f32 %v2045_v35, %v2040_v21 }
0x12b8   : > { %v2049_v38 = vpop.permute.xlu1 %2048  ;;  %v2091_v24 = vpop.permute.xlu0 %2090 }
0x12b9   : > { %v2051_v46 = vmul.f32 %v5606_v48, %v2049_v38 }
0x12bb   : > { %v2052_v51 = vadd.f32 %v2051_v46, %v2046_v41 }
0x12bd   : > { %v2061_v54 = vpop.permute.xlu1 %2060  ;;  %v2058_v32 = vadd.f32 %v2057_v36, %v2052_v51  ;;  %v2093_v36 = vmul.f32 %v5643_v43, %v2091_v24 }
0x12be   : > { %v2063_v53 = vmul.f32 %v5616_v61, %v2061_v54 }
0x12c0   : > { %v2064_v29 = vadd.f32 %v2063_v53, %v2058_v32 }
0x12c2   : > { %v2067_v49 = vpop.permute.xlu1 %2066 }
0x12c3   : > { %v2069_v0 = vmul.f32 %v5622_v15, %v2067_v49  ;;  %v2109_v49 = vpop.permute.xlu0 %2108 }
0x12c5   : > { %v2070_v16 = vadd.f32 %v2069_v0, %v2064_v29 }
0x12c7   : > { %v2079_v20 = vpop.permute.xlu1 %2078  ;;  %v2076_v21 = vadd.f32 %v2075_v17, %v2070_v16  ;;  %v2111_v16 = vmul.f32 %v5656_v59, %v2109_v49 }
0x12c8   : > { %v2081_v35 = vmul.f32 %v5631_v22, %v2079_v20 }
0x12ca   : > { %v2082_v41 = vadd.f32 %v2081_v35, %v2076_v21  ;;  %v2187_v35 = vpop.permute.xlu0 %2186 }
0x12cc   : > { %v2085_v38 = vpop.permute.xlu1 %2084 }
0x12cd   : > { %v2087_v46 = vmul.f32 %v5637_v28, %v2085_v38 }
0x12ce   : > { %v2185_v38 = vpop.permute.xlu0 %2184 }
0x12cf   : > { %v2088_v51 = vadd.f32 %v2087_v46, %v2082_v41  ;;  %v2189_v41 = vsel %vm604_vm2, %v5864_v25, %v2185_v38 }
0x12d1   : > { %v2097_v54 = vpop.permute.xlu1 %2096  ;;  %v2094_v32 = vadd.f32 %v2093_v36, %v2088_v51 }
0x12d2   : > { %v2099_v53 = vmul.f32 %v5646_v47, %v2097_v54 }
0x12d4   : > { %v2100_v0 = vadd.f32 %v2099_v53, %v2094_v32 }
0x12d6   : > { %v2103_v29 = vpop.permute.xlu1 %2102 }
0x12d7   : > { %v2105_v11 = vmul.f32 %v5653_v55, %v2103_v29 }
0x12d9   : > { %v2106_v17 = vadd.f32 %v2105_v11, %v2100_v0 }
0x12db   : > { %v2112_v20 = vadd.f32 %v2111_v16, %v2106_v17 }
0x12dd   : > { %v2113_v21 = vsel %vm749_vm6, %v2112_v20, -inf }
0x12de   : > { %2114 = vmax.xlane.f32.xlu1 %v2113_v21  ;;  %v2586_v21 = vsel %vm604_vm2, %v5666_v40, 0 }
0x12ef   : > { %2125 = vrot.lane.b32.xlu1 %v5811_v14, %s5370_s23 }
0x12f3   : > { %2193 = vrot.lane.b32.xlu1 %v2189_v41, %s5366_s10 }
0x12f7   : > { %2190 = vrot.lane.b32.xlu1 %v5877_v42, %s5366_s10 }
0x1367   : > { %v2115_v46 = vpop.xlane.xlu1 %2114 }
0x1368   : > { %v2116_v24 = vsub.f32 %v2112_v20, %v2115_v46 }
0x136a   : > { %v2117_v51 = vmul.f32 1.442695, %v2116_v24 }
0x136b   : > { %v2126_v36 = vpop.permute.xlu1 %2125 }
0x136c   : > { %5214 = vpow2.f32 %v2117_v51  ;;  %v2131_v54 = vsel %vm604_vm2, %v2126_v36, 0 }
0x136d   : > { %4679 = vmatpush3.bf16.msra.mxu1 %v2131_v54 }
0x136e   : > { %4684 = vmatprep.subr.bf16.mxu1 %v5351_v23 }
0x136f   : > { %v2194_v16 = vpop.permute.xlu1 %2193 }
0x1370   : > { %v2201_v17 = vsel %vm608_vm0, %v2194_v16, 0 }
0x1373   : > { %v2191_v20 = vpop.permute.xlu1 %2190 }
0x1379   : > { %v5215_v32 = vpop.eup %5214 }
0x137a   : > { %v2119_v53 = vsel %vm749_vm6, %v5215_v32, 0.0 }
0x137b   : > { %2120 = vadd.xlane.f32.xlu0 %v2119_v53 }
0x1391   : > { %2195 = vrot.lane.b32.xlu0 %v2187_v35, %s5366_s10 }
0x1404   : > { %v2121_v25 = vpop.xlane.xlu0 %2120 }
0x1405   : > { %5216 = vrcp.f32 %v2121_v25 }
0x1408   : > { %v2196_v42 = vpop.permute.xlu0 %2195 }
0x1409   : > { %v2204_v0 = vsel %vm608_vm0, %v2196_v42, 0 }
0x1412   : > { %v5217_v49 = vpop.eup %5216 }
0x1413   : > { %v2123_v29 = vmul.f32 %v5217_v49, %v5215_v32 }
0x1415   : > { %v2124_v11 = vpack.c.bf16 %v2123_v29, %v2123_v29 }
0x1417   : > { %4681 = vmatmul.mubr.msk.bf16.vlgmr.msra.gmra.mxu1 %vm749_vm6, %v2124_v11 }
0x1418   : > { %4685 = vmatpush3.bf16.xpose.msra.mxu1 %v2204_v0  ;;  %4688 = vmatprep.mubr.msk.bf16.mxu1 %vm5352_vm1, %v5351_v23 }
0x1419   : > { %4686 = vmatprep.subr.bf16.mxu1 %v5351_v23 }
0x1420   : > { %4687 = vmatpush3.bf16.xpose.msra.mxu1 %v2201_v17 }
0x1421   : > { %4706 = vmatprep.subr.bf16.mxu1 %v5351_v23 }
0x1427   : > { %4689 = vmatmul.mubr.msk.bf16.vlgmr.msra.gmra.mxu1 %vm608_vm0, %v2191_v20 }
0x1428   : > { %4707 = vmatpush3.bf16.msra.mxu1 %v2586_v21  ;;  %4708 = vmatprep.mubr.msk.bf16.mxu1 %vm5352_vm1, %v5351_v23 }
0x1429   : > { %4712 = vmatprep.subr.bf16.mxu1 %v5351_v23 }
0x14d7   : > { %v6076_v35 = vpop.f32.mrf.mxu1 }
0x14d9   : > { %v4682_v38 = vpop.f32.mrf.mxu1 }
0x14db   : > { %v2170_v41 = vpop.f32.mrf.mxu1 }
0x14dd   : > { %v4683_v46 = vpop.f32.mrf.mxu1 }
0x14e7   : > { %v2240_v24 = vpop.f32.mrf.mxu1 }
0x14e8   : > { %2261 = vperm.xlu0 %4992, %v2240_v24   ;;  %2249 = vperm.xlu1 %4990, %v2240_v24   ;;  %v2246_v25 = vadd.f32 %v2240_v24, %v5911_v9 }
0x14e9   : > { %v4690_v51 = vpop.f32.mrf.mxu1 }
0x14eb   : > { %v2243_v36 = vpop.f32.mrf.mxu1 }
0x14ec   : > { %4995 = vset.pattern.permute.xlu0 %v5358_v2  ;;  %4991 = vset.pattern.permute.xlu1 %v6736_v63 }
0x14ed   : > { %2279 = vperm.xlu0 %4995, %v2240_v24   ;;  %2255 = vperm.xlu1 %4991, %v2240_v24   ;;  %v4691_v54 = vpop.f32.mrf.mxu1 }
0x14f1   : > { %4998 = vset.pattern.permute.xlu0 %v6740_v4  ;;  %4993 = vset.pattern.permute.xlu1 %v6730_v62 }
0x14f2   : > { %2297 = vperm.xlu0 %4998, %v2240_v24   ;;  %2267 = vperm.xlu1 %4993, %v2240_v24  }
0x14f6   : > { %5001 = vset.pattern.permute.xlu0 %v6737_v6  ;;  %4994 = vset.pattern.permute.xlu1 %v5357_v1 }
0x14f7   : > { %2315 = vperm.xlu0 %5001, %v2240_v24   ;;  %2273 = vperm.xlu1 %4994, %v2240_v24  }
0x14fb   : > { %5004 = vset.pattern.permute.xlu0 %v6732_v8  ;;  %4996 = vset.pattern.permute.xlu1 %v5359_v3 }
0x14fc   : > { %2333 = vperm.xlu0 %5004, %v2240_v24   ;;  %2285 = vperm.xlu1 %4996, %v2240_v24  }
0x1500   : > { %4997 = vset.pattern.permute.xlu1 %v5361_v5  ;;  %5005 = vset.pattern.permute.xlu0 %v5354_v27 }
0x1501   : > { %2291 = vperm.xlu1 %4997, %v2240_v24  }
0x1505   : > { %4999 = vset.pattern.permute.xlu1 %v5363_v7 }
0x1506   : > { %2303 = vperm.xlu1 %4999, %v2240_v24  }
0x150a   : > { %5000 = vset.pattern.permute.xlu1 %v6739_v10 }
0x150b   : > { %2309 = vperm.xlu1 %5000, %v2240_v24  }
0x150f   : > { %5002 = vset.pattern.permute.xlu1 %v5367_v12 }
0x1510   : > { %2321 = vperm.xlu1 %5002, %v2240_v24  }
0x1514   : > { %5003 = vset.pattern.permute.xlu1 %v6734_v13 }
0x1515   : > { %2327 = vperm.xlu1 %5003, %v2240_v24  }
0x1519   : > { %5006 = vset.pattern.permute.xlu1 %v6736_v63 }
0x1563   : > { %v2250_v32 = vpop.permute.xlu1 %2249  ;;  %v2262_v0 = vpop.permute.xlu0 %2261 }
0x1564   : > { %v2252_v53 = vmul.f32 %v5580_v33, %v2250_v32  ;;  %v2264_v16 = vmul.f32 %v5597_v39, %v2262_v0 }
0x1566   : > { %v2253_v42 = vadd.f32 %v2252_v53, %v2246_v25 }
0x1568   : > { %v2256_v49 = vpop.permute.xlu1 %2255  ;;  %v2280_v51 = vpop.permute.xlu0 %2279 }
0x1569   : > { %v2258_v29 = vmul.f32 %v5591_v37, %v2256_v49  ;;  %v2282_v24 = vmul.f32 %v5613_v56, %v2280_v51 }
0x156b   : > { %v2259_v11 = vadd.f32 %v2258_v29, %v2253_v42 }
0x156d   : > { %v2268_v17 = vpop.permute.xlu1 %2267  ;;  %v2265_v20 = vadd.f32 %v2264_v16, %v2259_v11  ;;  %v2298_v29 = vpop.permute.xlu0 %2297 }
0x156e   : > { %v2270_v21 = vmul.f32 %v5602_v45, %v2268_v17  ;;  %v2300_v11 = vmul.f32 %v5628_v19, %v2298_v29 }
0x1570   : > { %v2271_v41 = vadd.f32 %v2270_v21, %v2265_v20 }
0x1572   : > { %v2274_v38 = vpop.permute.xlu1 %2273 }
0x1573   : > { %v2276_v46 = vmul.f32 %v5606_v48, %v2274_v38 }
0x1575   : > { %v2277_v36 = vadd.f32 %v2276_v46, %v2271_v41  ;;  %v2316_v46 = vpop.permute.xlu0 %2315 }
0x1577   : > { %v2286_v54 = vpop.permute.xlu1 %2285  ;;  %v2283_v32 = vadd.f32 %v2282_v24, %v2277_v36  ;;  %v2318_v36 = vmul.f32 %v5643_v43, %v2316_v46 }
0x1578   : > { %v2288_v53 = vmul.f32 %v5616_v61, %v2286_v54 }
0x157a   : > { %v2289_v49 = vadd.f32 %v2288_v53, %v2283_v32  ;;  %v2334_v53 = vpop.permute.xlu0 %2333 }
0x157b   : > { %v2336_v29 = vmul.f32 %v5656_v59, %v2334_v53  ;;  %v476_v53 = vadd.f32 %v5528_v58, %v5503_v34 }
0x157c   : > { %v2292_v25 = vpop.permute.xlu1 %2291 }
0x157d   : > { %v2294_v42 = vmul.f32 %v5622_v15, %v2292_v25 }
0x157f   : > { %v2295_v0 = vadd.f32 %v2294_v42, %v2289_v49 }
0x1581   : > { %v2304_v16 = vpop.permute.xlu1 %2303  ;;  %v2301_v17 = vadd.f32 %v2300_v11, %v2295_v0 }
0x1582   : > { %v2306_v20 = vmul.f32 %v5631_v22, %v2304_v16 }
0x1584   : > { %v2307_v38 = vadd.f32 %v2306_v20, %v2301_v17 }
0x1586   : > { %v2310_v21 = vpop.permute.xlu1 %2309 }
0x1587   : > { %v2312_v41 = vmul.f32 %v5637_v28, %v2310_v21 }
0x1589   : > { %v2313_v51 = vadd.f32 %v2312_v41, %v2307_v38 }
0x158b   : > { %v2322_v24 = vpop.permute.xlu1 %2321  ;;  %v2319_v54 = vadd.f32 %v2318_v36, %v2313_v51 }
0x158c   : > { %v2324_v32 = vmul.f32 %v5646_v47, %v2322_v24 }
0x158e   : > { %v2325_v49 = vadd.f32 %v2324_v32, %v2319_v54  ;;  %v472_v32 = vadd.f32 %v5524_v52, %v5503_v34 }
0x1590   : > { %v2328_v25 = vpop.permute.xlu1 %2327 }
0x1591   : > { %v2330_v42 = vmul.f32 %v5653_v55, %v2328_v25 }
0x1593   : > { %v2331_v0 = vadd.f32 %v2330_v42, %v2325_v49  ;;  %v6124_v42 = vpack.c.bf16 %v476_v53, %v472_v32 }
0x1595   : > { %v2337_v11 = vadd.f32 %v2336_v29, %v2331_v0  ;;  %v5175_v29 = vld [vmem:[%s6727_s3] ss:$0 sps:$4 sm:$0xff]  }
0x1596   : > { %v2429_v34 = vsel %vm604_vm2, %v6124_v42, %v5175_v29 }
0x1597   : > { %v2338_v16 = vsel %vm749_vm6, %v2337_v11, -inf  ;;  %v2433_v52 = vsel %vm608_vm0, %v2429_v34, 0 }
0x1598   : > { %2339 = vmax.xlane.f32.xlu1 %v2338_v16 }
0x15a9   : > { %2350 = vrot.lane.b32.xlu1 %v5811_v14, %s5366_s10  ;;  %v5174_v14 = vld [vmem:[%s6727_s3 + $0x4] sm:$0x1f]  }
0x15aa   : > { %v2436_v49 = vsel %vm608_vm0, %v5174_v14, 0 }
0x1621   : > { %v2340_v17 = vpop.xlane.xlu1 %2339 }
0x1622   : > { %v2341_v20 = vsub.f32 %v2337_v11, %v2340_v17 }
0x1624   : > { %v2342_v21 = vmul.f32 1.442695, %v2341_v20 }
0x1625   : > { %v2351_v38 = vpop.permute.xlu1 %2350 }
0x1626   : > { %5218 = vpow2.f32 %v2342_v21  ;;  %v2356_v41 = vsel %vm604_vm2, %v2351_v38, 0 }
0x1627   : > { %4693 = vmatpush3.bf16.msra.mxu0 %v2356_v41  ;;  %v5176_v41 = vld [vmem:[%s6727_s3 + $0x10] sm:$0x1f]  }
0x1628   : > { %4698 = vmatprep.subr.bf16.mxu0 %v5351_v23 }
0x1633   : > { %v5219_v46 = vpop.eup %5218 }
0x1634   : > { %v2344_v51 = vsel %vm749_vm6, %v5219_v46, 0.0 }
0x1635   : > { %2345 = vadd.xlane.f32.xlu0 %v2344_v51 }
0x16be   : > { %v2346_v36 = vpop.xlane.xlu0 %2345 }
0x16bf   : > { %5220 = vrcp.f32 %v2346_v36 }
0x16cc   : > { %v5221_v24 = vpop.eup %5220 }
0x16cd   : > { %v2348_v54 = vmul.f32 %v5221_v24, %v5219_v46  ;;  %v5177_v46 = vld [vmem:[%s6727_s3 + $0xc] ss:$0 sps:$4 sm:$0xff]  }
0x16cf   : > { %v2349_v25 = vpack.c.bf16 %v2348_v54, %v2348_v54 }
0x16d1   : > { %4695 = vmatmul.mubr.msk.bf16.vlgmr.msra.gmra.mxu0 %vm749_vm6, %v2349_v25 }
0x16d2   : > { %4699 = vmatpush3.bf16.xpose.msra.mxu0 %v2436_v49  ;;  %4702 = vmatprep.mubr.msk.bf16.mxu0 %vm5352_vm1, %v5351_v23 }
0x16d3   : > { %4700 = vmatprep.subr.bf16.mxu0 %v5351_v23 }
0x16da   : > { %4701 = vmatpush3.bf16.xpose.msra.mxu0 %v2433_v52 }
0x16db   : > { %4720 = vmatprep.subr.bf16.mxu0 %v5351_v23 }
0x16e1   : > { %4703 = vmatmul.mubr.msk.bf16.vlgmr.msra.gmra.mxu0 %vm608_vm0, %v5526_v57 }
0x16e2   : > { %4722 = vmatprep.mubr.msk.bf16.mxu0 %vm5352_vm1, %v5351_v23 }
0x1791   : > { %v6140_v58 = vpop.f32.mrf.mxu0 }
0x1793   : > { %v4696_v0 = vpop.f32.mrf.mxu0 }
0x1795   : > { %v2395_v11 = vpop.f32.mrf.mxu0 }
0x1797   : > { %v4697_v16 = vpop.f32.mrf.mxu0 }
0x17a1   : > { %v2472_v17 = vpop.f32.mrf.mxu0 }
0x17a2   : > { %2487 = vperm.xlu1 %5006, %v2472_v17   ;;  %2481 = vperm.xlu0 %5005, %v2472_v17   ;;  %v2478_v53 = vadd.f32 %v2472_v17, %v5911_v9 }
0x17a3   : > { %v4704_v20 = vpop.f32.mrf.mxu0 }
0x17a5   : > { %v2475_v21 = vpop.f32.mrf.mxu0 }
0x17a6   : > { %5007 = vset.pattern.permute.xlu1 %v5353_v26  ;;  %5014 = vset.pattern.permute.xlu0 %v5363_v7 }
0x17a7   : > { %2493 = vperm.xlu1 %5007, %v2472_v17   ;;  %2535 = vperm.xlu0 %5014, %v2472_v17   ;;  %v4705_v38 = vpop.f32.mrf.mxu0 }
0x17ab   : > { %5008 = vset.pattern.permute.xlu1 %v6730_v62  ;;  %5017 = vset.pattern.permute.xlu0 %v5367_v12 }
0x17ac   : > { %2499 = vperm.xlu1 %5008, %v2472_v17   ;;  %2553 = vperm.xlu0 %5017, %v2472_v17  }
0x17b0   : > { %5009 = vset.pattern.permute.xlu1 %v5357_v1  ;;  %5020 = vset.pattern.permute.xlu0 %v5354_v27 }
0x17b1   : > { %2505 = vperm.xlu1 %5009, %v2472_v17  }
0x17b5   : > { %5010 = vset.pattern.permute.xlu1 %v5358_v2 }
0x17b6   : > { %2511 = vperm.xlu1 %5010, %v2472_v17  }
0x17ba   : > { %5011 = vset.pattern.permute.xlu1 %v5359_v3 }
0x17bb   : > { %2517 = vperm.xlu1 %5011, %v2472_v17  }
0x17bf   : > { %5012 = vset.pattern.permute.xlu1 %v5361_v5 }
0x17c0   : > { %2523 = vperm.xlu1 %5012, %v2472_v17  }
0x17c4   : > { %5013 = vset.pattern.permute.xlu1 %v6740_v4 }
0x17c5   : > { %2529 = vperm.xlu1 %5013, %v2472_v17  }
0x17c9   : > { %5015 = vset.pattern.permute.xlu1 %v6739_v10 }
0x17ca   : > { %2541 = vperm.xlu1 %5015, %v2472_v17  }
0x17ce   : > { %5016 = vset.pattern.permute.xlu1 %v6737_v6 }
0x17cf   : > { %2547 = vperm.xlu1 %5016, %v2472_v17  }
0x17d3   : > { %5018 = vset.pattern.permute.xlu1 %v6734_v13 }
0x17d4   : > { %2559 = vperm.xlu1 %5018, %v2472_v17  }
0x17d8   : > { %5019 = vset.pattern.permute.xlu1 %v6732_v8 }
0x17d9   : > { %2565 = vperm.xlu1 %5019, %v2472_v17  }
0x17dd   : > { %2641 = vrot.lane.b32.xlu1 %v5176_v41, %s5366_s10 }
0x17de   : > { %5021 = vset.pattern.permute.xlu1 %v6736_v63 }
0x17e1   : > { %2639 = vrot.lane.b32.xlu1 %v5177_v46, %s5366_s10 }
0x181d   : > { %v2488_v51 = vpop.permute.xlu1 %2487  ;;  %v2482_v24 = vpop.permute.xlu0 %2481 }
0x181e   : > { %v2484_v54 = vmul.f32 %v5580_v33, %v2482_v24  ;;  %v2490_v49 = vmul.f32 %v5591_v37, %v2488_v51 }
0x1820   : > { %v2485_v25 = vadd.f32 %v2484_v54, %v2478_v53 }
0x1822   : > { %v2494_v36 = vpop.permute.xlu1 %2493  ;;  %v2491_v34 = vadd.f32 %v2490_v49, %v2485_v25 }
0x1823   : > { %v2496_v52 = vmul.f32 %v5597_v39, %v2494_v36 }
0x1825   : > { %v2497_v16 = vadd.f32 %v2496_v52, %v2491_v34 }
0x1827   : > { %v2500_v14 = vpop.permute.xlu1 %2499 }
0x1828   : > { %v2502_v0 = vmul.f32 %v5602_v45, %v2500_v14  ;;  %v2536_v14 = vpop.permute.xlu0 %2535 }
0x1829   : > { %v2538_v49 = vmul.f32 %v5631_v22, %v2536_v14 }
0x182a   : > { %v2503_v21 = vadd.f32 %v2502_v0, %v2497_v16 }
0x182c   : > { %v2506_v32 = vpop.permute.xlu1 %2505  ;;  %v2554_v16 = vpop.permute.xlu0 %2553 }
0x182d   : > { %v2508_v20 = vmul.f32 %v5606_v48, %v2506_v32 }
0x182f   : > { %v2509_v41 = vadd.f32 %v2508_v20, %v2503_v21  ;;  %v2556_v21 = vmul.f32 %v5646_v47, %v2554_v16 }
0x1831   : > { %v2512_v29 = vpop.permute.xlu1 %2511 }
0x1832   : > { %v2514_v38 = vmul.f32 %v5613_v56, %v2512_v29 }
0x1834   : > { %v2515_v17 = vadd.f32 %v2514_v38, %v2509_v41 }
0x1836   : > { %v2518_v11 = vpop.permute.xlu1 %2517 }
0x1837   : > { %v2520_v46 = vmul.f32 %v5616_v61, %v2518_v11 }
0x1839   : > { %v2521_v24 = vadd.f32 %v2520_v46, %v2515_v17 }
0x183b   : > { %v2524_v9 = vpop.permute.xlu1 %2523 }
0x183c   : > { %v2526_v51 = vmul.f32 %v5622_v15, %v2524_v9 }
0x183e   : > { %v2527_v53 = vadd.f32 %v2526_v51, %v2521_v24 }
0x1840   : > { %v2530_v54 = vpop.permute.xlu1 %2529 }
0x1841   : > { %v2532_v36 = vmul.f32 %v5628_v19, %v2530_v54 }
0x1843   : > { %v2533_v25 = vadd.f32 %v2532_v36, %v2527_v53 }
0x1845   : > { %v2542_v32 = vpop.permute.xlu1 %2541  ;;  %v2539_v34 = vadd.f32 %v2538_v49, %v2533_v25 }
0x1846   : > { %v2544_v29 = vmul.f32 %v5637_v28, %v2542_v32 }
0x1848   : > { %v2545_v0 = vadd.f32 %v2544_v29, %v2539_v34 }
0x184a   : > { %v2548_v52 = vpop.permute.xlu1 %2547 }
0x184b   : > { %v2550_v11 = vmul.f32 %v5643_v43, %v2548_v52 }
0x184d   : > { %v2551_v20 = vadd.f32 %v2550_v11, %v2545_v0 }
0x184f   : > { %v2560_v38 = vpop.permute.xlu1 %2559  ;;  %v2557_v41 = vadd.f32 %v2556_v21, %v2551_v20 }
0x1850   : > { %v2562_v46 = vmul.f32 %v5653_v55, %v2560_v38 }
0x1852   : > { %v2563_v17 = vadd.f32 %v2562_v46, %v2557_v41 }
0x1854   : > { %v2566_v9 = vpop.permute.xlu1 %2565 }
0x1855   : > { %v2568_v51 = vmul.f32 %v5656_v59, %v2566_v9 }
0x1857   : > { %v2569_v24 = vadd.f32 %v2568_v51, %v2563_v17 }
0x1858   : > { %v2642_v53 = vpop.permute.xlu1 %2641 }
0x1859   : > { %v2570_v54 = vsel %vm749_vm6, %v2569_v24, -inf }
0x185a   : > { %2571 = vmax.xlane.f32.xlu0 %v2570_v54 }
0x185c   : > { %v2640_v34 = vpop.permute.xlu1 %2639 }
0x185d   : > { %v2644_v29 = vsel %vm604_vm2, %v6124_v42, %v2640_v34 }
0x1870   : > { %2651 = vrot.lane.b32.xlu0 %v2642_v53, %s5369_s15 }
0x1874   : > { %2646 = vrot.lane.b32.xlu0 %v5526_v57, %s5369_s15 }
0x18e3   : > { %v2572_v36 = vpop.xlane.xlu0 %2571 }
0x18e4   : > { %v2573_v14 = vsub.f32 %v2569_v24, %v2572_v36 }
0x18e6   : > { %v2574_v25 = vmul.f32 1.442695, %v2573_v14 }
0x18e7   : > { %v2652_v16 = vpop.permute.xlu0 %2651 }
0x18e8   : > { %5222 = vpow2.f32 %v2574_v25  ;;  %v2660_v20 = vsel %vm608_vm0, %v2652_v16, 0  ;;  %v5178_v25 = vld [vmem:[%s6727_s3 + $0x1c] sm:$0x1f]  }
0x18eb   : > { %v2647_v46 = vpop.permute.xlu0 %2646 }
0x18f5   : > { %v5223_v49 = vpop.eup %5222 }
0x18f6   : > { %v2576_v32 = vsel %vm749_vm6, %v5223_v49, 0.0 }
0x18f7   : > { %2577 = vadd.xlane.f32.xlu1 %v2576_v32 }
0x1908   : > { %2649 = vrot.lane.b32.xlu1 %v2644_v29, %s5369_s15  ;;  %v6227_v29 = vld [vmem:[%s6728_s4] sm:$0xff] }
0x1980   : > { %v2578_v52 = vpop.xlane.xlu1 %2577 }
0x1981   : > { %5224 = vrcp.f32 %v2578_v52 }
0x1984   : > { %v2650_v38 = vpop.permute.xlu1 %2649 }
0x1985   : > { %v2657_v41 = vsel %vm608_vm0, %v2650_v38, 0 }
0x198e   : > { %v5225_v0 = vpop.eup %5224 }
0x198f   : > { %v2580_v11 = vmul.f32 %v5225_v0, %v5223_v49  ;;  %v5179_v49 = vld [vmem:[%s6727_s3 + $0x18] ss:$0 sps:$4 sm:$0xff]  }
0x1991   : > { %v2581_v21 = vpack.c.bf16 %v2580_v11, %v2580_v11 }
0x1993   : > { %4709 = vmatmul.mubr.msk.bf16.vlgmr.msra.gmra.mxu1 %vm749_vm6, %v2581_v21 }
0x1994   : > { %4713 = vmatpush3.bf16.xpose.msra.mxu1 %v2660_v20  ;;  %4716 = vmatprep.mubr.msk.bf16.mxu1 %vm5352_vm1, %v5351_v23 }
0x1995   : > { %4714 = vmatprep.subr.bf16.mxu1 %v5351_v23 }
0x199c   : > { %4715 = vmatpush3.bf16.xpose.msra.mxu1 %v2657_v41 }
0x199d   : > { %4734 = vmatprep.subr.bf16.mxu1 %v5351_v23 }
0x19a3   : > { %4717 = vmatmul.mubr.msk.bf16.vlgmr.msra.gmra.mxu1 %vm608_vm0, %v2647_v46 }
0x19a4   : > { %4736 = vmatprep.mubr.msk.bf16.mxu1 %vm5352_vm1, %v5351_v23 }
0x1a53   : > { %v6199_v9 = vpop.f32.mrf.mxu1 }
0x1a55   : > { %v4710_v17 = vpop.f32.mrf.mxu1 }
0x1a57   : > { %v2625_v51 = vpop.f32.mrf.mxu1 }
0x1a59   : > { %v4711_v24 = vpop.f32.mrf.mxu1 }
0x1a63   : > { %v2696_v54 = vpop.f32.mrf.mxu1 }
0x1a64   : > { %2711 = vperm.xlu1 %5021, %v2696_v54   ;;  %2705 = vperm.xlu0 %5020, %v2696_v54   ;;  %v2702_v52 = vadd.f32 %v6227_v29, %v2696_v54 }
0x1a65   : > { %v4718_v53 = vpop.f32.mrf.mxu1 }
0x1a67   : > { %v2699_v36 = vpop.f32.mrf.mxu1 }
0x1a68   : > { %5023 = vset.pattern.permute.xlu1 %v6730_v62  ;;  %5022 = vset.pattern.permute.xlu0 %v5353_v26 }
0x1a69   : > { %2723 = vperm.xlu1 %5023, %v2696_v54   ;;  %2717 = vperm.xlu0 %5022, %v2696_v54   ;;  %v4719_v14 = vpop.f32.mrf.mxu1 }
0x1a6d   : > { %5024 = vset.pattern.permute.xlu1 %v5357_v1  ;;  %5025 = vset.pattern.permute.xlu0 %v5358_v2 }
0x1a6e   : > { %2729 = vperm.xlu1 %5024, %v2696_v54   ;;  %2735 = vperm.xlu0 %5025, %v2696_v54  }
0x1a72   : > { %5026 = vset.pattern.permute.xlu1 %v5359_v3  ;;  %5028 = vset.pattern.permute.xlu0 %v6740_v4 }
0x1a73   : > { %2741 = vperm.xlu1 %5026, %v2696_v54   ;;  %2753 = vperm.xlu0 %5028, %v2696_v54  }
0x1a77   : > { %5027 = vset.pattern.permute.xlu1 %v5361_v5  ;;  %5031 = vset.pattern.permute.xlu0 %v6737_v6 }
0x1a78   : > { %2747 = vperm.xlu1 %5027, %v2696_v54   ;;  %2771 = vperm.xlu0 %5031, %v2696_v54  }
0x1a7c   : > { %5029 = vset.pattern.permute.xlu1 %v5363_v7  ;;  %5034 = vset.pattern.permute.xlu0 %v6732_v8 }
0x1a7d   : > { %2759 = vperm.xlu1 %5029, %v2696_v54   ;;  %2789 = vperm.xlu0 %5034, %v2696_v54  }
0x1a81   : > { %5030 = vset.pattern.permute.xlu1 %v6739_v10  ;;  %2868 = vrot.lane.b32.xlu0 %v5178_v25, %s5370_s23 }
0x1a82   : > { %2765 = vperm.xlu1 %5030, %v2696_v54   ;;  %5037 = vset.pattern.permute.xlu0 %v5353_v26 }
0x1a85   : > { %2866 = vrot.lane.b32.xlu0 %v5179_v49, %s5370_s23 }
0x1a86   : > { %5032 = vset.pattern.permute.xlu1 %v5367_v12 }
0x1a87   : > { %2777 = vperm.xlu1 %5032, %v2696_v54  }
0x1a8b   : > { %5033 = vset.pattern.permute.xlu1 %v6734_v13 }
0x1a8c   : > { %2783 = vperm.xlu1 %5033, %v2696_v54  }
0x1a90   : > { %5035 = vset.pattern.permute.xlu1 %v5354_v27 }
0x1adf   : > { %v2712_v32 = vpop.permute.xlu1 %2711  ;;  %v2706_v34 = vpop.permute.xlu0 %2705 }
0x1ae0   : > { %v2708_v0 = vmul.f32 %v5580_v33, %v2706_v34  ;;  %v2714_v11 = vmul.f32 %v5591_v37, %v2712_v32 }
0x1ae2   : > { %v2709_v16 = vadd.f32 %v2708_v0, %v2702_v52 }
0x1ae4   : > { %v2724_v20 = vpop.permute.xlu1 %2723  ;;  %v2718_v21 = vpop.permute.xlu0 %2717  ;;  %v2715_v38 = vadd.f32 %v2714_v11, %v2709_v16 }
0x1ae5   : > { %v2720_v41 = vmul.f32 %v5597_v39, %v2718_v21  ;;  %v2726_v46 = vmul.f32 %v5602_v45, %v2724_v20 }
0x1ae7   : > { %v2721_v17 = vadd.f32 %v2720_v41, %v2715_v38 }
0x1ae9   : > { %v2730_v51 = vpop.permute.xlu1 %2729  ;;  %v2727_v24 = vadd.f32 %v2726_v46, %v2721_v17  ;;  %v2736_v36 = vpop.permute.xlu0 %2735 }
0x1aea   : > { %v2732_v53 = vmul.f32 %v5606_v48, %v2730_v51  ;;  %v2738_v54 = vmul.f32 %v5613_v56, %v2736_v36 }
0x1aec   : > { %v2733_v14 = vadd.f32 %v2732_v53, %v2727_v24 }
0x1aee   : > { %v2742_v25 = vpop.permute.xlu1 %2741  ;;  %v2739_v49 = vadd.f32 %v2738_v54, %v2733_v14  ;;  %v2754_v11 = vpop.permute.xlu0 %2753 }
0x1aef   : > { %v2744_v32 = vmul.f32 %v5616_v61, %v2742_v25  ;;  %v2756_v20 = vmul.f32 %v5628_v19, %v2754_v11 }
0x1af1   : > { %v2745_v52 = vadd.f32 %v2744_v32, %v2739_v49 }
0x1af3   : > { %v2748_v34 = vpop.permute.xlu1 %2747  ;;  %v2772_v24 = vpop.permute.xlu0 %2771 }
0x1af4   : > { %v2750_v0 = vmul.f32 %v5622_v15, %v2748_v34  ;;  %v2774_v36 = vmul.f32 %v5643_v43, %v2772_v24 }
0x1af6   : > { %v2751_v16 = vadd.f32 %v2750_v0, %v2745_v52 }
0x1af8   : > { %v2760_v21 = vpop.permute.xlu1 %2759  ;;  %v2757_v38 = vadd.f32 %v2756_v20, %v2751_v16  ;;  %v2790_v49 = vpop.permute.xlu0 %2789 }
0x1af9   : > { %v2762_v41 = vmul.f32 %v5631_v22, %v2760_v21  ;;  %v2792_v0 = vmul.f32 %v5656_v59, %v2790_v49 }
0x1afb   : > { %v2763_v17 = vadd.f32 %v2762_v41, %v2757_v38 }
0x1afc   : > { %v2869_v21 = vpop.permute.xlu0 %2868 }
0x1afd   : > { %v2766_v46 = vpop.permute.xlu1 %2765 }
0x1afe   : > { %v2768_v51 = vmul.f32 %v5637_v28, %v2766_v46 }
0x1b00   : > { %v2769_v53 = vadd.f32 %v2768_v51, %v2763_v17  ;;  %v2867_v38 = vpop.permute.xlu0 %2866 }
0x1b01   : > { %v2871_v41 = vsel %vm604_vm2, %v6124_v42, %v2867_v38 }
0x1b02   : > { %v2778_v14 = vpop.permute.xlu1 %2777  ;;  %v2775_v54 = vadd.f32 %v2774_v36, %v2769_v53 }
0x1b03   : > { %v2780_v25 = vmul.f32 %v5646_v47, %v2778_v14 }
0x1b05   : > { %v2781_v34 = vadd.f32 %v2780_v25, %v2775_v54 }
0x1b07   : > { %v2784_v32 = vpop.permute.xlu1 %2783 }
0x1b08   : > { %v2786_v52 = vmul.f32 %v5653_v55, %v2784_v32 }
0x1b0a   : > { %v2787_v11 = vadd.f32 %v2786_v52, %v2781_v34 }
0x1b0c   : > { %v2793_v16 = vadd.f32 %v2792_v0, %v2787_v11 }
0x1b0e   : > { %v2794_v20 = vsel %vm749_vm6, %v2793_v16, -inf }
0x1b0f   : > { %2795 = vmax.xlane.f32.xlu1 %v2794_v20 }
0x1b20   : > { %2807 = vrot.lane.b32.xlu1 %v5666_v40, %s5369_s15 }
0x1b24   : > { %2875 = vrot.lane.b32.xlu1 %v2871_v41, %s5370_s23 }
0x1b28   : > { %2872 = vrot.lane.b32.xlu1 %v5526_v57, %s5370_s23 }
0x1b98   : > { %v2796_v46 = vpop.xlane.xlu1 %2795 }
0x1b99   : > { %v2797_v17 = vsub.f32 %v2793_v16, %v2796_v46 }
0x1b9b   : > { %v2798_v51 = vmul.f32 1.442695, %v2797_v17 }
0x1b9c   : > { %v2808_v24 = vpop.permute.xlu1 %2807 }
0x1b9d   : > { %5226 = vpow2.f32 %v2798_v51  ;;  %v2813_v53 = vsel %vm604_vm2, %v2808_v24, 0 }
0x1b9e   : > { %4721 = vmatpush3.bf16.msra.mxu0 %v2813_v53  ;;  %v5180_v53 = vld [vmem:[%s6727_s3 + $0x28] sm:$0x1f]  }
0x1b9f   : > { %4726 = vmatprep.subr.bf16.mxu0 %v5351_v23 }
0x1ba0   : > { %v2876_v0 = vpop.permute.xlu1 %2875 }
0x1ba1   : > { %v2883_v11 = vsel %vm608_vm0, %v2876_v0, 0 }
0x1ba4   : > { %v2873_v16 = vpop.permute.xlu1 %2872 }
0x1baa   : > { %v5227_v36 = vpop.eup %5226 }
0x1bab   : > { %v2800_v14 = vsel %vm749_vm6, %v5227_v36, 0.0 }
0x1bac   : > { %2801 = vadd.xlane.f32.xlu0 %v2800_v14 }
0x1bc2   : > { %2877 = vrot.lane.b32.xlu0 %v2869_v21, %s5370_s23 }
0x1c35   : > { %v2802_v54 = vpop.xlane.xlu0 %2801 }
0x1c36   : > { %5228 = vrcp.f32 %v2802_v54 }
0x1c39   : > { %v2878_v49 = vpop.permute.xlu0 %2877 }
0x1c3a   : > { %v2886_v34 = vsel %vm608_vm0, %v2878_v49, 0 }
0x1c43   : > { %v5229_v25 = vpop.eup %5228 }
0x1c44   : > { %v2804_v32 = vmul.f32 %v5229_v25, %v5227_v36  ;;  %v5181_v36 = vld [vmem:[%s6727_s3 + $0x24] ss:$0 sps:$4 sm:$0xff]  }
0x1c46   : > { %v2805_v52 = vpack.c.bf16 %v2804_v32, %v2804_v32 }
0x1c48   : > { %4723 = vmatmul.mubr.msk.bf16.vlgmr.msra.gmra.mxu0 %vm749_vm6, %v2805_v52 }
0x1c49   : > { %4727 = vmatpush3.bf16.xpose.msra.mxu0 %v2886_v34  ;;  %4730 = vmatprep.mubr.msk.bf16.mxu0 %vm5352_vm1, %v5351_v23 }
0x1c4a   : > { %4728 = vmatprep.subr.bf16.mxu0 %v5351_v23 }
0x1c51   : > { %4729 = vmatpush3.bf16.xpose.msra.mxu0 %v2883_v11 }
0x1c52   : > { %4748 = vmatprep.subr.bf16.mxu0 %v5351_v23 }
0x1c58   : > { %4731 = vmatmul.mubr.msk.bf16.vlgmr.msra.gmra.mxu0 %vm608_vm0, %v2873_v16 }
0x1c59   : > { %4750 = vmatprep.mubr.msk.bf16.mxu0 %vm5352_vm1, %v5351_v23 }
0x1d08   : > { %v6267_v20 = vpop.f32.mrf.mxu0 }
0x1d0a   : > { %v4724_v21 = vpop.f32.mrf.mxu0 }
0x1d0c   : > { %v2852_v38 = vpop.f32.mrf.mxu0 }
0x1d0e   : > { %v4725_v41 = vpop.f32.mrf.mxu0 }
0x1d18   : > { %v2922_v46 = vpop.f32.mrf.mxu0 }
0x1d19   : > { %2943 = vperm.xlu0 %5037, %v2922_v46   ;;  %2931 = vperm.xlu1 %5035, %v2922_v46   ;;  %v2928_v25 = vadd.f32 %v6227_v29, %v2922_v46 }
0x1d1a   : > { %v4732_v17 = vpop.f32.mrf.mxu0 }
0x1d1c   : > { %v2925_v51 = vpop.f32.mrf.mxu0 }
0x1d1d   : > { %5040 = vset.pattern.permute.xlu0 %v5358_v2  ;;  %5036 = vset.pattern.permute.xlu1 %v6736_v63 }
0x1d1e   : > { %2961 = vperm.xlu0 %5040, %v2922_v46   ;;  %2937 = vperm.xlu1 %5036, %v2922_v46   ;;  %v4733_v24 = vpop.f32.mrf.mxu0 }
0x1d22   : > { %5043 = vset.pattern.permute.xlu0 %v6740_v4  ;;  %5038 = vset.pattern.permute.xlu1 %v6730_v62 }
0x1d23   : > { %2979 = vperm.xlu0 %5043, %v2922_v46   ;;  %2949 = vperm.xlu1 %5038, %v2922_v46  }
0x1d27   : > { %5046 = vset.pattern.permute.xlu0 %v6737_v6  ;;  %5039 = vset.pattern.permute.xlu1 %v5357_v1 }
0x1d28   : > { %2997 = vperm.xlu0 %5046, %v2922_v46   ;;  %2955 = vperm.xlu1 %5039, %v2922_v46  }
0x1d2c   : > { %5049 = vset.pattern.permute.xlu0 %v6732_v8  ;;  %5041 = vset.pattern.permute.xlu1 %v5359_v3 }
0x1d2d   : > { %3015 = vperm.xlu0 %5049, %v2922_v46   ;;  %2967 = vperm.xlu1 %5041, %v2922_v46  }
0x1d31   : > { %5042 = vset.pattern.permute.xlu1 %v5361_v5  ;;  %3093 = vrot.lane.b32.xlu0 %v5180_v53, %s5369_s15 }
0x1d32   : > { %2973 = vperm.xlu1 %5042, %v2922_v46   ;;  %5052 = vset.pattern.permute.xlu0 %v5353_v26 }
0x1d35   : > { %3091 = vrot.lane.b32.xlu0 %v5181_v36, %s5369_s15 }
0x1d36   : > { %5044 = vset.pattern.permute.xlu1 %v5363_v7 }
0x1d37   : > { %2985 = vperm.xlu1 %5044, %v2922_v46  }
0x1d3b   : > { %5045 = vset.pattern.permute.xlu1 %v6739_v10 }
0x1d3c   : > { %2991 = vperm.xlu1 %5045, %v2922_v46  }
0x1d40   : > { %5047 = vset.pattern.permute.xlu1 %v5367_v12 }
0x1d41   : > { %3003 = vperm.xlu1 %5047, %v2922_v46  }
0x1d45   : > { %5048 = vset.pattern.permute.xlu1 %v6734_v13 }
0x1d46   : > { %3009 = vperm.xlu1 %5048, %v2922_v46  }
0x1d4a   : > { %5050 = vset.pattern.permute.xlu1 %v5354_v27 }
0x1d94   : > { %v2932_v14 = vpop.permute.xlu1 %2931  ;;  %v2944_v52 = vpop.permute.xlu0 %2943 }
0x1d95   : > { %v2934_v54 = vmul.f32 %v5580_v33, %v2932_v14  ;;  %v2946_v11 = vmul.f32 %v5597_v39, %v2944_v52 }
0x1d97   : > { %v2935_v32 = vadd.f32 %v2934_v54, %v2928_v25 }
0x1d99   : > { %v2938_v49 = vpop.permute.xlu1 %2937  ;;  %v2962_v24 = vpop.permute.xlu0 %2961 }
0x1d9a   : > { %v2940_v34 = vmul.f32 %v5591_v37, %v2938_v49  ;;  %v2964_v46 = vmul.f32 %v5613_v56, %v2962_v24 }
0x1d9c   : > { %v2941_v0 = vadd.f32 %v2940_v34, %v2935_v32 }
0x1d9e   : > { %v2950_v16 = vpop.permute.xlu1 %2949  ;;  %v2947_v21 = vadd.f32 %v2946_v11, %v2941_v0  ;;  %v2980_v34 = vpop.permute.xlu0 %2979 }
0x1d9f   : > { %v2952_v38 = vmul.f32 %v5602_v45, %v2950_v16  ;;  %v2982_v0 = vmul.f32 %v5628_v19, %v2980_v34 }
0x1da1   : > { %v2953_v17 = vadd.f32 %v2952_v38, %v2947_v21 }
0x1da3   : > { %v2956_v41 = vpop.permute.xlu1 %2955 }
0x1da4   : > { %v2958_v51 = vmul.f32 %v5606_v48, %v2956_v41 }
0x1da6   : > { %v2959_v53 = vadd.f32 %v2958_v51, %v2953_v17  ;;  %v2998_v51 = vpop.permute.xlu0 %2997 }
0x1da8   : > { %v2968_v36 = vpop.permute.xlu1 %2967  ;;  %v2965_v14 = vadd.f32 %v2964_v46, %v2959_v53  ;;  %v3000_v53 = vmul.f32 %v5643_v43, %v2998_v51 }
0x1da9   : > { %v2970_v54 = vmul.f32 %v5616_v61, %v2968_v36 }
0x1dab   : > { %v2971_v49 = vadd.f32 %v2970_v54, %v2965_v14  ;;  %v3016_v54 = vpop.permute.xlu0 %3015 }
0x1dac   : > { %v3018_v34 = vmul.f32 %v5656_v59, %v3016_v54 }
0x1dad   : > { %v2974_v25 = vpop.permute.xlu1 %2973 }
0x1dae   : > { %v2976_v32 = vmul.f32 %v5622_v15, %v2974_v25 }
0x1db0   : > { %v2977_v52 = vadd.f32 %v2976_v32, %v2971_v49 }
0x1db2   : > { %v2986_v11 = vpop.permute.xlu1 %2985  ;;  %v2983_v16 = vadd.f32 %v2982_v0, %v2977_v52 }
0x1db3   : > { %v2988_v21 = vmul.f32 %v5631_v22, %v2986_v11 }
0x1db5   : > { %v2989_v41 = vadd.f32 %v2988_v21, %v2983_v16  ;;  %v3094_v16 = vpop.permute.xlu0 %3093 }
0x1db7   : > { %v2992_v38 = vpop.permute.xlu1 %2991 }
0x1db8   : > { %v2994_v17 = vmul.f32 %v5637_v28, %v2992_v38 }
0x1db9   : > { %v3092_v21 = vpop.permute.xlu0 %3091 }
0x1dba   : > { %v2995_v24 = vadd.f32 %v2994_v17, %v2989_v41  ;;  %v3096_v38 = vsel %vm604_vm2, %v6124_v42, %v3092_v21 }
0x1dbc   : > { %v3004_v46 = vpop.permute.xlu1 %3003  ;;  %v3001_v36 = vadd.f32 %v3000_v53, %v2995_v24 }
0x1dbd   : > { %v3006_v14 = vmul.f32 %v5646_v47, %v3004_v46 }
0x1dbf   : > { %v3007_v49 = vadd.f32 %v3006_v14, %v3001_v36 }
0x1dc1   : > { %v3010_v25 = vpop.permute.xlu1 %3009 }
0x1dc2   : > { %v3012_v32 = vmul.f32 %v5653_v55, %v3010_v25 }
0x1dc4   : > { %v3013_v52 = vadd.f32 %v3012_v32, %v3007_v49 }
0x1dc6   : > { %v3019_v0 = vadd.f32 %v3018_v34, %v3013_v52 }
0x1dc8   : > { %v3020_v11 = vsel %vm749_vm6, %v3019_v0, -inf }
0x1dc9   : > { %3021 = vmax.xlane.f32.xlu1 %v3020_v11  ;;  %v6328_v11 = vrot.slane %v5666_v40, 4 }
0x1dcb   : > { %v3497_v21 = vsel %vm604_vm2, %v6328_v11, 0 }
0x1dda   : > { %3032 = vrot.lane.b32.xlu1 %v5666_v40, %s5370_s23 }
0x1dde   : > { %3100 = vrot.lane.b32.xlu1 %v3096_v38, %s5366_s10 }
0x1de2   : > { %3097 = vrot.lane.b32.xlu1 %v5526_v57, %s5366_s10 }
0x1e52   : > { %v3022_v41 = vpop.xlane.xlu1 %3021 }
0x1e53   : > { %v3023_v17 = vsub.f32 %v3019_v0, %v3022_v41 }
0x1e55   : > { %v3024_v51 = vmul.f32 1.442695, %v3023_v17 }
0x1e56   : > { %v3033_v24 = vpop.permute.xlu1 %3032 }
0x1e57   : > { %5230 = vpow2.f32 %v3024_v51  ;;  %v3038_v53 = vsel %vm604_vm2, %v3033_v24, 0 }
0x1e58   : > { %4735 = vmatpush3.bf16.msra.mxu1 %v3038_v53 }
0x1e59   : > { %4740 = vmatprep.subr.bf16.mxu1 %v5351_v23 }
0x1e5a   : > { %v3101_v52 = vpop.permute.xlu1 %3100 }
0x1e5b   : > { %v3108_v0 = vsel %vm608_vm0, %v3101_v52, 0 }
0x1e64   : > { %v5231_v46 = vpop.eup %5230 }
0x1e65   : > { %v3026_v36 = vsel %vm749_vm6, %v5231_v46, 0.0 }
0x1e66   : > { %3027 = vadd.xlane.f32.xlu0 %v3026_v36 }
0x1e7c   : > { %3102 = vrot.lane.b32.xlu0 %v3094_v16, %s5366_s10  ;;  %v3098_v16 = vpop.permute.xlu1 %3097 }
0x1eef   : > { %v3028_v14 = vpop.xlane.xlu0 %3027 }
0x1ef0   : > { %5232 = vrcp.f32 %v3028_v14 }
0x1ef3   : > { %v3103_v25 = vpop.permute.xlu0 %3102 }
0x1ef4   : > { %v3111_v32 = vsel %vm608_vm0, %v3103_v25, 0 }
0x1efd   : > { %v5233_v54 = vpop.eup %5232 }
0x1efe   : > { %v3030_v49 = vmul.f32 %v5233_v54, %v5231_v46 }
0x1f00   : > { %v3031_v34 = vpack.c.bf16 %v3030_v49, %v3030_v49 }
0x1f02   : > { %4737 = vmatmul.mubr.msk.bf16.vlgmr.msra.gmra.mxu1 %vm749_vm6, %v3031_v34 }
0x1f03   : > { %4741 = vmatpush3.bf16.xpose.msra.mxu1 %v3111_v32  ;;  %4744 = vmatprep.mubr.msk.bf16.mxu1 %vm5352_vm1, %v5351_v23 }
0x1f04   : > { %4742 = vmatprep.subr.bf16.mxu1 %v5351_v23 }
0x1f0b   : > { %4743 = vmatpush3.bf16.xpose.msra.mxu1 %v3108_v0 }
0x1f0c   : > { %4762 = vmatprep.subr.bf16.mxu1 %v5351_v23 }
0x1f12   : > { %4745 = vmatmul.mubr.msk.bf16.vlgmr.msra.gmra.mxu1 %vm608_vm0, %v3098_v16 }
0x1f13   : > { %4763 = vmatpush3.bf16.msra.mxu1 %v3497_v21  ;;  %4764 = vmatprep.mubr.msk.bf16.mxu1 %vm5352_vm1, %v5351_v23 }
0x1f14   : > { %4768 = vmatprep.subr.bf16.mxu1 %v5351_v23 }
0x1fc2   : > { %v6336_v38 = vpop.f32.mrf.mxu1 }
0x1fc4   : > { %v4738_v41 = vpop.f32.mrf.mxu1 }
0x1fc6   : > { %v3077_v17 = vpop.f32.mrf.mxu1 }
0x1fc8   : > { %v4739_v51 = vpop.f32.mrf.mxu1 }
0x1fd2   : > { %v3147_v24 = vpop.f32.mrf.mxu1 }
0x1fd3   : > { %3168 = vperm.xlu0 %5052, %v3147_v24   ;;  %3156 = vperm.xlu1 %5050, %v3147_v24   ;;  %v3153_v25 = vadd.f32 %v6227_v29, %v3147_v24 }
0x1fd4   : > { %v4746_v53 = vpop.f32.mrf.mxu1 }
0x1fd6   : > { %v3150_v46 = vpop.f32.mrf.mxu1 }
0x1fd7   : > { %5055 = vset.pattern.permute.xlu0 %v5358_v2  ;;  %5051 = vset.pattern.permute.xlu1 %v6736_v63 }
0x1fd8   : > { %3186 = vperm.xlu0 %5055, %v3147_v24   ;;  %3162 = vperm.xlu1 %5051, %v3147_v24   ;;  %v4747_v36 = vpop.f32.mrf.mxu1 }
0x1fdc   : > { %5058 = vset.pattern.permute.xlu0 %v6740_v4  ;;  %5053 = vset.pattern.permute.xlu1 %v6730_v62 }
0x1fdd   : > { %3204 = vperm.xlu0 %5058, %v3147_v24   ;;  %3174 = vperm.xlu1 %5053, %v3147_v24  }
0x1fe1   : > { %5061 = vset.pattern.permute.xlu0 %v6737_v6  ;;  %5054 = vset.pattern.permute.xlu1 %v5357_v1 }
0x1fe2   : > { %3222 = vperm.xlu0 %5061, %v3147_v24   ;;  %3180 = vperm.xlu1 %5054, %v3147_v24  }
0x1fe6   : > { %5064 = vset.pattern.permute.xlu0 %v6732_v8  ;;  %5056 = vset.pattern.permute.xlu1 %v5359_v3 }
0x1fe7   : > { %3240 = vperm.xlu0 %5064, %v3147_v24   ;;  %3192 = vperm.xlu1 %5056, %v3147_v24  }
0x1feb   : > { %5057 = vset.pattern.permute.xlu1 %v5361_v5  ;;  %5065 = vset.pattern.permute.xlu0 %v5354_v27 }
0x1fec   : > { %3198 = vperm.xlu1 %5057, %v3147_v24  }
0x1ff0   : > { %5059 = vset.pattern.permute.xlu1 %v5363_v7 }
0x1ff1   : > { %3210 = vperm.xlu1 %5059, %v3147_v24  }
0x1ff5   : > { %5060 = vset.pattern.permute.xlu1 %v6739_v10 }
0x1ff6   : > { %3216 = vperm.xlu1 %5060, %v3147_v24  }
0x1ffa   : > { %5062 = vset.pattern.permute.xlu1 %v5367_v12 }
0x1ffb   : > { %3228 = vperm.xlu1 %5062, %v3147_v24  }
0x1fff   : > { %5063 = vset.pattern.permute.xlu1 %v6734_v13 }
0x2000   : > { %3234 = vperm.xlu1 %5063, %v3147_v24  }
0x2004   : > { %5066 = vset.pattern.permute.xlu1 %v6736_v63 }
0x204e   : > { %v3157_v14 = vpop.permute.xlu1 %3156  ;;  %v3169_v52 = vpop.permute.xlu0 %3168 }
0x204f   : > { %v3159_v54 = vmul.f32 %v5580_v33, %v3157_v14  ;;  %v3171_v16 = vmul.f32 %v5597_v39, %v3169_v52 }
0x2051   : > { %v3160_v32 = vadd.f32 %v3159_v54, %v3153_v25 }
0x2053   : > { %v3163_v49 = vpop.permute.xlu1 %3162  ;;  %v3187_v36 = vpop.permute.xlu0 %3186 }
0x2054   : > { %v3165_v34 = vmul.f32 %v5591_v37, %v3163_v49  ;;  %v3189_v29 = vmul.f32 %v5613_v56, %v3187_v36 }
0x2056   : > { %v3166_v0 = vadd.f32 %v3165_v34, %v3160_v32 }
0x2058   : > { %v3175_v21 = vpop.permute.xlu1 %3174  ;;  %v3172_v41 = vadd.f32 %v3171_v16, %v3166_v0  ;;  %v3205_v52 = vpop.permute.xlu0 %3204 }
0x2059   : > { %v3177_v17 = vmul.f32 %v5602_v45, %v3175_v21  ;;  %v3207_v16 = vmul.f32 %v5628_v19, %v3205_v52 }
0x205b   : > { %v3178_v53 = vadd.f32 %v3177_v17, %v3172_v41 }
0x205d   : > { %v3181_v51 = vpop.permute.xlu1 %3180  ;;  %v3223_v36 = vpop.permute.xlu0 %3222 }
0x205e   : > { %v3183_v46 = vmul.f32 %v5606_v48, %v3181_v51 }
0x2060   : > { %v3184_v14 = vadd.f32 %v3183_v46, %v3178_v53 }
0x2062   : > { %v3193_v24 = vpop.permute.xlu1 %3192  ;;  %v3190_v54 = vadd.f32 %v3189_v29, %v3184_v14  ;;  %v3225_v29 = vmul.f32 %v5643_v43, %v3223_v36 }
0x2063   : > { %v3195_v25 = vmul.f32 %v5616_v61, %v3193_v24 }
0x2065   : > { %v3196_v32 = vadd.f32 %v3195_v25, %v3190_v54 }
0x2067   : > { %v3199_v49 = vpop.permute.xlu1 %3198 }
0x2068   : > { %v3201_v34 = vmul.f32 %v5622_v15, %v3199_v49  ;;  %v3241_v49 = vpop.permute.xlu0 %3240 }
0x206a   : > { %v3202_v0 = vadd.f32 %v3201_v34, %v3196_v32 }
0x206c   : > { %v3211_v21 = vpop.permute.xlu1 %3210  ;;  %v3208_v41 = vadd.f32 %v3207_v16, %v3202_v0  ;;  %v3243_v0 = vmul.f32 %v5656_v59, %v3241_v49 }
0x206d   : > { %v3213_v17 = vmul.f32 %v5631_v22, %v3211_v21 }
0x206f   : > { %v3214_v53 = vadd.f32 %v3213_v17, %v3208_v41 }
0x2071   : > { %v3217_v51 = vpop.permute.xlu1 %3216 }
0x2072   : > { %v3219_v46 = vmul.f32 %v5637_v28, %v3217_v51 }
0x2074   : > { %v3220_v14 = vadd.f32 %v3219_v46, %v3214_v53 }
0x2076   : > { %v3229_v24 = vpop.permute.xlu1 %3228  ;;  %v3226_v54 = vadd.f32 %v3225_v29, %v3220_v14 }
0x2077   : > { %v3231_v25 = vmul.f32 %v5646_v47, %v3229_v24 }
0x2079   : > { %v3232_v34 = vadd.f32 %v3231_v25, %v3226_v54 }
0x207b   : > { %v3235_v32 = vpop.permute.xlu1 %3234 }
0x207c   : > { %v3237_v52 = vmul.f32 %v5653_v55, %v3235_v32 }
0x207e   : > { %v3238_v16 = vadd.f32 %v3237_v52, %v3232_v34  ;;  %v6381_v34 = vrot.slane %v6124_v42, 4  ;;  %v5183_v52 = vld [vmem:[%s6727_s3] ss:$0 sps:$4 sm:$0xff]   ;;  %v6394_v42 = vrot.slane %v5526_v57, 4 }
0x2080   : > { %v3244_v21 = vadd.f32 %v3243_v0, %v3238_v16  ;;  %v3338_v0 = vsel %vm604_vm2, %v6381_v34, %v5183_v52 }
0x2081   : > { %v3343_v16 = vsel %vm608_vm0, %v3338_v0, 0 }
0x2082   : > { %v3245_v41 = vsel %vm749_vm6, %v3244_v21, -inf }
0x2083   : > { %3246 = vmax.xlane.f32.xlu1 %v3245_v41 }
0x2094   : > { %3257 = vrot.lane.b32.xlu1 %v5666_v40, %s5366_s10  ;;  %v5182_v40 = vld [vmem:[%s6727_s3 + $0x4] sm:$0x1f]  }
0x2095   : > { %v3346_v32 = vsel %vm608_vm0, %v5182_v40, 0 }
0x210c   : > { %v3247_v17 = vpop.xlane.xlu1 %3246 }
0x210d   : > { %v3248_v51 = vsub.f32 %v3244_v21, %v3247_v17 }
0x210f   : > { %v3249_v53 = vmul.f32 1.442695, %v3248_v51 }
0x2110   : > { %v3258_v46 = vpop.permute.xlu1 %3257 }
0x2111   : > { %5234 = vpow2.f32 %v3249_v53  ;;  %v3263_v36 = vsel %vm604_vm2, %v3258_v46, 0 }
0x2112   : > { %4749 = vmatpush3.bf16.msra.mxu0 %v3263_v36 }
0x2113   : > { %4754 = vmatprep.subr.bf16.mxu0 %v5351_v23 }
0x211e   : > { %v5235_v14 = vpop.eup %5234 }
0x211f   : > { %v3251_v29 = vsel %vm749_vm6, %v5235_v14, 0.0 }
0x2120   : > { %3252 = vadd.xlane.f32.xlu0 %v3251_v29  ;;  %v5185_v29 = vld [vmem:[%s6727_s3 + $0xc] ss:$0 sps:$4 sm:$0xff]  }
0x21a9   : > { %v3253_v24 = vpop.xlane.xlu0 %3252 }
0x21aa   : > { %5236 = vrcp.f32 %v3253_v24 }
0x21b7   : > { %v5237_v54 = vpop.eup %5236 }
0x21b8   : > { %v3255_v25 = vmul.f32 %v5237_v54, %v5235_v14  ;;  %v5184_v14 = vld [vmem:[%s6727_s3 + $0x10] sm:$0x1f]  }
0x21ba   : > { %v3256_v49 = vpack.c.bf16 %v3255_v25, %v3255_v25  ;;  %v6428_v25 = vld [vmem:[%s6728_s4] sm:$0xff] }
0x21bc   : > { %4751 = vmatmul.mubr.msk.bf16.vlgmr.msra.gmra.mxu0 %vm749_vm6, %v3256_v49 }
0x21bd   : > { %4755 = vmatpush3.bf16.xpose.msra.mxu0 %v3346_v32  ;;  %4758 = vmatprep.mubr.msk.bf16.mxu0 %vm5352_vm1, %v5351_v23 }
0x21be   : > { %4756 = vmatprep.subr.bf16.mxu0 %v5351_v23 }
0x21c5   : > { %4757 = vmatpush3.bf16.xpose.msra.mxu0 %v3343_v16 }
0x21c6   : > { %4776 = vmatprep.subr.bf16.mxu0 %v5351_v23 }
0x21cc   : > { %4759 = vmatmul.mubr.msk.bf16.vlgmr.msra.gmra.mxu0 %vm608_vm0, %v6394_v42 }
0x21cd   : > { %4778 = vmatprep.mubr.msk.bf16.mxu0 %vm5352_vm1, %v5351_v23 }
0x227c   : > { %v6400_v21 = vpop.f32.mrf.mxu0 }
0x227e   : > { %v4752_v41 = vpop.f32.mrf.mxu0 }
0x2280   : > { %v3302_v17 = vpop.f32.mrf.mxu0 }
0x2282   : > { %v4753_v51 = vpop.f32.mrf.mxu0 }
0x228c   : > { %v3382_v53 = vpop.f32.mrf.mxu0 }
0x228d   : > { %3397 = vperm.xlu1 %5066, %v3382_v53   ;;  %3391 = vperm.xlu0 %5065, %v3382_v53   ;;  %v3388_v52 = vadd.f32 %v3382_v53, %v6428_v25 }
0x228e   : > { %v4760_v46 = vpop.f32.mrf.mxu0 }
0x2290   : > { %v3385_v36 = vpop.f32.mrf.mxu0 }
0x2291   : > { %5067 = vset.pattern.permute.xlu1 %v5353_v26  ;;  %5073 = vset.pattern.permute.xlu0 %v6740_v4 }
0x2292   : > { %3403 = vperm.xlu1 %5067, %v3382_v53   ;;  %3439 = vperm.xlu0 %5073, %v3382_v53   ;;  %v4761_v57 = vpop.f32.mrf.mxu0 }
0x2296   : > { %5068 = vset.pattern.permute.xlu1 %v6730_v62  ;;  %5076 = vset.pattern.permute.xlu0 %v6737_v6 }
0x2297   : > { %3409 = vperm.xlu1 %5068, %v3382_v53   ;;  %3457 = vperm.xlu0 %5076, %v3382_v53  }
0x229b   : > { %5069 = vset.pattern.permute.xlu1 %v5357_v1  ;;  %5079 = vset.pattern.permute.xlu0 %v6732_v8 }
0x229c   : > { %3415 = vperm.xlu1 %5069, %v3382_v53   ;;  %3475 = vperm.xlu0 %5079, %v3382_v53  }
0x22a0   : > { %5070 = vset.pattern.permute.xlu1 %v5358_v2  ;;  %3552 = vrot.lane.b32.xlu0 %v5184_v14, %s5366_s10 }
0x22a1   : > { %3421 = vperm.xlu1 %5070, %v3382_v53   ;;  %5083 = vset.pattern.permute.xlu0 %v6730_v62 }
0x22a4   : > { %3550 = vrot.lane.b32.xlu0 %v5185_v29, %s5366_s10 }
0x22a5   : > { %5071 = vset.pattern.permute.xlu1 %v5359_v3 }
0x22a6   : > { %3427 = vperm.xlu1 %5071, %v3382_v53  }
0x22aa   : > { %5072 = vset.pattern.permute.xlu1 %v5361_v5 }
0x22ab   : > { %3433 = vperm.xlu1 %5072, %v3382_v53  }
0x22af   : > { %5074 = vset.pattern.permute.xlu1 %v5363_v7 }
0x22b0   : > { %3445 = vperm.xlu1 %5074, %v3382_v53  }
0x22b4   : > { %5075 = vset.pattern.permute.xlu1 %v6739_v10 }
0x22b5   : > { %3451 = vperm.xlu1 %5075, %v3382_v53  }
0x22b9   : > { %5077 = vset.pattern.permute.xlu1 %v5367_v12 }
0x22ba   : > { %3463 = vperm.xlu1 %5077, %v3382_v53  }
0x22be   : > { %5078 = vset.pattern.permute.xlu1 %v6734_v13 }
0x22bf   : > { %3469 = vperm.xlu1 %5078, %v3382_v53  }
0x22c3   : > { %5080 = vset.pattern.permute.xlu1 %v5354_v27 }
0x2308   : > { %v3398_v24 = vpop.permute.xlu1 %3397  ;;  %v3392_v54 = vpop.permute.xlu0 %3391 }
0x2309   : > { %v3394_v32 = vmul.f32 %v5580_v33, %v3392_v54  ;;  %v3400_v41 = vmul.f32 %v5591_v37, %v3398_v24 }
0x230b   : > { %v3395_v0 = vadd.f32 %v3394_v32, %v3388_v52 }
0x230d   : > { %v3404_v40 = vpop.permute.xlu1 %3403  ;;  %v3401_v17 = vadd.f32 %v3400_v41, %v3395_v0  ;;  %v3440_v0 = vpop.permute.xlu0 %3439 }
0x230e   : > { %v3406_v51 = vmul.f32 %v5597_v39, %v3404_v40  ;;  %v3442_v41 = vmul.f32 %v5628_v19, %v3440_v0 }
0x2310   : > { %v3407_v57 = vadd.f32 %v3406_v51, %v3401_v17 }
0x2312   : > { %v3410_v49 = vpop.permute.xlu1 %3409 }
0x2313   : > { %v3412_v36 = vmul.f32 %v5602_v45, %v3410_v49 }
0x2315   : > { %v3413_v29 = vadd.f32 %v3412_v36, %v3407_v57  ;;  %v3458_v57 = vpop.permute.xlu0 %3457 }
0x2317   : > { %v3416_v16 = vpop.permute.xlu1 %3415 }
0x2318   : > { %v3418_v14 = vmul.f32 %v5606_v48, %v3416_v16 }
0x231a   : > { %v3419_v54 = vadd.f32 %v3418_v14, %v3413_v29 }
0x231c   : > { %v3422_v46 = vpop.permute.xlu1 %3421 }
0x231d   : > { %v3424_v62 = vmul.f32 %v5613_v56, %v3422_v46 }
0x231f   : > { %v3425_v32 = vadd.f32 %v3424_v62, %v3419_v54  ;;  %v3460_v62 = vmul.f32 %v5643_v43, %v3458_v57 }
0x2321   : > { %v3428_v8 = vpop.permute.xlu1 %3427 }
0x2322   : > { %v3430_v53 = vmul.f32 %v5616_v61, %v3428_v8 }
0x2324   : > { %v3431_v13 = vadd.f32 %v3430_v53, %v3425_v32  ;;  %v3476_v53 = vpop.permute.xlu0 %3475 }
0x2326   : > { %v3434_v52 = vpop.permute.xlu1 %3433 }
0x2327   : > { %v3436_v24 = vmul.f32 %v5622_v15, %v3434_v52 }
0x2329   : > { %v3437_v40 = vadd.f32 %v3436_v24, %v3431_v13  ;;  %v3478_v24 = vmul.f32 %v5656_v59, %v3476_v53 }
0x232b   : > { %v3446_v49 = vpop.permute.xlu1 %3445  ;;  %v3443_v17 = vadd.f32 %v3442_v41, %v3437_v40 }
0x232c   : > { %v3448_v16 = vmul.f32 %v5631_v22, %v3446_v49  ;;  %v3553_v49 = vpop.permute.xlu0 %3552 }
0x232e   : > { %v3449_v36 = vadd.f32 %v3448_v16, %v3443_v17 }
0x2330   : > { %v3452_v51 = vpop.permute.xlu1 %3451  ;;  %v3551_v57 = vpop.permute.xlu0 %3550 }
0x2331   : > { %v3454_v46 = vmul.f32 %v5637_v28, %v3452_v51 }
0x2333   : > { %v3455_v14 = vadd.f32 %v3454_v46, %v3449_v36 }
0x2335   : > { %v3464_v8 = vpop.permute.xlu1 %3463  ;;  %v3461_v29 = vadd.f32 %v3460_v62, %v3455_v14  ;;  %v3555_v14 = vsel %vm604_vm2, %v6381_v34, %v3551_v57  ;;  %v6745_v57 = vmov 23  }
0x2336   : > { %v3466_v54 = vmul.f32 %v5646_v47, %v3464_v8 }
0x2338   : > { %v3467_v32 = vadd.f32 %v3466_v54, %v3461_v29 }
0x233a   : > { %v3470_v13 = vpop.permute.xlu1 %3469 }
0x233b   : > { %v3472_v52 = vmul.f32 %v5653_v55, %v3470_v13 }
0x233d   : > { %v3473_v0 = vadd.f32 %v3472_v52, %v3467_v32 }
0x233f   : > { %v3479_v40 = vadd.f32 %v3478_v24, %v3473_v0 }
0x2341   : > { %v3480_v41 = vsel %vm749_vm6, %v3479_v40, -inf }
0x2342   : > { %3481 = vmax.xlane.f32.xlu1 %v3480_v41 }
0x2353   : > { %3561 = vrot.lane.b32.xlu1 %v3553_v49, %s5369_s15 }
0x2357   : > { %3556 = vrot.lane.b32.xlu1 %v6394_v42, %s5369_s15 }
0x23cb   : > { %v3482_v17 = vpop.xlane.xlu1 %3481 }
0x23cc   : > { %v3483_v16 = vsub.f32 %v3479_v40, %v3482_v17 }
0x23ce   : > { %v3484_v51 = vmul.f32 1.442695, %v3483_v16 }
0x23cf   : > { %v3562_v54 = vpop.permute.xlu1 %3561 }
0x23d0   : > { %5238 = vpow2.f32 %v3484_v51  ;;  %v3570_v53 = vsel %vm608_vm0, %v3562_v54, 0 }
0x23d3   : > { %v3557_v24 = vpop.permute.xlu1 %3556 }
0x23dd   : > { %v5239_v36 = vpop.eup %5238 }
0x23de   : > { %v3486_v46 = vsel %vm749_vm6, %v5239_v36, 0.0 }
0x23df   : > { %3487 = vadd.xlane.f32.xlu0 %v3486_v46  ;;  %v6744_v46 = vmov 22  }
0x23f5   : > { %3559 = vrot.lane.b32.xlu0 %v3555_v14, %s5369_s15  ;;  %v5186_v14 = vld [vmem:[%s6727_s3 + $0x1c] sm:$0x1f]  }
0x2468   : > { %v3488_v62 = vpop.xlane.xlu0 %3487 }
0x2469   : > { %5240 = vrcp.f32 %v3488_v62  ;;  %v5187_v62 = vld [vmem:[%s6727_s3 + $0x18] ss:$0 sps:$4 sm:$0xff]  }
0x246c   : > { %v3560_v32 = vpop.permute.xlu0 %3559 }
0x246d   : > { %v3567_v52 = vsel %vm608_vm0, %v3560_v32, 0 }
0x2476   : > { %v5241_v8 = vpop.eup %5240 }
0x2477   : > { %v3490_v29 = vmul.f32 %v5241_v8, %v5239_v36 }
0x2479   : > { %v3491_v13 = vpack.c.bf16 %v3490_v29, %v3490_v29 }
0x247b   : > { %4765 = vmatmul.mubr.msk.bf16.vlgmr.msra.gmra.mxu1 %vm749_vm6, %v3491_v13 }
0x247c   : > { %4769 = vmatpush3.bf16.xpose.msra.mxu1 %v3570_v53  ;;  %4772 = vmatprep.mubr.msk.bf16.mxu1 %vm5352_vm1, %v5351_v23 }
0x247d   : > { %4770 = vmatprep.subr.bf16.mxu1 %v5351_v23 }
0x2484   : > { %4771 = vmatpush3.bf16.xpose.msra.mxu1 %v3567_v52 }
0x2485   : > { %4790 = vmatprep.subr.bf16.mxu1 %v5351_v23 }
0x248b   : > { %4773 = vmatmul.mubr.msk.bf16.vlgmr.msra.gmra.mxu1 %vm608_vm0, %v3557_v24 }
0x248c   : > { %4792 = vmatprep.mubr.msk.bf16.mxu1 %vm5352_vm1, %v5351_v23 }
0x253b   : > { %v6464_v0 = vpop.f32.mrf.mxu1 }
0x253d   : > { %v4766_v40 = vpop.f32.mrf.mxu1 }
0x253f   : > { %v3536_v41 = vpop.f32.mrf.mxu1 }
0x2541   : > { %v4767_v49 = vpop.f32.mrf.mxu1 }
0x254b   : > { %v3606_v17 = vpop.f32.mrf.mxu1 }
0x254c   : > { %3633 = vperm.xlu0 %5083, %v3606_v17   ;;  %3615 = vperm.xlu1 %5080, %v3606_v17   ;;  %v3612_v53 = vadd.f32 %v3606_v17, %v6428_v25 }
0x254d   : > { %v4774_v16 = vpop.f32.mrf.mxu1 }
0x254f   : > { %v3609_v51 = vpop.f32.mrf.mxu1 }
0x2550   : > { %5086 = vset.pattern.permute.xlu0 %v5359_v3  ;;  %5081 = vset.pattern.permute.xlu1 %v6736_v63 }
0x2551   : > { %3651 = vperm.xlu0 %5086, %v3606_v17   ;;  %3621 = vperm.xlu1 %5081, %v3606_v17   ;;  %v4775_v36 = vpop.f32.mrf.mxu1 }
0x2555   : > { %5089 = vset.pattern.permute.xlu0 %v5363_v7  ;;  %5082 = vset.pattern.permute.xlu1 %v5353_v26 }
0x2556   : > { %3669 = vperm.xlu0 %5089, %v3606_v17   ;;  %3627 = vperm.xlu1 %5082, %v3606_v17  }
0x255a   : > { %5092 = vset.pattern.permute.xlu0 %v5367_v12  ;;  %5084 = vset.pattern.permute.xlu1 %v5357_v1 }
0x255b   : > { %3687 = vperm.xlu0 %5092, %v3606_v17   ;;  %3639 = vperm.xlu1 %5084, %v3606_v17  }
0x255f   : > { %5085 = vset.pattern.permute.xlu1 %v5358_v2  ;;  %5095 = vset.pattern.permute.xlu0 %v5354_v27 }
0x2560   : > { %3645 = vperm.xlu1 %5085, %v3606_v17  }
0x2564   : > { %5087 = vset.pattern.permute.xlu1 %v5361_v5 }
0x2565   : > { %3657 = vperm.xlu1 %5087, %v3606_v17  }
0x2569   : > { %5088 = vset.pattern.permute.xlu1 %v6740_v4 }
0x256a   : > { %3663 = vperm.xlu1 %5088, %v3606_v17  }
0x256e   : > { %5090 = vset.pattern.permute.xlu1 %v6739_v10 }
0x256f   : > { %3675 = vperm.xlu1 %5090, %v3606_v17  }
0x2573   : > { %5091 = vset.pattern.permute.xlu1 %v6737_v6 }
0x2574   : > { %3681 = vperm.xlu1 %5091, %v3606_v17  }
0x2578   : > { %5093 = vset.pattern.permute.xlu1 %v6744_v46 }
0x2579   : > { %3693 = vperm.xlu1 %5093, %v3606_v17  }
0x257d   : > { %5094 = vset.pattern.permute.xlu1 %v6745_v57 }
0x257e   : > { %3699 = vperm.xlu1 %5094, %v3606_v17  }
0x2582   : > { %3777 = vrot.lane.b32.xlu1 %v5186_v14, %s5370_s23 }
0x2583   : > { %5096 = vset.pattern.permute.xlu1 %v6736_v63 }
0x2586   : > { %3775 = vrot.lane.b32.xlu1 %v5187_v62, %s5370_s23 }
0x25c7   : > { %v3616_v8 = vpop.permute.xlu1 %3615  ;;  %v3634_v41 = vpop.permute.xlu0 %3633 }
0x25c8   : > { %v3618_v29 = vmul.f32 %v5580_v33, %v3616_v8  ;;  %v3636_v16 = vmul.f32 %v5602_v45, %v3634_v41 }
0x25ca   : > { %v3619_v32 = vadd.f32 %v3618_v29, %v3612_v53 }
0x25cc   : > { %v3622_v54 = vpop.permute.xlu1 %3621  ;;  %v3652_v17 = vpop.permute.xlu0 %3651 }
0x25cd   : > { %v3624_v13 = vmul.f32 %v5591_v37, %v3622_v54  ;;  %v3654_v29 = vmul.f32 %v5616_v61, %v3652_v17 }
0x25cf   : > { %v3625_v24 = vadd.f32 %v3624_v13, %v3619_v32 }
0x25d1   : > { %v3628_v52 = vpop.permute.xlu1 %3627 }
0x25d2   : > { %v3630_v40 = vmul.f32 %v5597_v39, %v3628_v52 }
0x25d4   : > { %v3631_v49 = vadd.f32 %v3630_v40, %v3625_v24  ;;  %v3670_v40 = vpop.permute.xlu0 %3669 }
0x25d6   : > { %v3640_v51 = vpop.permute.xlu1 %3639  ;;  %v3637_v36 = vadd.f32 %v3636_v16, %v3631_v49  ;;  %v3672_v49 = vmul.f32 %v5631_v22, %v3670_v40 }
0x25d7   : > { %v3642_v14 = vmul.f32 %v5606_v48, %v3640_v51 }
0x25d9   : > { %v3643_v8 = vadd.f32 %v3642_v14, %v3637_v36 }
0x25db   : > { %v3646_v62 = vpop.permute.xlu1 %3645 }
0x25dc   : > { %v3648_v63 = vmul.f32 %v5613_v56, %v3646_v62 }
0x25de   : > { %v3649_v6 = vadd.f32 %v3648_v63, %v3643_v8  ;;  %v3688_v8 = vpop.permute.xlu0 %3687 }
0x25df   : > { %v3690_v17 = vmul.f32 %v5646_v47, %v3688_v8 }
0x25e0   : > { %v3658_v54 = vpop.permute.xlu1 %3657  ;;  %v3655_v53 = vadd.f32 %v3654_v29, %v3649_v6 }
0x25e1   : > { %v3660_v13 = vmul.f32 %v5622_v15, %v3658_v54 }
0x25e3   : > { %v3661_v52 = vadd.f32 %v3660_v13, %v3655_v53 }
0x25e5   : > { %v3664_v32 = vpop.permute.xlu1 %3663 }
0x25e6   : > { %v3666_v24 = vmul.f32 %v5628_v19, %v3664_v32 }
0x25e8   : > { %v3667_v41 = vadd.f32 %v3666_v24, %v3661_v52 }
0x25ea   : > { %v3676_v16 = vpop.permute.xlu1 %3675  ;;  %v3673_v51 = vadd.f32 %v3672_v49, %v3667_v41 }
0x25eb   : > { %v3678_v36 = vmul.f32 %v5637_v28, %v3676_v16 }
0x25ed   : > { %v3679_v63 = vadd.f32 %v3678_v36, %v3673_v51 }
0x25ef   : > { %v3682_v14 = vpop.permute.xlu1 %3681 }
0x25f0   : > { %v3684_v62 = vmul.f32 %v5643_v43, %v3682_v14 }
0x25f2   : > { %v3685_v6 = vadd.f32 %v3684_v62, %v3679_v63 }
0x25f4   : > { %v3694_v29 = vpop.permute.xlu1 %3693  ;;  %v3691_v54 = vadd.f32 %v3690_v17, %v3685_v6 }
0x25f5   : > { %v3696_v53 = vmul.f32 %v5653_v55, %v3694_v29 }
0x25f7   : > { %v3697_v32 = vadd.f32 %v3696_v53, %v3691_v54 }
0x25f9   : > { %v3700_v13 = vpop.permute.xlu1 %3699 }
0x25fa   : > { %v3702_v52 = vmul.f32 %v5656_v59, %v3700_v13 }
0x25fc   : > { %v3703_v24 = vadd.f32 %v3702_v52, %v3697_v32 }
0x25fd   : > { %v3778_v41 = vpop.permute.xlu1 %3777 }
0x25fe   : > { %v3704_v40 = vsel %vm749_vm6, %v3703_v24, -inf }
0x25ff   : > { %3705 = vmax.xlane.f32.xlu0 %v3704_v40 }
0x2601   : > { %v3776_v49 = vpop.permute.xlu1 %3775 }
0x2602   : > { %v3780_v16 = vsel %vm604_vm2, %v6381_v34, %v3776_v49 }
0x2615   : > { %3716 = vrot.lane.b32.xlu0 %v6328_v11, %s5369_s15 }
0x2619   : > { %3784 = vrot.lane.b32.xlu0 %v3780_v16, %s5370_s23 }
0x261d   : > { %3781 = vrot.lane.b32.xlu0 %v6394_v42, %s5370_s23 }
0x2688   : > { %v3706_v51 = vpop.xlane.xlu0 %3705 }
0x2689   : > { %v3707_v36 = vsub.f32 %v3703_v24, %v3706_v51 }
0x268b   : > { %v3708_v14 = vmul.f32 1.442695, %v3707_v36 }
0x268c   : > { %v3717_v63 = vpop.permute.xlu0 %3716 }
0x268d   : > { %5242 = vpow2.f32 %v3708_v14  ;;  %v3722_v62 = vsel %vm604_vm2, %v3717_v63, 0 }
0x268e   : > { %4777 = vmatpush3.bf16.msra.mxu0 %v3722_v62  ;;  %v6746_v62 = vmov 12  }
0x268f   : > { %4782 = vmatprep.subr.bf16.mxu0 %v5351_v23 }
0x2690   : > { %v3785_v52 = vpop.permute.xlu0 %3784 }
0x2691   : > { %v3792_v24 = vsel %vm608_vm0, %v3785_v52, 0 }
0x2694   : > { %v3782_v40 = vpop.permute.xlu0 %3781 }
0x269a   : > { %v5243_v8 = vpop.eup %5242 }
0x269b   : > { %v3710_v6 = vsel %vm749_vm6, %v5243_v8, 0.0 }
0x269c   : > { %3711 = vadd.xlane.f32.xlu1 %v3710_v6  ;;  %v6747_v6 = vmov 20  }
0x26ad   : > { %3786 = vrot.lane.b32.xlu1 %v3778_v41, %s5370_s23 }
0x2725   : > { %v3712_v17 = vpop.xlane.xlu1 %3711 }
0x2726   : > { %5244 = vrcp.f32 %v3712_v17  ;;  %v5188_v17 = vld [vmem:[%s6727_s3 + $0x28] sm:$0x1f]  }
0x2729   : > { %v3787_v54 = vpop.permute.xlu1 %3786 }
0x272a   : > { %v3795_v13 = vsel %vm608_vm0, %v3787_v54, 0 }
0x2733   : > { %v5245_v29 = vpop.eup %5244 }
0x2734   : > { %v3714_v53 = vmul.f32 %v5245_v29, %v5243_v8  ;;  %v6748_v29 = vmov 10  }
0x2736   : > { %v3715_v32 = vpack.c.bf16 %v3714_v53, %v3714_v53 }
0x2738   : > { %4779 = vmatmul.mubr.msk.bf16.vlgmr.msra.gmra.mxu0 %vm749_vm6, %v3715_v32 }
0x2739   : > { %4783 = vmatpush3.bf16.xpose.msra.mxu0 %v3795_v13  ;;  %4786 = vmatprep.mubr.msk.bf16.mxu0 %vm5352_vm1, %v5351_v23 }
0x273a   : > { %4784 = vmatprep.subr.bf16.mxu0 %v5351_v23 }
0x2741   : > { %4785 = vmatpush3.bf16.xpose.msra.mxu0 %v3792_v24 }
0x2742   : > { %4804 = vmatprep.subr.bf16.mxu0 %v5351_v23 }
0x2748   : > { %4787 = vmatmul.mubr.msk.bf16.vlgmr.msra.gmra.mxu0 %vm608_vm0, %v3782_v40 }
0x2749   : > { %4806 = vmatprep.mubr.msk.bf16.mxu0 %vm5352_vm1, %v5351_v23 }
0x27f8   : > { %v6527_v41 = vpop.f32.mrf.mxu0 }
0x27fa   : > { %v4780_v49 = vpop.f32.mrf.mxu0 }
0x27fc   : > { %v3761_v16 = vpop.f32.mrf.mxu0 }
0x27fe   : > { %v4781_v51 = vpop.f32.mrf.mxu0 }
0x2808   : > { %v3831_v36 = vpop.f32.mrf.mxu0 }
0x2809   : > { %3846 = vperm.xlu1 %5096, %v3831_v36   ;;  %3840 = vperm.xlu0 %5095, %v3831_v36   ;;  %v3837_v13 = vadd.f32 %v3831_v36, %v6428_v25 }
0x280a   : > { %v4788_v14 = vpop.f32.mrf.mxu0 }
0x280c   : > { %v3834_v63 = vpop.f32.mrf.mxu0 }
0x280d   : > { %5097 = vset.pattern.permute.xlu1 %v5353_v26  ;;  %5098 = vset.pattern.permute.xlu0 %v6746_v62 }
0x280e   : > { %3852 = vperm.xlu1 %5097, %v3831_v36   ;;  %3858 = vperm.xlu0 %5098, %v3831_v36   ;;  %v4789_v8 = vpop.f32.mrf.mxu0 }
0x2812   : > { %5099 = vset.pattern.permute.xlu1 %v5357_v1  ;;  %5101 = vset.pattern.permute.xlu0 %v5359_v3 }
0x2813   : > { %3864 = vperm.xlu1 %5099, %v3831_v36   ;;  %3876 = vperm.xlu0 %5101, %v3831_v36  }
0x2817   : > { %5100 = vset.pattern.permute.xlu1 %v5358_v2  ;;  %5104 = vset.pattern.permute.xlu0 %v5363_v7 }
0x2818   : > { %3870 = vperm.xlu1 %5100, %v3831_v36   ;;  %3894 = vperm.xlu0 %5104, %v3831_v36  }
0x281c   : > { %5102 = vset.pattern.permute.xlu1 %v5361_v5  ;;  %5107 = vset.pattern.permute.xlu0 %v5367_v12 }
0x281d   : > { %3882 = vperm.xlu1 %5102, %v3831_v36   ;;  %3912 = vperm.xlu0 %5107, %v3831_v36  }
0x2821   : > { %5103 = vset.pattern.permute.xlu1 %v6740_v4  ;;  %5110 = vset.pattern.permute.xlu0 %v5354_v27  ;;  %v5189_v27 = vld [vmem:[%s6727_s3 + $0x24] ss:$0 sps:$4 sm:$0xff]  }
0x2822   : > { %3888 = vperm.xlu1 %5103, %v3831_v36  }
0x2826   : > { %5105 = vset.pattern.permute.xlu1 %v6739_v10 }
0x2827   : > { %3900 = vperm.xlu1 %5105, %v3831_v36  }
0x282b   : > { %5106 = vset.pattern.permute.xlu1 %v6747_v6 }
0x282c   : > { %3906 = vperm.xlu1 %5106, %v3831_v36  }
0x2830   : > { %5108 = vset.pattern.permute.xlu1 %v6744_v46 }
0x2831   : > { %3918 = vperm.xlu1 %5108, %v3831_v36  }
0x2835   : > { %5109 = vset.pattern.permute.xlu1 %v6745_v57 }
0x2836   : > { %3924 = vperm.xlu1 %5109, %v3831_v36  }
0x283a   : > { %4002 = vrot.lane.b32.xlu1 %v5188_v17, %s5369_s15 }
0x283b   : > { %5111 = vset.pattern.permute.xlu1 %v6748_v29 }
0x283e   : > { %4000 = vrot.lane.b32.xlu1 %v5189_v27, %s5369_s15 }
0x2884   : > { %v3847_v54 = vpop.permute.xlu1 %3846  ;;  %v3841_v53 = vpop.permute.xlu0 %3840 }
0x2885   : > { %v3843_v32 = vmul.f32 %v5580_v33, %v3841_v53  ;;  %v3849_v52 = vmul.f32 %v5591_v37, %v3847_v54 }
0x2887   : > { %v3844_v24 = vadd.f32 %v3843_v32, %v3837_v13 }
0x2889   : > { %v3853_v40 = vpop.permute.xlu1 %3852  ;;  %v3850_v49 = vadd.f32 %v3849_v52, %v3844_v24  ;;  %v3859_v51 = vpop.permute.xlu0 %3858 }
0x288a   : > { %v3855_v16 = vmul.f32 %v5597_v39, %v3853_v40  ;;  %v3861_v63 = vmul.f32 %v5602_v45, %v3859_v51 }
0x288c   : > { %v3856_v14 = vadd.f32 %v3855_v16, %v3850_v49 }
0x288e   : > { %v3865_v8 = vpop.permute.xlu1 %3864  ;;  %v3862_v17 = vadd.f32 %v3861_v63, %v3856_v14  ;;  %v3877_v53 = vpop.permute.xlu0 %3876 }
0x288f   : > { %v3867_v27 = vmul.f32 %v5606_v48, %v3865_v8  ;;  %v3879_v54 = vmul.f32 %v5616_v61, %v3877_v53 }
0x2891   : > { %v3868_v10 = vadd.f32 %v3867_v27, %v3862_v17 }
0x2893   : > { %v3871_v29 = vpop.permute.xlu1 %3870  ;;  %v3895_v16 = vpop.permute.xlu0 %3894 }
0x2894   : > { %v3873_v36 = vmul.f32 %v5613_v56, %v3871_v29  ;;  %v3897_v14 = vmul.f32 %v5631_v22, %v3895_v16 }
0x2896   : > { %v3874_v4 = vadd.f32 %v3873_v36, %v3868_v10 }
0x2898   : > { %v3883_v13 = vpop.permute.xlu1 %3882  ;;  %v3880_v32 = vadd.f32 %v3879_v54, %v3874_v4  ;;  %v3913_v36 = vpop.permute.xlu0 %3912 }
0x2899   : > { %v3885_v52 = vmul.f32 %v5622_v15, %v3883_v13  ;;  %v3915_v53 = vmul.f32 %v5646_v47, %v3913_v36 }
0x289b   : > { %v3886_v40 = vadd.f32 %v3885_v52, %v3880_v32 }
0x289d   : > { %v3889_v24 = vpop.permute.xlu1 %3888 }
0x289e   : > { %v3891_v49 = vmul.f32 %v5628_v19, %v3889_v24 }
0x28a0   : > { %v3892_v51 = vadd.f32 %v3891_v49, %v3886_v40 }
0x28a2   : > { %v3901_v63 = vpop.permute.xlu1 %3900  ;;  %v3898_v8 = vadd.f32 %v3897_v14, %v3892_v51 }
0x28a3   : > { %v3903_v17 = vmul.f32 %v5637_v28, %v3901_v63 }
0x28a5   : > { %v3904_v10 = vadd.f32 %v3903_v17, %v3898_v8 }
0x28a7   : > { %v3907_v27 = vpop.permute.xlu1 %3906 }
0x28a8   : > { %v3909_v29 = vmul.f32 %v5643_v43, %v3907_v27 }
0x28aa   : > { %v3910_v4 = vadd.f32 %v3909_v29, %v3904_v10 }
0x28ac   : > { %v3919_v54 = vpop.permute.xlu1 %3918  ;;  %v3916_v13 = vadd.f32 %v3915_v53, %v3910_v4 }
0x28ad   : > { %v3921_v32 = vmul.f32 %v5653_v55, %v3919_v54 }
0x28af   : > { %v3922_v24 = vadd.f32 %v3921_v32, %v3916_v13 }
0x28b1   : > { %v3925_v52 = vpop.permute.xlu1 %3924 }
0x28b2   : > { %v3927_v40 = vmul.f32 %v5656_v59, %v3925_v52 }
0x28b4   : > { %v3928_v49 = vadd.f32 %v3927_v40, %v3922_v24 }
0x28b5   : > { %v4003_v51 = vpop.permute.xlu1 %4002 }
0x28b6   : > { %v3929_v16 = vsel %vm749_vm6, %v3928_v49, -inf }
0x28b7   : > { %3930 = vmax.xlane.f32.xlu0 %v3929_v16 }
0x28b9   : > { %v4001_v14 = vpop.permute.xlu1 %4000 }
0x28ba   : > { %v4005_v63 = vsel %vm604_vm2, %v6381_v34, %v4001_v14 }
0x28cd   : > { %3941 = vrot.lane.b32.xlu0 %v6328_v11, %s5370_s23 }
0x28d1   : > { %4009 = vrot.lane.b32.xlu0 %v4005_v63, %s5366_s10 }
0x28d5   : > { %4006 = vrot.lane.b32.xlu0 %v6394_v42, %s5366_s10 }
0x2940   : > { %v3931_v8 = vpop.xlane.xlu0 %3930 }
0x2941   : > { %v3932_v17 = vsub.f32 %v3928_v49, %v3931_v8 }
0x2943   : > { %v3933_v27 = vmul.f32 1.442695, %v3932_v17 }
0x2944   : > { %v3942_v10 = vpop.permute.xlu0 %3941 }
0x2945   : > { %5246 = vpow2.f32 %v3933_v27  ;;  %v3947_v29 = vsel %vm604_vm2, %v3942_v10, 0 }
0x2946   : > { %4791 = vmatpush3.bf16.msra.mxu1 %v3947_v29 }
0x2947   : > { %4796 = vmatprep.subr.bf16.mxu1 %v5351_v23 }
0x2948   : > { %v4010_v52 = vpop.permute.xlu0 %4009 }
0x2949   : > { %v4017_v24 = vsel %vm608_vm0, %v4010_v52, 0 }
0x294c   : > { %v4007_v40 = vpop.permute.xlu0 %4006 }
0x2952   : > { %v5247_v36 = vpop.eup %5246 }
0x2953   : > { %v3935_v4 = vsel %vm749_vm6, %v5247_v36, 0.0 }
0x2954   : > { %3936 = vadd.xlane.f32.xlu1 %v3935_v4 }
0x2965   : > { %4011 = vrot.lane.b32.xlu1 %v4003_v51, %s5366_s10 }
0x29dd   : > { %v3937_v34 = vpop.xlane.xlu1 %3936 }
0x29de   : > { %5248 = vrcp.f32 %v3937_v34 }
0x29e1   : > { %v4012_v42 = vpop.permute.xlu1 %4011 }
0x29e2   : > { %v4020_v13 = vsel %vm608_vm0, %v4012_v42, 0 }
0x29eb   : > { %v5249_v53 = vpop.eup %5248 }
0x29ec   : > { %v3939_v54 = vmul.f32 %v5249_v53, %v5247_v36 }
0x29ee   : > { %v3940_v32 = vpack.c.bf16 %v3939_v54, %v3939_v54 }
0x29f0   : > { %4793 = vmatmul.mubr.msk.bf16.vlgmr.msra.gmra.mxu1 %vm749_vm6, %v3940_v32 }
0x29f1   : > { %4797 = vmatpush3.bf16.xpose.msra.mxu1 %v4020_v13  ;;  %4800 = vmatprep.mubr.msk.bf16.mxu1 %vm5352_vm1, %v5351_v23  ;;  %vm1501_vm1 = vcmask 523264  }
0x29f2   : > { %4798 = vmatprep.subr.bf16.mxu1 %v5351_v23 }
0x29f9   : > { %4799 = vmatpush3.bf16.xpose.msra.mxu1 %v4017_v24 }
0x2a00   : > { %4801 = vmatmul.mubr.msk.bf16.vlgmr.msra.gmra.mxu1 %vm608_vm0, %v4007_v40 }
0x2ab0   : > { %v6587_v49 = vpop.f32.mrf.mxu1 }
0x2ab2   : > { %v4794_v16 = vpop.f32.mrf.mxu1 }
0x2ab4   : > { %v3986_v51 = vpop.f32.mrf.mxu1 }
0x2ab6   : > { %v4795_v14 = vpop.f32.mrf.mxu1 }
0x2ac0   : > { %v4056_v63 = vpop.f32.mrf.mxu1 }
0x2ac1   : > { %4071 = vperm.xlu1 %5111, %v4056_v63   ;;  %4065 = vperm.xlu0 %5110, %v4056_v63  }
0x2ac2   : > { %v4802_v8 = vpop.f32.mrf.mxu1 }
0x2ac4   : > { %v4059_v17 = vpop.f32.mrf.mxu1 }
0x2ac5   : > { %5112 = vset.pattern.permute.xlu1 %v5353_v26  ;;  %5113 = vset.pattern.permute.xlu0 %v6746_v62  ;;  %v6749_v26 = vmov 17  }
0x2ac6   : > { %4077 = vperm.xlu1 %5112, %v4056_v63   ;;  %4083 = vperm.xlu0 %5113, %v4056_v63   ;;  %v4803_v23 = vpop.f32.mrf.mxu1 }
0x2aca   : > { %5114 = vset.pattern.permute.xlu1 %v5357_v1  ;;  %5116 = vset.pattern.permute.xlu0 %v5359_v3  ;;  %v6750_v1 = vmov 19  }
0x2acb   : > { %4089 = vperm.xlu1 %5114, %v4056_v63   ;;  %4101 = vperm.xlu0 %5116, %v4056_v63  }
0x2acf   : > { %5115 = vset.pattern.permute.xlu1 %v5358_v2  ;;  %5119 = vset.pattern.permute.xlu0 %v5363_v7 }
0x2ad0   : > { %4095 = vperm.xlu1 %5115, %v4056_v63   ;;  %4119 = vperm.xlu0 %5119, %v4056_v63  }
0x2ad4   : > { %5117 = vset.pattern.permute.xlu1 %v5361_v5  ;;  %5122 = vset.pattern.permute.xlu0 %v5367_v12  ;;  %v4062_v5 = vadd.f32 %v4056_v63, %v6428_v25 }
0x2ad5   : > { %4107 = vperm.xlu1 %5117, %v4056_v63   ;;  %4137 = vperm.xlu0 %5122, %v4056_v63  }
0x2ad9   : > { %5118 = vset.pattern.permute.xlu1 %v6749_v26  ;;  %5125 = vset.pattern.permute.xlu0 %v6745_v57 }
0x2ada   : > { %4113 = vperm.xlu1 %5118, %v4056_v63  }
0x2ade   : > { %5120 = vset.pattern.permute.xlu1 %v6750_v1 }
0x2adf   : > { %4125 = vperm.xlu1 %5120, %v4056_v63  }
0x2ae3   : > { %5121 = vset.pattern.permute.xlu1 %v6747_v6 }
0x2ae4   : > { %4131 = vperm.xlu1 %5121, %v4056_v63  }
0x2ae8   : > { %5123 = vset.pattern.permute.xlu1 %v6744_v46 }
0x2ae9   : > { %4143 = vperm.xlu1 %5123, %v4056_v63  }
0x2aed   : > { %5124 = vset.pattern.permute.xlu1 %v6745_v57 }
0x2aee   : > { %4149 = vperm.xlu1 %5124, %v4056_v63  }
0x2b3c   : > { %v4072_v2 = vpop.permute.xlu1 %4071  ;;  %v4066_v3 = vpop.permute.xlu0 %4065 }
0x2b3d   : > { %v4068_v7 = vmul.f32 %v5580_v33, %v4066_v3  ;;  %v4074_v12 = vmul.f32 %v5591_v37, %v4072_v2 }
0x2b3f   : > { %v4069_v62 = vadd.f32 %v4068_v7, %v4062_v5 }
0x2b41   : > { %v4078_v27 = vpop.permute.xlu1 %4077  ;;  %v4075_v10 = vadd.f32 %v4074_v12, %v4069_v62  ;;  %v4084_v29 = vpop.permute.xlu0 %4083 }
0x2b42   : > { %v4080_v6 = vmul.f32 %v5597_v39, %v4078_v27  ;;  %v4086_v46 = vmul.f32 %v5602_v45, %v4084_v29 }
0x2b44   : > { %v4081_v36 = vadd.f32 %v4080_v6, %v4075_v10 }
0x2b46   : > { %v4090_v4 = vpop.permute.xlu1 %4089  ;;  %v4087_v57 = vadd.f32 %v4086_v46, %v4081_v36  ;;  %v4102_v33 = vpop.permute.xlu0 %4101 }
0x2b47   : > { %v4092_v34 = vmul.f32 %v5606_v48, %v4090_v4  ;;  %v4104_v37 = vmul.f32 %v5616_v61, %v4102_v33 }
0x2b49   : > { %v4093_v42 = vadd.f32 %v4092_v34, %v4087_v57 }
0x2b4b   : > { %v4096_v53 = vpop.permute.xlu1 %4095  ;;  %v4120_v40 = vpop.permute.xlu0 %4119 }
0x2b4c   : > { %v4098_v25 = vmul.f32 %v5613_v56, %v4096_v53  ;;  %v4122_v48 = vmul.f32 %v5631_v22, %v4120_v40 }
0x2b4e   : > { %v4099_v54 = vadd.f32 %v4098_v25, %v4093_v42 }
0x2b50   : > { %v4108_v13 = vpop.permute.xlu1 %4107  ;;  %v4105_v32 = vadd.f32 %v4104_v37, %v4099_v54  ;;  %v4138_v17 = vpop.permute.xlu0 %4137 }
0x2b51   : > { %v4110_v39 = vmul.f32 %v5622_v15, %v4108_v13  ;;  %v4140_v15 = vmul.f32 %v5646_v47, %v4138_v17 }
0x2b53   : > { %v4111_v24 = vadd.f32 %v4110_v39, %v4105_v32 }
0x2b55   : > { %v4114_v52 = vpop.permute.xlu1 %4113 }
0x2b56   : > { %v4116_v45 = vmul.f32 %v5628_v19, %v4114_v52 }
0x2b58   : > { %v4117_v16 = vadd.f32 %v4116_v45, %v4111_v24 }
0x2b5a   : > { %v4126_v51 = vpop.permute.xlu1 %4125  ;;  %v4123_v14 = vadd.f32 %v4122_v48, %v4117_v16 }
0x2b5b   : > { %v4128_v56 = vmul.f32 %v5637_v28, %v4126_v51 }
0x2b5d   : > { %v4129_v8 = vadd.f32 %v4128_v56, %v4123_v14 }
0x2b5f   : > { %v4132_v63 = vpop.permute.xlu1 %4131 }
0x2b60   : > { %v4134_v61 = vmul.f32 %v5643_v43, %v4132_v63 }
0x2b62   : > { %v4135_v23 = vadd.f32 %v4134_v61, %v4129_v8 }
0x2b64   : > { %v4144_v26 = vpop.permute.xlu1 %4143  ;;  %v4141_v1 = vadd.f32 %v4140_v15, %v4135_v23 }
0x2b65   : > { %v4146_v19 = vmul.f32 %v5653_v55, %v4144_v26 }
0x2b67   : > { %v4147_v3 = vadd.f32 %v4146_v19, %v4141_v1 }
0x2b69   : > { %v4150_v2 = vpop.permute.xlu1 %4149 }
0x2b6a   : > { %v4152_v22 = vmul.f32 %v5656_v59, %v4150_v2 }
0x2b6c   : > { %v4153_v5 = vadd.f32 %v4152_v22, %v4147_v3 }
0x2b6e   : > { %v4154_v7 = vsel %vm749_vm6, %v4153_v5, -inf }
0x2b6f   : > { %4155 = vmax.xlane.f32.xlu0 %v4154_v7 }
0x2b85   : > { %4166 = vrot.lane.b32.xlu0 %v6328_v11, %s5366_s10 }
0x2b89   : > { %2399 = vrot.lane.b32.xlu0 %v6010_v60, %s5366_s10 }
0x2b8d   : > { %4215 = vrot.lane.b32.xlu0 %v6527_v41, %s5366_s10 }
0x2b91   : > { %2403 = vrot.lane.b32.xlu0 %v6076_v35, %s5370_s23 }
0x2b95   : > { %4219 = vrot.lane.b32.xlu0 %v6587_v49, %s5370_s23 }
0x2b99   : > { %2407 = vrot.lane.b32.xlu0 %v6140_v58, %s5369_s15 }
0x2bf8   : > { %v4156_v28 = vpop.xlane.xlu0 %4155 }
0x2bf9   : > { %v4157_v43 = vsub.f32 %v4153_v5, %v4156_v28 }
0x2bfb   : > { %v4158_v47 = vmul.f32 1.442695, %v4157_v43 }
0x2bfc   : > { %v4167_v55 = vpop.permute.xlu0 %4166 }
0x2bfd   : > { %5250 = vpow2.f32 %v4158_v47  ;;  %v4172_v59 = vsel %vm604_vm2, %v4167_v55, 0 }
0x2bfe   : > { %4805 = vmatpush3.bf16.msra.mxu0 %v4172_v59 }
0x2c00   : > { %v2400_v60 = vpop.permute.xlu0 %2399 }
0x2c01   : > { %v2410_v27 = vsel %vm608_vm0, %v5947_v18, %v2400_v60 }
0x2c04   : > { %v4216_v11 = vpop.permute.xlu0 %4215 }
0x2c05   : > { %v4226_v49 = vsel %vm608_vm0, %v6464_v0, %v4216_v11 }
0x2c08   : > { %v2404_v41 = vpop.permute.xlu0 %2403 }
0x2c09   : > { %v2411_v10 = vsel %vm1501_vm1, %v2410_v27, %v2404_v41 }
0x2c0a   : > { %v5251_v35 = vpop.eup %5250 }
0x2c0b   : > { %v4160_v12 = vsel %vm749_vm6, %v5251_v35, 0.0 }
0x2c0c   : > { %4161 = vadd.xlane.f32.xlu1 %v4160_v12  ;;  %v4220_v58 = vpop.permute.xlu0 %4219 }
0x2c0d   : > { %v4227_v62 = vsel %vm1501_vm1, %v4226_v49, %v4220_v58 }
0x2c10   : > { %v2408_v6 = vpop.permute.xlu0 %2407 }
0x2c11   : > { %v2412_v29 = vsel %vm1503_vm7, %v2411_v10, %v2408_v6 }
0x2c12   : > { %4417 = vst [vmem:[%s6644_s14 + $0x8] sm:$0xff] %v2412_v29 }
0x2c1d   : > { %1489 = vrot.lane.b32.xlu1 %v5750_v50, %s5366_s10 }
0x2c21   : > { %3306 = vrot.lane.b32.xlu1 %v6267_v20, %s5366_s10  ;;  %s4245_s10 = sshll.u32 %s6644_s14, 4  ;;  %s6673_s10 = int_to_ptr.vmem [resolvable:$true] %s4245_s10 }
0x2c22   : > { %s5281_s26 = scalar_lea.vmem %s6673_s10, 512 }
0x2c23   : > { %p5282_p8 = scmp.ne.s32.totalorder %s6673_s10, %s5281_s26 }
0x2c25   : > { %1493 = vrot.lane.b32.xlu1 %v5819_v31, %s5370_s23  ;;  %p5283_p9 = pnand %p5282_p8, %p5442_p5 }
0x2c27   : > { %p5284_p10 = pneg %p5283_p9 }
0x2c29   : > { %3310 = vrot.lane.b32.xlu1 %v6336_v38, %s5370_s23  ;;  %s4475_s23 = sshll.u32 %s5425_s22, 9  ;;  %s5371_s22 = smov [#allocation5]  }
0x2c2a   : > { %s6678_s25 = scalar_lea.hbm %s6729_s5, %s4475_s23  ;;  %s5285_s30 = sshll.u32 %s5371_s22, 4  ;;  %s5286_s30 = int_to_ptr.vmem [resolvable:$false] %s5285_s30 }
0x2c2b   : > { %s5287_s6 = scalar_lea.vmem %s5286_s30, 1024  ;;  %p5288_p11 = scmp.lt.s32.totalorder %s6673_s10, %s5286_s30 }
0x2c2c   : > { %p5289_p12 = scmp.lt.s32.totalorder %s5287_s6, %s5281_s26 }
0x2c2d   : > { %1497 = vrot.lane.b32.xlu1 %v5883_v44, %s5369_s15 }
0x2c2e   : > { %p5290_p13 = por %p5289_p12, %p5288_p11 }
0x2c30   : > { %p5291_p0 = pnand %p5290_p13, %p5284_p10 }
0x2c31   : > { %3314 = vrot.lane.b32.xlu1 %v6400_v21, %s5369_s15 }
0x2c95   : > { %v4162_v18 = vpop.xlane.xlu1 %4161 }
0x2c96   : > { %5252 = vrcp.f32 %v4162_v18 }
0x2c99   : > { %v1490_v0 = vpop.permute.xlu1 %1489 }
0x2c9a   : > { %v1500_v38 = vsel %vm608_vm0, %v5687_v30, %v1490_v0 }
0x2c9d   : > { %v3307_v50 = vpop.permute.xlu1 %3306 }
0x2c9e   : > { %v3317_v34 = vsel %vm608_vm0, %v6199_v9, %v3307_v50 }
0x2ca1   : > { %v1494_v36 = vpop.permute.xlu1 %1493 }
0x2ca2   : > { %v1502_v44 = vsel %vm1501_vm1, %v1500_v38, %v1494_v36 }
0x2ca3   : > { %v5253_v20 = vpop.eup %5252 }
0x2ca4   : > { %v4164_v46 = vmul.f32 %v5253_v20, %v5251_v35 }
0x2ca5   : > { %v3311_v4 = vpop.permute.xlu1 %3310 }
0x2ca6   : > { %v4165_v31 = vpack.c.bf16 %v4164_v46, %v4164_v46  ;;  %v3318_v53 = vsel %vm1501_vm1, %v3317_v34, %v3311_v4 }
0x2ca8   : > { %4807 = vmatmul.mubr.msk.bf16.vlgmr.msra.gmra.mxu0 %vm749_vm6, %v4165_v31 }
0x2ca9   : > { %v1498_v21 = vpop.permute.xlu1 %1497 }
0x2caa   : > { %v1504_v57 = vsel %vm1503_vm7, %v1502_v44, %v1498_v21 }
0x2cab   : > { %1505 = vst [vmem:[%s6644_s14] sm:$0xff] %v1504_v57 }
0x2cad   : > { %v3315_v42 = vpop.permute.xlu1 %3314 }
0x2cae   : > { %v3319_v30 = vsel %vm1503_vm7, %v3318_v53, %v3315_v42 }
0x2caf   : > { %4443 = vst [vmem:[%s6644_s14 + $0x10] sm:$0xff] %v3319_v30 }
0x2d68   : > { %v4208_v25 = vpop.f32.mrf.mxu0 }
0x2d69   : > { %4223 = vrot.lane.b32.xlu0 %v4208_v25, %s5369_s15  ;;  %s6684_s15 = scalar_lea.sflag [#allocation4], %s231_s12 }
0x2d6a   : > { %v4808_v33 = vpop.f32.mrf.mxu0 }
0x2d6c   : > { %v4211_v54 = vpop.f32.mrf.mxu0 }
0x2d6e   : > { %v4809_v37 = vpop.f32.mrf.mxu0 }
0x2ddb   : > { %v4224_v9 = vpop.permute.xlu0 %4223 }
0x2ddc   : > { %v4228_v13 = vsel %vm1503_vm7, %v4227_v62, %v4224_v9 }
0x2ddd   : > { %4469 = vst [vmem:[%s6644_s14 + $0x18] sm:$0xff] %v4228_v13 }
0x2dde   : > { %5294 = shalt.err (!%p5291_p0)
}
0x2ddf   : > { %s5295_s7 = scalar_lea.hbm %s6678_s25, 512  ;;  %s5299_s11 = scalar_lea.hbm %s6729_s5, 1024 }
0x2de0   : > { %p5296_p1 = scmp.ne.s32.totalorder %s6678_s25, %s5295_s7  ;;  %p5300_p4 = scmp.lt.s32.totalorder %s6678_s25, %s6729_s5 }
0x2de1   : > { %p5301_p7 = scmp.lt.s32.totalorder %s5299_s11, %s5295_s7 }
0x2de2   : > { %p5297_p2 = pnand %p5296_p1, %p5442_p5 }
0x2de3   : > { %p5302_p6 = por %p5301_p7, %p5300_p4 }
0x2de4   : > { %p5298_p3 = pneg %p5297_p2 }
0x2de6   : > { %p5303_p8 = pnand %p5302_p6, %p5298_p3 }
0x2de8   : > { %5306 = shalt.err (!%p5303_p8)
}
0x2de9   : > { %s5372_s14 = smov 128   ;;  %s5373_s23 = smov 8  }
0x2dea   : > { %4814 = dma.vmem_to_hbm [thread:$0]  (%p5442_p5), %s6673_s10, 512, %s6678_s25, %s6684_s15, %s5372_s14, %s5372_s14, %s5373_s23  }
0x2deb PF: > { %p4826_p9 = scmp.ge.s32.totalorder %s5345_s21, 2  ;;  %s4260_s16 = sand.u32 1, %s5333_s18  }
0x2dec   : > { %p6751_p10 = scmp.ne.s32.totalorder %s6742_s29, 0  ;;  %s4261_s17 = scalar_lea.sflag [#allocation4], %s4260_s16 }
0x2dee   : > { %p4821_p11 = pnand %p4826_p9, %p6751_p10 }
0x2df0   : > { %p4822_p12 = pneg %p4821_p11 }
0x2df2   : > { %5328 = dma.done.wait (%p4822_p12), %s4261_s17, 512  }
0x2df3   : > { %5330 = vsyncadd (%p4822_p12), %s4261_s17, 4294966784  ;;  %p16_p13 = scmp.ge.s32.totalorder %s5429_s24, 4   ;;  %s6752_s18 = smov %s5337_s19 }
0x2df4   : > { %s6753_s19 = smov %s5341_s20  ;;  %s6754_s20 = smov %s5440_s27 }
0x2df5   : > { %s6755_s21 = smov %s5429_s24  ;;  %18 = sbr.rel (!%p16_p13) target bundleno = 4 (0x4), region = 86 }
0x2dfa   :  { %4266 = vsyncpa [#allocation3], 1 }
0x2dfb   :  { %4268 = vsyncpa [#allocation3 + $0x1], 1 }
0x2dfc   :  { %4269 = vsyncpa [#allocation4], 1 }
0x2dfd   :  { %4271 = vsyncpa [#allocation4 + $0x1], 1 }

</bundles_post_ra>
